<compile_context>
chip_gen: v5e
topology: v5e:2x2
jax: 0.10.0
libtpu: 0.0.40
codegen_flags: <defaults>
</compile_context>

<pallas_src>
import functools
import numpy as np
import jax
import jax.numpy as jnp
from jax.experimental import pallas as pl
from jax.experimental.pallas import tpu as pltpu

LANE = 128
_PAR = pltpu.CompilerParams(dimension_semantics=("parallel",))


def _round_up(x, m):
    return ((x + m - 1) // m) * m


# ----------------------------- Pallas kernels -----------------------------

def _pw_conv_bias_relu_kernel(x_ref, w_ref, b_ref, o_ref):
    # x: (tm, Cin), w: (Cin, Cout) with BN scale pre-folded, b: (1, Cout)
    y = jnp.dot(x_ref[...], w_ref[...], preferred_element_type=jnp.float32)
    y = y + b_ref[...]
    o_ref[...] = jnp.maximum(y, 0.0).astype(o_ref.dtype)


def pointwise_conv_bn_relu(x2d, w_folded, bias):
    """ReLU((M, Cin) @ (Cin, Cout) + bias). BN scale is folded into w_folded."""
    M, Cin = x2d.shape
    Cout = w_folded.shape[1]
    tm = min(256, _round_up(M, 8))
    Mp = _round_up(M, tm)
    if Mp != M:
        x2d = jnp.pad(x2d, ((0, Mp - M), (0, 0)))
    out = pl.pallas_call(
        _pw_conv_bias_relu_kernel,
        out_shape=jax.ShapeDtypeStruct((Mp, Cout), jnp.float32),
        grid=(Mp // tm,),
        in_specs=[
            pl.BlockSpec((tm, Cin), lambda i: (i, 0)),
            pl.BlockSpec((Cin, Cout), lambda i: (0, 0)),
            pl.BlockSpec((1, Cout), lambda i: (0, 0)),
        ],
        out_specs=pl.BlockSpec((tm, Cout), lambda i: (i, 0)),
        compiler_params=_PAR,
    )(x2d, w_folded, bias)
    return out if Mp == M else out[:M]


def _row_pass_kernel(k_ref, x_ref, o_ref):
    # k: (Ho, Hi), x: (1, Hi, Wi*C) -> o: (1, Ho, Wi*C)   (one lane-dense MXU matmul)
    o_ref[0] = jnp.dot(k_ref[...], x_ref[0],
                       preferred_element_type=jnp.float32).astype(o_ref.dtype)


def row_pass(rh, x_nhwc):
    """t[n,ho,wi,c] = sum_hi rh[ho,hi] * x[n,hi,wi,c]."""
    rh = jnp.asarray(rh, jnp.float32)
    N, Hi, Wi, C = x_nhwc.shape
    Ho = rh.shape[0]
    t = pl.pallas_call(
        _row_pass_kernel,
        out_shape=jax.ShapeDtypeStruct((N, Ho, Wi * C), jnp.float32),
        grid=(N,),
        in_specs=[
            pl.BlockSpec((Ho, Hi), lambda n: (0, 0)),
            pl.BlockSpec((1, Hi, Wi * C), lambda n: (n, 0, 0)),
        ],
        out_specs=pl.BlockSpec((1, Ho, Wi * C), lambda n: (n, 0, 0)),
        compiler_params=_PAR,
    )(rh, x_nhwc.reshape(N, Hi, Wi * C))
    return t.reshape(N, Ho, Wi, C)                       # free host reshape


def _col_pass_kernel(k_ref, t_ref, o_ref):
    # k: (Wo, Wi), t: (1, Ho, Wi, C) -> o: (1, Ho, Wo, C)
    kv = k_ref[...]
    for h in range(t_ref.shape[1]):
        o_ref[0, h] = jnp.dot(kv, t_ref[0, h],
                              preferred_element_type=jnp.float32).astype(o_ref.dtype)


def _col_pass_res_kernel(k_ref, t_ref, r_ref, o_ref):
    # same as _col_pass_kernel with a fused residual add
    kv = k_ref[...]
    for h in range(t_ref.shape[1]):
        y = jnp.dot(kv, t_ref[0, h], preferred_element_type=jnp.float32) + r_ref[0, h]
        o_ref[0, h] = y.astype(o_ref.dtype)


def _col_pass_gmean_kernel(k_ref, t_ref, m_ref, o_ref, *, inv_w):
    # column pass with the pool1 (global-mean broadcast) residual fused in.
    # m: (1, 1, Wi, C) = per-column means along H (from the stacked row pass).
    kv = k_ref[...]
    gm = jnp.sum(m_ref[0, 0], axis=0, keepdims=True) * inv_w        # (1, C)
    for h in range(t_ref.shape[1]):
        y = jnp.dot(kv, t_ref[0, h], preferred_element_type=jnp.float32) + gm
        o_ref[0, h] = y.astype(o_ref.dtype)


def col_pass(rw, t_nhwc, residual=None, mean_rows=None, inv_w=None):
    """out[n,ho,wo,c] = sum_wi rw[wo,wi] * t[n,ho,wi,c]  (+ residual / + global mean)."""
    rw = jnp.asarray(rw, jnp.float32)
    N, Ho, Wi, C = t_nhwc.shape
    Wo = rw.shape[0]
    out_shape = jax.ShapeDtypeStruct((N, Ho, Wo, C), jnp.float32)
    k_spec = pl.BlockSpec((Wo, Wi), lambda n: (0, 0))
    t_spec = pl.BlockSpec((1, Ho, Wi, C), lambda n: (n, 0, 0, 0))
    o_spec = pl.BlockSpec((1, Ho, Wo, C), lambda n: (n, 0, 0, 0))
    if mean_rows is not None:
        m_spec = pl.BlockSpec((1, 1, Wi, C), lambda n: (n, 0, 0, 0))
        return pl.pallas_call(
            functools.partial(_col_pass_gmean_kernel, inv_w=float(inv_w)),
            out_shape=out_shape, grid=(N,),
            in_specs=[k_spec, t_spec, m_spec], out_specs=o_spec, compiler_params=_PAR,
        )(rw, t_nhwc, mean_rows)
    if residual is not None:
        return pl.pallas_call(
            _col_pass_res_kernel, out_shape=out_shape, grid=(N,),
            in_specs=[k_spec, t_spec, o_spec], out_specs=o_spec, compiler_params=_PAR,
        )(rw, t_nhwc, residual)
    return pl.pallas_call(
        _col_pass_kernel, out_shape=out_shape, grid=(N,),
        in_specs=[k_spec, t_spec], out_specs=o_spec, compiler_params=_PAR,
    )(rw, t_nhwc)


def separable_spatial(rh, rw, x_nhwc, residual=None):
    """Separable spatial resample (bilinear / avg-pool) with an optional fused residual."""
    return col_pass(rw, row_pass(rh, x_nhwc), residual=residual)


def _dw3x3_bn_kernel(xp_ref, w_ref, b_ref, o_ref, *, relu):
    # xp: (1, H+2, W+2, C), w: (9, C) with BN scale pre-folded, b: (1, C)
    _, Hp, Wp, C = xp_ref.shape
    H, W = Hp - 2, Wp - 2
    xv = xp_ref[0]
    wv = w_ref[...]
    acc = jnp.zeros((H, W, C), jnp.float32)
    for dy in range(3):
        for dx in range(3):
            k = dy * 3 + dx
            acc = acc + xv[dy:dy + H, dx:dx + W, :] * wv[k:k + 1, :][None]
    y = acc + b_ref[...][None]
    if relu:
        y = jnp.maximum(y, 0.0)
    o_ref[0] = y.astype(o_ref.dtype)


def depthwise3x3_bn(x_nhwc, w9_folded, bias, relu):
    N, H, W, C = x_nhwc.shape
    # TODO(synk): fold the pad into the producing kernel / row-tile with a halo at
    # large resolutions; the depthwise inputs here are small pooled grids.
    xp = jnp.pad(x_nhwc, ((0, 0), (1, 1), (1, 1), (0, 0)))
    return pl.pallas_call(
        functools.partial(_dw3x3_bn_kernel, relu=relu),
        out_shape=jax.ShapeDtypeStruct((N, H, W, C), jnp.float32),
        grid=(N,),
        in_specs=[
            pl.BlockSpec((1, H + 2, W + 2, C), lambda n: (n, 0, 0, 0)),
            pl.BlockSpec((9, C), lambda n: (0, 0)),
            pl.BlockSpec((1, C), lambda n: (0, 0)),
        ],
        out_specs=pl.BlockSpec((1, H, W, C), lambda n: (n, 0, 0, 0)),
        compiler_params=_PAR,
    )(xp, w9_folded, bias)


def _process8_kernel(xp_ref, dw_w_ref, dw_b_ref, pw_w_ref, pw_b_ref, o_ref):
    # process8 fused: depthwise 3x3 + BN (no ReLU) -> 1x1 conv + BN + ReLU.
    _, Hp, Wp, C = xp_ref.shape
    H, W = Hp - 2, Wp - 2
    xv = xp_ref[0]
    wv = dw_w_ref[...]
    acc = jnp.zeros((H, W, C), jnp.float32)
    for dy in range(3):
        for dx in range(3):
            k = dy * 3 + dx
            acc = acc + xv[dy:dy + H, dx:dx + W, :] * wv[k:k + 1, :][None]
    y = acc + dw_b_ref[...][None]                          # BN affine, no ReLU
    pw = pw_w_ref[...]
    pb = pw_b_ref[...]
    for h in range(H):                                     # per-row (W,C)@(C,C) matmuls
        row = jnp.dot(y[h], pw, preferred_element_type=jnp.float32) + pb
        o_ref[0, h] = jnp.maximum(row, 0.0).astype(o_ref.dtype)


def process8_fused(x_nhwc, dw_w, dw_b, pw_w, pw_b):
    N, H, W, C = x_nhwc.shape
    xp = jnp.pad(x_nhwc, ((0, 0), (1, 1), (1, 1), (0, 0)))
    return pl.pallas_call(
        _process8_kernel,
        out_shape=jax.ShapeDtypeStruct((N, H, W, C), jnp.float32),
        grid=(N,),
        in_specs=[
            pl.BlockSpec((1, H + 2, W + 2, C), lambda n: (n, 0, 0, 0)),
            pl.BlockSpec((9, C), lambda n: (0, 0)),
            pl.BlockSpec((1, C), lambda n: (0, 0)),
            pl.BlockSpec((C, C), lambda n: (0, 0)),
            pl.BlockSpec((1, C), lambda n: (0, 0)),
        ],
        out_specs=pl.BlockSpec((1, H, W, C), lambda n: (n, 0, 0, 0)),
        compiler_params=_PAR,
    )(xp, dw_w, dw_b, pw_w, pw_b)


# ------------------ 1-D separable operator builders (cached host glue) ------------------

@functools.lru_cache(maxsize=None)
def _bilinear_1d(in_size, out_size):
    # F.interpolate(mode='bilinear', align_corners=False) weights along one axis
    Wm = np.zeros((out_size, in_size), dtype=np.float32)
    if in_size == 1:
        Wm[:, 0] = 1.0
        return Wm
    scale = in_size / out_size
    for o in range(out_size):
        src = (o + 0.5) * scale - 0.5
        src = max(src, 0.0)
        i0 = min(int(np.floor(src)), in_size - 1)
        i1 = min(i0 + 1, in_size - 1)
        l1 = src - i0
        Wm[o, i0] += 1.0 - l1
        Wm[o, i1] += l1
    return Wm


@functools.lru_cache(maxsize=None)
def _avgpool_1d(in_size, k, s, p):
    # one axis of AvgPool2d (count_include_pad=True, ceil_mode=False); includes 1/k so
    # the separable product of the two axes carries the full 1/k^2 divisor.
    out_size = (in_size + 2 * p - k) // s + 1
    Pm = np.zeros((out_size, in_size), dtype=np.float32)
    for o in range(out_size):
        start = o * s - p
        for i in range(start, start + k):
            if 0 <= i < in_size:
                Pm[o, i] += 1.0
    return Pm / float(k), out_size


# ----------------------------- parameters -----------------------------

def fold_bn(gamma, beta, mean, var, eps=1e-5):
    scale = gamma / jnp.sqrt(var + eps)
    bias = beta - mean * scale
    return scale.astype(jnp.float32), bias.astype(jnp.float32)


def _pad2(a, rows, cols):
    return jnp.pad(a, ((0, rows - a.shape[0]), (0, cols - a.shape[1]))).astype(jnp.float32)


def init_params(key, inplanes, outplanes):
    cin_p = _round_up(inplanes, LANE)
    cout_p = _round_up(outplanes, LANE)
    keys = iter(jax.random.split(key, 32))

    def nrm(shape, std=0.1):
        return (jax.random.normal(next(keys), shape) * std).astype(jnp.float32)

    def bn():
        gamma = jax.random.uniform(next(keys), (outplanes,), minval=0.5, maxval=1.5)
        beta = jax.random.normal(next(keys), (outplanes,)) * 0.1
        mean = jax.random.normal(next(keys), (outplanes,)) * 0.1
        var = jax.random.uniform(next(keys), (outplanes,), minval=0.5, maxval=1.5)
        return fold_bn(gamma, beta, mean, var)

    p = {}
    # self.dim : 1x1 conv + BN + ReLU  (BN scale folded into w; channels lane-padded)
    w = nrm((inplanes, outplanes)); s, b = bn()
    p['dim_w'] = _pad2(w * s[None, :], cin_p, cout_p)
    p['dim_b'] = _pad2(b[None, :], 1, cout_p)
    # process2 / process4 : depthwise 3x3 + BN + ReLU
    for name in ('p2', 'p4'):
        w = nrm((9, outplanes)); s, b = bn()
        p[f'{name}_w'] = _pad2(w * s[None, :], 9, cout_p)
        p[f'{name}_b'] = _pad2(b[None, :], 1, cout_p)
    # process8 : depthwise 3x3 + BN (no ReLU), then 1x1 conv + BN + ReLU
    w = nrm((9, outplanes)); s, b = bn()
    p['p8_dw_w'] = _pad2(w * s[None, :], 9, cout_p)
    p['p8_dw_b'] = _pad2(b[None, :], 1, cout_p)
    w = nrm((outplanes, outplanes)); s, b = bn()
    p['p8_pw_w'] = _pad2(w * s[None, :], cout_p, cout_p)
    p['p8_pw_b'] = _pad2(b[None, :], 1, cout_p)
    return p


# ----------------------------- forward -----------------------------

def newelppm_forward(x_nchw, params, out_channels):
    N, Cin, H, W = x_nchw.shape
    cin_p, cp = params['dim_w'].shape
    x = jnp.transpose(x_nchw, (0, 2, 3, 1)).astype(jnp.float32)      # NHWC
    if cin_p != Cin:
        x = jnp.pad(x, ((0, 0), (0, 0), (0, 0), (0, cin_p - Cin)))   # lane-pad channels

    # self.dim: 1x1 conv + BN + ReLU
    xd = pointwise_conv_bn_relu(x.reshape(N * H * W, cin_p),
                                params['dim_w'], params['dim_b']).reshape(N, H, W, cp)

    # pooling branches (AvgPool2d, count_include_pad=True) as separable operators
    ph2, h2 = _avgpool_1d(H, 17, 8, 8); pw2, w2 = _avgpool_1d(W, 17, 8, 8)   # self.pool2
    ph4, h4 = _avgpool_1d(H, 9, 4, 4);  pw4, w4 = _avgpool_1d(W, 9, 4, 4)    # self.pool4
    ph8, h8 = _avgpool_1d(H, 5, 2, 2);  pw8, w8 = _avgpool_1d(W, 5, 2, 2)    # self.pool8

    # one stacked row pass shared by all three pools + the global-mean (pool1) row:
    # xd is read from HBM once instead of four times.
    rh_all = np.concatenate(
        [ph2, ph4, ph8, np.full((1, H), 1.0 / H, dtype=np.float32)], axis=0)
    T = row_pass(rh_all, xd)                                 # (N, h2+h4+h8+1, W, cp)
    o2, o4, o8 = h2, h2 + h4, h2 + h4 + h8
    T2, T4, T8, Tm = T[:, :o2], T[:, o2:o4], T[:, o4:o8], T[:, o8:o8 + 1]

    # s2in = pool2(x) + bilinear-upsample(AdaptiveAvgPool(1,1)) == pool2 + global mean
    # (the global-mean broadcast is fused into the pool2 column pass).
    s2in = col_pass(pw2, T2, mean_rows=Tm, inv_w=1.0 / W)
    p4 = col_pass(pw4, T4)
    p8 = col_pass(pw8, T8)

    # process2, then upsample to the pool4 grid and add pool_list[1] (fused)
    y2 = depthwise3x3_bn(s2in, params['p2_w'], params['p2_b'], relu=True)
    s4in = separable_spatial(_bilinear_1d(h2, h4), _bilinear_1d(w2, w4), y2, residual=p4)

    # process4, then upsample to the pool8 grid and add pool_list[2] (fused)
    y4 = depthwise3x3_bn(s4in, params['p4_w'], params['p4_b'], relu=True)
    s8in = separable_spatial(_bilinear_1d(h4, h8), _bilinear_1d(w4, w8), y4, residual=p8)

    # process8 (depthwise + BN -> 1x1 conv + BN + ReLU) fused into one kernel
    y8 = process8_fused(s8in, params['p8_dw_w'], params['p8_dw_b'],
                        params['p8_pw_w'], params['p8_pw_b'])

    # x_8 = upsample to full resolution; x_f = x_8 + x (residual fused in the kernel)
    out = separable_spatial(_bilinear_1d(h8, H), _bilinear_1d(w8, W), y8, residual=xd)

    out = out[..., :out_channels]                 # drop channel/lane padding
    return jnp.transpose(out, (0, 3, 1, 2))       # back to NCHW


# ----------------------------- pure-JAX reference (no Pallas) -----------------------------

def reference_forward(x_nchw, params, out_channels):
    N, Cin, H, W = x_nchw.shape
    cin_p, cp = params['dim_w'].shape
    P = jax.lax.Precision.HIGHEST
    relu = lambda v: jnp.maximum(v, 0.0)
    x = jnp.transpose(x_nchw, (0, 2, 3, 1)).astype(jnp.float32)
    if cin_p != Cin:
        x = jnp.pad(x, ((0, 0), (0, 0), (0, 0), (0, cin_p - Cin)))
    xd = relu(jnp.einsum('nhwc,cd->nhwd', x, params['dim_w'], precision=P)
              + params['dim_b'][0])

    def sep(rh, rw, v):
        return jnp.einsum('oh,pw,nhwc->nopc', jnp.asarray(rh), jnp.asarray(rw), v,
                          precision=P)

    def dw3(v, w9, b):
        Hh, Ww = v.shape[1], v.shape[2]
        vp = jnp.pad(v, ((0, 0), (1, 1), (1, 1), (0, 0)))
        acc = jnp.zeros_like(v)
        for dy in range(3):
            for dx in range(3):
                acc = acc + vp[:, dy:dy + Hh, dx:dx + Ww, :] * w9[dy * 3 + dx][None, None, None, :]
        return acc + b[0][None, None, None, :]

    ph2, h2 = _avgpool_1d(H, 17, 8, 8); pw2, w2 = _avgpool_1d(W, 17, 8, 8)
    ph4, h4 = _avgpool_1d(H, 9, 4, 4);  pw4, w4 = _avgpool_1d(W, 9, 4, 4)
    ph8, h8 = _avgpool_1d(H, 5, 2, 2);  pw8, w8 = _avgpool_1d(W, 5, 2, 2)
    p2 = sep(ph2, pw2, xd); p4 = sep(ph4, pw4, xd); p8 = sep(ph8, pw8, xd)
    s2 = jnp.mean(xd, axis=(1, 2), keepdims=True) + p2
    y2 = relu(dw3(s2, params['p2_w'], params['p2_b']))
    s4 = sep(_bilinear_1d(h2, h4), _bilinear_1d(w2, w4), y2) + p4
    y4 = relu(dw3(s4, params['p4_w'], params['p4_b']))
    s8 = sep(_bilinear_1d(h4, h8), _bilinear_1d(w4, w8), y4) + p8
    y8 = dw3(s8, params['p8_dw_w'], params['p8_dw_b'])
    y8 = relu(jnp.einsum('nhwc,cd->nhwd', y8, params['p8_pw_w'], precision=P)
              + params['p8_pw_b'][0])
    out = sep(_bilinear_1d(h8, H), _bilinear_1d(w8, W), y8) + xd
    return jnp.transpose(out[..., :out_channels], (0, 3, 1, 2))


# ----------------------------- main -----------------------------

if __name__ == "__main__":
    N, Cin, Cout, H, W = 2, 4, 8, 16, 16
    key = jax.random.PRNGKey(0)
    kx, kp = jax.random.split(key)
    x = jax.random.normal(kx, (N, Cin, H, W), dtype=jnp.float32)
    params = init_params(kp, Cin, Cout)

    fwd = jax.jit(functools.partial(newelppm_forward, out_channels=Cout))
    out = jax.block_until_ready(fwd(x, params))

    assert out.shape == (N, Cout, H, W)
    assert bool(jnp.all(jnp.isfinite(out)))

    ref = jax.block_until_ready(reference_forward(x, params, Cout))
    np.testing.assert_allclose(np.asarray(out), np.asarray(ref), rtol=1e-3, atol=1e-3)

    print("KERNEL_OK")
</pallas_src>

<mosaic_0001>
module attributes {stable_mosaic.version = 11 : i64} {
  func.func @_pw_conv_bias_relu_kernel(%arg0: i32, %arg1: memref<256x128xf32, #tpu.memory_space<vmem>>, %arg2: memref<128x128xf32, #tpu.memory_space<vmem>>, %arg3: memref<1x128xf32, #tpu.memory_space<vmem>>, %arg4: memref<256x128xf32, #tpu.memory_space<vmem>>) attributes {dimension_semantics = [#tpu.dimension_semantics<parallel>], iteration_bounds = array<i64: 2>, scalar_prefetch = 0 : i64, scratch_operands = 0 : i64, tpu.core_type = #tpu.core_type<tc>, window_params = [{transform_indices = @transform_0, window_bounds = array<i64: 256, 128>}, {pipeline_mode = #tpu.pipeline_mode<synchronous>, transform_indices = @transform_1, window_bounds = array<i64: 128, 128>}, {pipeline_mode = #tpu.pipeline_mode<synchronous>, transform_indices = @transform_2, window_bounds = array<i64: 1, 128>}, {transform_indices = @transform_3, window_bounds = array<i64: 256, 128>}]} {
    %c0 = arith.constant 0 : index
    %c0_0 = arith.constant 0 : index
    %0 = vector.load %arg1[%c0, %c0_0] : memref<256x128xf32, #tpu.memory_space<vmem>>, vector<256x128xf32>
    %c0_1 = arith.constant 0 : index
    %c0_2 = arith.constant 0 : index
    %1 = vector.load %arg2[%c0_1, %c0_2] : memref<128x128xf32, #tpu.memory_space<vmem>>, vector<128x128xf32>
    %cst = arith.constant dense<0.000000e+00> : vector<256x128xf32>
    %2 = tpu.matmul %0, %1, %cst {dimension_numbers = #tpu.dot_dimension_numbers<[1], [0], [0], [1], [0, 0, 1, 1], [], []>} : vector<256x128xf32>, vector<128x128xf32>, vector<256x128xf32> -> vector<256x128xf32>
    %c0_3 = arith.constant 0 : index
    %c0_4 = arith.constant 0 : index
    %3 = vector.load %arg3[%c0_3, %c0_4] : memref<1x128xf32, #tpu.memory_space<vmem>>, vector<1x128xf32>
    %4 = vector.broadcast %3 : vector<1x128xf32> to vector<256x128xf32>
    %5 = arith.addf %2, %4 : vector<256x128xf32>
    %cst_5 = arith.constant 0.000000e+00 : f32
    %6 = vector.broadcast %cst_5 : f32 to vector<256x128xf32>
    %7 = arith.maximumf %5, %6 : vector<256x128xf32>
    %c0_6 = arith.constant 0 : index
    %c0_7 = arith.constant 0 : index
    %8 = vector.load %arg4[%c0_6, %c0_7] : memref<256x128xf32, #tpu.memory_space<vmem>>, vector<256x128xf32>
    tpu.vector_store %arg4[%c0_6, %c0_7], %7 {strides = array<i32>} : memref<256x128xf32, #tpu.memory_space<vmem>>, vector<256x128xf32>,
    return
  }
  func.func @transform_0(%arg0: i32) -> (i32, i32) {
    %c0_i32 = arith.constant 0 : i32
    %c0_i32_0 = arith.constant 0 : i32
    return %arg0, %c0_i32 : i32, i32
  }
  func.func @transform_1(%arg0: i32) -> (i32, i32) {
    %c0_i32 = arith.constant 0 : i32
    %c0_i32_0 = arith.constant 0 : i32
    %c0_i32_1 = arith.constant 0 : i32
    return %c0_i32, %c0_i32_0 : i32, i32
  }
  func.func @transform_2(%arg0: i32) -> (i32, i32) {
    %c0_i32 = arith.constant 0 : i32
    %c0_i32_0 = arith.constant 0 : i32
    %c0_i32_1 = arith.constant 0 : i32
    return %c0_i32, %c0_i32_0 : i32, i32
  }
  func.func @transform_3(%arg0: i32) -> (i32, i32) {
    %c0_i32 = arith.constant 0 : i32
    %c0_i32_0 = arith.constant 0 : i32
    return %arg0, %c0_i32 : i32, i32
  }
}

module attributes {stable_mosaic.version = 11 : i64} {
  func.func @_row_pass_kernel(%arg0: i32, %arg1: memref<15x16xf32, #tpu.memory_space<vmem>>, %arg2: memref<1x16x2048xf32, #tpu.memory_space<vmem>>, %arg3: memref<1x15x2048xf32, #tpu.memory_space<vmem>>) attributes {dimension_semantics = [#tpu.dimension_semantics<parallel>], iteration_bounds = array<i64: 2>, scalar_prefetch = 0 : i64, scratch_operands = 0 : i64, tpu.core_type = #tpu.core_type<tc>, window_params = [{pipeline_mode = #tpu.pipeline_mode<synchronous>, transform_indices = @transform_0, window_bounds = array<i64: 15, 16>}, {transform_indices = @transform_1, window_bounds = array<i64: 1, 16, 2048>}, {transform_indices = @transform_2, window_bounds = array<i64: 1, 15, 2048>}]} {
    %c0 = arith.constant 0 : index
    %c0_0 = arith.constant 0 : index
    %0 = vector.load %arg1[%c0, %c0_0] : memref<15x16xf32, #tpu.memory_space<vmem>>, vector<15x16xf32>
    %c0_1 = arith.constant 0 : index
    %c0_2 = arith.constant 0 : index
    %c0_3 = arith.constant 0 : index
    %1 = vector.load %arg2[%c0_1, %c0_2, %c0_3] : memref<1x16x2048xf32, #tpu.memory_space<vmem>>, vector<1x16x2048xf32>
    %2 = vector.shape_cast %1 : vector<1x16x2048xf32> to vector<16x2048xf32>
    %cst = arith.constant dense<0.000000e+00> : vector<15x2048xf32>
    %3 = tpu.matmul %0, %2, %cst {dimension_numbers = #tpu.dot_dimension_numbers<[1], [0], [0], [1], [0, 0, 1, 1], [], []>} : vector<15x16xf32>, vector<16x2048xf32>, vector<15x2048xf32> -> vector<15x2048xf32>
    %c0_4 = arith.constant 0 : index
    %c0_5 = arith.constant 0 : index
    %c0_6 = arith.constant 0 : index
    %4 = vector.load %arg3[%c0_4, %c0_5, %c0_6] : memref<1x15x2048xf32, #tpu.memory_space<vmem>>, vector<1x15x2048xf32>
    %5 = vector.shape_cast %4 : vector<1x15x2048xf32> to vector<15x2048xf32>
    %6 = vector.shape_cast %3 : vector<15x2048xf32> to vector<1x15x2048xf32>
    tpu.vector_store %arg3[%c0_4, %c0_5, %c0_6], %6 {strides = array<i32>} : memref<1x15x2048xf32, #tpu.memory_space<vmem>>, vector<1x15x2048xf32>,
    return
  }
  func.func @transform_0(%arg0: i32) -> (i32, i32) {
    %c0_i32 = arith.constant 0 : i32
    %c0_i32_0 = arith.constant 0 : i32
    %c0_i32_1 = arith.constant 0 : i32
    return %c0_i32, %c0_i32_0 : i32, i32
  }
  func.func @transform_1(%arg0: i32) -> (i32, i32, i32) {
    %c0_i32 = arith.constant 0 : i32
    %c0_i32_0 = arith.constant 0 : i32
    %c0_i32_1 = arith.constant 0 : i32
    return %arg0, %c0_i32, %c0_i32_0 : i32, i32, i32
  }
  func.func @transform_2(%arg0: i32) -> (i32, i32, i32) {
    %c0_i32 = arith.constant 0 : i32
    %c0_i32_0 = arith.constant 0 : i32
    %c0_i32_1 = arith.constant 0 : i32
    return %arg0, %c0_i32, %c0_i32_0 : i32, i32, i32
  }
}

module attributes {stable_mosaic.version = 11 : i64} {
  func.func @_col_pass_gmean_kernel(%arg0: i32, %arg1: memref<2x16xf32, #tpu.memory_space<vmem>>, %arg2: memref<1x2x16x128xf32, #tpu.memory_space<vmem>>, %arg3: memref<1x1x16x128xf32, #tpu.memory_space<vmem>>, %arg4: memref<1x2x2x128xf32, #tpu.memory_space<vmem>>) attributes {dimension_semantics = [#tpu.dimension_semantics<parallel>], iteration_bounds = array<i64: 2>, scalar_prefetch = 0 : i64, scratch_operands = 0 : i64, tpu.core_type = #tpu.core_type<tc>, window_params = [{pipeline_mode = #tpu.pipeline_mode<synchronous>, transform_indices = @transform_0, window_bounds = array<i64: 2, 16>}, {transform_indices = @transform_1, window_bounds = array<i64: 1, 2, 16, 128>}, {transform_indices = @transform_2, window_bounds = array<i64: 1, 1, 16, 128>}, {transform_indices = @transform_3, window_bounds = array<i64: 1, 2, 2, 128>}]} {
    %c0 = arith.constant 0 : index
    %c0_0 = arith.constant 0 : index
    %0 = vector.load %arg1[%c0, %c0_0] : memref<2x16xf32, #tpu.memory_space<vmem>>, vector<2x16xf32>
    %c0_1 = arith.constant 0 : index
    %c0_2 = arith.constant 0 : index
    %c0_3 = arith.constant 0 : index
    %c0_4 = arith.constant 0 : index
    %1 = vector.load %arg3[%c0_1, %c0_2, %c0_3, %c0_4] : memref<1x1x16x128xf32, #tpu.memory_space<vmem>>, vector<1x1x16x128xf32>
    %2 = vector.shape_cast %1 : vector<1x1x16x128xf32> to vector<16x128xf32>
    %cst = arith.constant dense<0.000000e+00> : vector<128xf32>
    %3 = vector.multi_reduction <add>, %2, %cst [0] : vector<16x128xf32> to vector<128xf32>
    %4 = vector.shape_cast %3 : vector<128xf32> to vector<1x128xf32>
    %cst_5 = arith.constant 6.250000e-02 : f32
    %5 = vector.broadcast %cst_5 : f32 to vector<1x128xf32>
    %6 = arith.mulf %4, %5 : vector<1x128xf32>
    %c0_6 = arith.constant 0 : index
    %c0_7 = arith.constant 0 : index
    %c0_8 = arith.constant 0 : index
    %c0_9 = arith.constant 0 : index
    %7 = vector.load %arg2[%c0_6, %c0_7, %c0_8, %c0_9] : memref<1x2x16x128xf32, #tpu.memory_space<vmem>>, vector<1x1x16x128xf32>
    %8 = vector.shape_cast %7 : vector<1x1x16x128xf32> to vector<16x128xf32>
    %cst_10 = arith.constant dense<0.000000e+00> : vector<2x128xf32>
    %9 = tpu.matmul %0, %8, %cst_10 {dimension_numbers = #tpu.dot_dimension_numbers<[1], [0], [0], [1], [0, 0, 1, 1], [], []>} : vector<2x16xf32>, vector<16x128xf32>, vector<2x128xf32> -> vector<2x128xf32>
    %10 = vector.broadcast %6 : vector<1x128xf32> to vector<2x128xf32>
    %11 = arith.addf %9, %10 : vector<2x128xf32>
    %c0_11 = arith.constant 0 : index
    %c0_12 = arith.constant 0 : index
    %c0_13 = arith.constant 0 : index
    %c0_14 = arith.constant 0 : index
    %12 = vector.load %arg4[%c0_11, %c0_12, %c0_13, %c0_14] : memref<1x2x2x128xf32, #tpu.memory_space<vmem>>, vector<1x1x2x128xf32>
    %13 = vector.shape_cast %12 : vector<1x1x2x128xf32> to vector<2x128xf32>
    %14 = vector.shape_cast %11 : vector<2x128xf32> to vector<1x1x2x128xf32>
    tpu.vector_store %arg4[%c0_11, %c0_12, %c0_13, %c0_14], %14 {strides = array<i32>} : memref<1x2x2x128xf32, #tpu.memory_space<vmem>>, vector<1x1x2x128xf32>,
    %c0_15 = arith.constant 0 : index
    %c1 = arith.constant 1 : index
    %c0_16 = arith.constant 0 : index
    %c0_17 = arith.constant 0 : index
    %15 = vector.load %arg2[%c0_15, %c1, %c0_16, %c0_17] : memref<1x2x16x128xf32, #tpu.memory_space<vmem>>, vector<1x1x16x128xf32>
    %16 = vector.shape_cast %15 : vector<1x1x16x128xf32> to vector<16x128xf32>
    %cst_18 = arith.constant dense<0.000000e+00> : vector<2x128xf32>
    %17 = tpu.matmul %0, %16, %cst_18 {dimension_numbers = #tpu.dot_dimension_numbers<[1], [0], [0], [1], [0, 0, 1, 1], [], []>} : vector<2x16xf32>, vector<16x128xf32>, vector<2x128xf32> -> vector<2x128xf32>
    %18 = vector.broadcast %6 : vector<1x128xf32> to vector<2x128xf32>
    %19 = arith.addf %17, %18 : vector<2x128xf32>
    %c0_19 = arith.constant 0 : index
    %c1_20 = arith.constant 1 : index
    %c0_21 = arith.constant 0 : index
    %c0_22 = arith.constant 0 : index
    %20 = vector.load %arg4[%c0_19, %c1_20, %c0_21, %c0_22] : memref<1x2x2x128xf32, #tpu.memory_space<vmem>>, vector<1x1x2x128xf32>
    %21 = vector.shape_cast %20 : vector<1x1x2x128xf32> to vector<2x128xf32>
    %22 = vector.shape_cast %19 : vector<2x128xf32> to vector<1x1x2x128xf32>
    tpu.vector_store %arg4[%c0_19, %c1_20, %c0_21, %c0_22], %22 {strides = array<i32>} : memref<1x2x2x128xf32, #tpu.memory_space<vmem>>, vector<1x1x2x128xf32>,
    return
  }
  func.func @transform_0(%arg0: i32) -> (i32, i32) {
    %c0_i32 = arith.constant 0 : i32
    %c0_i32_0 = arith.constant 0 : i32
    %c0_i32_1 = arith.constant 0 : i32
    return %c0_i32, %c0_i32_0 : i32, i32
  }
  func.func @transform_1(%arg0: i32) -> (i32, i32, i32, i32) {
    %c0_i32 = arith.constant 0 : i32
    %c0_i32_0 = arith.constant 0 : i32
    %c0_i32_1 = arith.constant 0 : i32
    %c0_i32_2 = arith.constant 0 : i32
    return %arg0, %c0_i32, %c0_i32_0, %c0_i32_1 : i32, i32, i32, i32
  }
  func.func @transform_2(%arg0: i32) -> (i32, i32, i32, i32) {
    %c0_i32 = arith.constant 0 : i32
    %c0_i32_0 = arith.constant 0 : i32
    %c0_i32_1 = arith.constant 0 : i32
    %c0_i32_2 = arith.constant 0 : i32
    return %arg0, %c0_i32, %c0_i32_0, %c0_i32_1 : i32, i32, i32, i32
  }
  func.func @transform_3(%arg0: i32) -> (i32, i32, i32, i32) {
    %c0_i32 = arith.constant 0 : i32
    %c0_i32_0 = arith.constant 0 : i32
    %c0_i32_1 = arith.constant 0 : i32
    %c0_i32_2 = arith.constant 0 : i32
    return %arg0, %c0_i32, %c0_i32_0, %c0_i32_1 : i32, i32, i32, i32
  }
}

module attributes {stable_mosaic.version = 11 : i64} {
  func.func @_dw3x3_bn_kernel(%arg0: i32, %arg1: memref<1x4x4x128xf32, #tpu.memory_space<vmem>>, %arg2: memref<9x128xf32, #tpu.memory_space<vmem>>, %arg3: memref<1x128xf32, #tpu.memory_space<vmem>>, %arg4: memref<1x2x2x128xf32, #tpu.memory_space<vmem>>) attributes {dimension_semantics = [#tpu.dimension_semantics<parallel>], iteration_bounds = array<i64: 2>, scalar_prefetch = 0 : i64, scratch_operands = 0 : i64, tpu.core_type = #tpu.core_type<tc>, window_params = [{transform_indices = @transform_0, window_bounds = array<i64: 1, 4, 4, 128>}, {pipeline_mode = #tpu.pipeline_mode<synchronous>, transform_indices = @transform_1, window_bounds = array<i64: 9, 128>}, {pipeline_mode = #tpu.pipeline_mode<synchronous>, transform_indices = @transform_2, window_bounds = array<i64: 1, 128>}, {transform_indices = @transform_3, window_bounds = array<i64: 1, 2, 2, 128>}]} {
    %c0 = arith.constant 0 : index
    %c0_0 = arith.constant 0 : index
    %c0_1 = arith.constant 0 : index
    %c0_2 = arith.constant 0 : index
    %0 = vector.load %arg1[%c0, %c0_0, %c0_1, %c0_2] : memref<1x4x4x128xf32, #tpu.memory_space<vmem>>, vector<1x4x4x128xf32>
    %1 = vector.shape_cast %0 : vector<1x4x4x128xf32> to vector<4x4x128xf32>
    %c0_3 = arith.constant 0 : index
    %c0_4 = arith.constant 0 : index
    %2 = vector.load %arg2[%c0_3, %c0_4] : memref<9x128xf32, #tpu.memory_space<vmem>>, vector<9x128xf32>
    %cst = arith.constant 0.000000e+00 : f32
    %3 = vector.broadcast %cst : f32 to vector<2x2x128xf32>
    %4 = vector.extract_strided_slice %1 {offsets = [0, 0, 0], sizes = [2, 2, 128], strides = [1, 1, 1]} : vector<4x4x128xf32> to vector<2x2x128xf32>
    %5 = vector.extract_strided_slice %2 {offsets = [0, 0], sizes = [1, 128], strides = [1, 1]} : vector<9x128xf32> to vector<1x128xf32>
    %6 = vector.shape_cast %5 : vector<1x128xf32> to vector<1x1x128xf32>
    %7 = vector.broadcast %6 : vector<1x1x128xf32> to vector<2x2x128xf32>
    %8 = arith.mulf %4, %7 : vector<2x2x128xf32>
    %9 = arith.addf %3, %8 : vector<2x2x128xf32>
    %10 = vector.extract_strided_slice %1 {offsets = [0, 1, 0], sizes = [2, 2, 128], strides = [1, 1, 1]} : vector<4x4x128xf32> to vector<2x2x128xf32>
    %11 = vector.extract_strided_slice %2 {offsets = [1, 0], sizes = [1, 128], strides = [1, 1]} : vector<9x128xf32> to vector<1x128xf32>
    %12 = vector.shape_cast %11 : vector<1x128xf32> to vector<1x1x128xf32>
    %13 = vector.broadcast %12 : vector<1x1x128xf32> to vector<2x2x128xf32>
    %14 = arith.mulf %10, %13 : vector<2x2x128xf32>
    %15 = arith.addf %9, %14 : vector<2x2x128xf32>
    %16 = vector.extract_strided_slice %1 {offsets = [0, 2, 0], sizes = [2, 2, 128], strides = [1, 1, 1]} : vector<4x4x128xf32> to vector<2x2x128xf32>
    %17 = vector.extract_strided_slice %2 {offsets = [2, 0], sizes = [1, 128], strides = [1, 1]} : vector<9x128xf32> to vector<1x128xf32>
    %18 = vector.shape_cast %17 : vector<1x128xf32> to vector<1x1x128xf32>
    %19 = vector.broadcast %18 : vector<1x1x128xf32> to vector<2x2x128xf32>
    %20 = arith.mulf %16, %19 : vector<2x2x128xf32>
    %21 = arith.addf %15, %20 : vector<2x2x128xf32>
    %22 = vector.extract_strided_slice %1 {offsets = [1, 0, 0], sizes = [2, 2, 128], strides = [1, 1, 1]} : vector<4x4x128xf32> to vector<2x2x128xf32>
    %23 = vector.extract_strided_slice %2 {offsets = [3, 0], sizes = [1, 128], strides = [1, 1]} : vector<9x128xf32> to vector<1x128xf32>
    %24 = vector.shape_cast %23 : vector<1x128xf32> to vector<1x1x128xf32>
    %25 = vector.broadcast %24 : vector<1x1x128xf32> to vector<2x2x128xf32>
    %26 = arith.mulf %22, %25 : vector<2x2x128xf32>
    %27 = arith.addf %21, %26 : vector<2x2x128xf32>
    %28 = vector.extract_strided_slice %1 {offsets = [1, 1, 0], sizes = [2, 2, 128], strides = [1, 1, 1]} : vector<4x4x128xf32> to vector<2x2x128xf32>
    %29 = vector.extract_strided_slice %2 {offsets = [4, 0], sizes = [1, 128], strides = [1, 1]} : vector<9x128xf32> to vector<1x128xf32>
    %30 = vector.shape_cast %29 : vector<1x128xf32> to vector<1x1x128xf32>
    %31 = vector.broadcast %30 : vector<1x1x128xf32> to vector<2x2x128xf32>
    %32 = arith.mulf %28, %31 : vector<2x2x128xf32>
    %33 = arith.addf %27, %32 : vector<2x2x128xf32>
    %34 = vector.extract_strided_slice %1 {offsets = [1, 2, 0], sizes = [2, 2, 128], strides = [1, 1, 1]} : vector<4x4x128xf32> to vector<2x2x128xf32>
    %35 = vector.extract_strided_slice %2 {offsets = [5, 0], sizes = [1, 128], strides = [1, 1]} : vector<9x128xf32> to vector<1x128xf32>
    %36 = vector.shape_cast %35 : vector<1x128xf32> to vector<1x1x128xf32>
    %37 = vector.broadcast %36 : vector<1x1x128xf32> to vector<2x2x128xf32>
    %38 = arith.mulf %34, %37 : vector<2x2x128xf32>
    %39 = arith.addf %33, %38 : vector<2x2x128xf32>
    %40 = vector.extract_strided_slice %1 {offsets = [2, 0, 0], sizes = [2, 2, 128], strides = [1, 1, 1]} : vector<4x4x128xf32> to vector<2x2x128xf32>
    %41 = vector.extract_strided_slice %2 {offsets = [6, 0], sizes = [1, 128], strides = [1, 1]} : vector<9x128xf32> to vector<1x128xf32>
    %42 = vector.shape_cast %41 : vector<1x128xf32> to vector<1x1x128xf32>
    %43 = vector.broadcast %42 : vector<1x1x128xf32> to vector<2x2x128xf32>
    %44 = arith.mulf %40, %43 : vector<2x2x128xf32>
    %45 = arith.addf %39, %44 : vector<2x2x128xf32>
    %46 = vector.extract_strided_slice %1 {offsets = [2, 1, 0], sizes = [2, 2, 128], strides = [1, 1, 1]} : vector<4x4x128xf32> to vector<2x2x128xf32>
    %47 = vector.extract_strided_slice %2 {offsets = [7, 0], sizes = [1, 128], strides = [1, 1]} : vector<9x128xf32> to vector<1x128xf32>
    %48 = vector.shape_cast %47 : vector<1x128xf32> to vector<1x1x128xf32>
    %49 = vector.broadcast %48 : vector<1x1x128xf32> to vector<2x2x128xf32>
    %50 = arith.mulf %46, %49 : vector<2x2x128xf32>
    %51 = arith.addf %45, %50 : vector<2x2x128xf32>
    %52 = vector.extract_strided_slice %1 {offsets = [2, 2, 0], sizes = [2, 2, 128], strides = [1, 1, 1]} : vector<4x4x128xf32> to vector<2x2x128xf32>
    %53 = vector.extract_strided_slice %2 {offsets = [8, 0], sizes = [1, 128], strides = [1, 1]} : vector<9x128xf32> to vector<1x128xf32>
    %54 = vector.shape_cast %53 : vector<1x128xf32> to vector<1x1x128xf32>
    %55 = vector.broadcast %54 : vector<1x1x128xf32> to vector<2x2x128xf32>
    %56 = arith.mulf %52, %55 : vector<2x2x128xf32>
    %57 = arith.addf %51, %56 : vector<2x2x128xf32>
    %c0_5 = arith.constant 0 : index
    %c0_6 = arith.constant 0 : index
    %58 = vector.load %arg3[%c0_5, %c0_6] : memref<1x128xf32, #tpu.memory_space<vmem>>, vector<1x128xf32>
    %59 = vector.shape_cast %58 : vector<1x128xf32> to vector<1x1x128xf32>
    %60 = vector.broadcast %59 : vector<1x1x128xf32> to vector<2x2x128xf32>
    %61 = arith.addf %57, %60 : vector<2x2x128xf32>
    %cst_7 = arith.constant 0.000000e+00 : f32
    %62 = vector.broadcast %cst_7 : f32 to vector<2x2x128xf32>
    %63 = arith.maximumf %61, %62 : vector<2x2x128xf32>
    %c0_8 = arith.constant 0 : index
    %c0_9 = arith.constant 0 : index
    %c0_10 = arith.constant 0 : index
    %c0_11 = arith.constant 0 : index
    %64 = vector.load %arg4[%c0_8, %c0_9, %c0_10, %c0_11] : memref<1x2x2x128xf32, #tpu.memory_space<vmem>>, vector<1x2x2x128xf32>
    %65 = vector.shape_cast %64 : vector<1x2x2x128xf32> to vector<2x2x128xf32>
    %66 = vector.shape_cast %63 : vector<2x2x128xf32> to vector<1x2x2x128xf32>
    tpu.vector_store %arg4[%c0_8, %c0_9, %c0_10, %c0_11], %66 {strides = array<i32>} : memref<1x2x2x128xf32, #tpu.memory_space<vmem>>, vector<1x2x2x128xf32>,
    return
  }
  func.func @transform_0(%arg0: i32) -> (i32, i32, i32, i32) {
    %c0_i32 = arith.constant 0 : i32
    %c0_i32_0 = arith.constant 0 : i32
    %c0_i32_1 = arith.constant 0 : i32
    %c0_i32_2 = arith.constant 0 : i32
    return %arg0, %c0_i32, %c0_i32_0, %c0_i32_1 : i32, i32, i32, i32
  }
  func.func @transform_1(%arg0: i32) -> (i32, i32) {
    %c0_i32 = arith.constant 0 : i32
    %c0_i32_0 = arith.constant 0 : i32
    %c0_i32_1 = arith.constant 0 : i32
    return %c0_i32, %c0_i32_0 : i32, i32
  }
  func.func @transform_2(%arg0: i32) -> (i32, i32) {
    %c0_i32 = arith.constant 0 : i32
    %c0_i32_0 = arith.constant 0 : i32
    %c0_i32_1 = arith.constant 0 : i32
    return %c0_i32, %c0_i32_0 : i32, i32
  }
  func.func @transform_3(%arg0: i32) -> (i32, i32, i32, i32) {
    %c0_i32 = arith.constant 0 : i32
    %c0_i32_0 = arith.constant 0 : i32
    %c0_i32_1 = arith.constant 0 : i32
    %c0_i32_2 = arith.constant 0 : i32
    return %arg0, %c0_i32, %c0_i32_0, %c0_i32_1 : i32, i32, i32, i32
  }
}

module attributes {stable_mosaic.version = 11 : i64} {
  func.func @_row_pass_kernel(%arg0: i32, %arg1: memref<4x2xf32, #tpu.memory_space<vmem>>, %arg2: memref<1x2x256xf32, #tpu.memory_space<vmem>>, %arg3: memref<1x4x256xf32, #tpu.memory_space<vmem>>) attributes {dimension_semantics = [#tpu.dimension_semantics<parallel>], iteration_bounds = array<i64: 2>, scalar_prefetch = 0 : i64, scratch_operands = 0 : i64, tpu.core_type = #tpu.core_type<tc>, window_params = [{pipeline_mode = #tpu.pipeline_mode<synchronous>, transform_indices = @transform_0, window_bounds = array<i64: 4, 2>}, {transform_indices = @transform_1, window_bounds = array<i64: 1, 2, 256>}, {transform_indices = @transform_2, window_bounds = array<i64: 1, 4, 256>}]} {
    %c0 = arith.constant 0 : index
    %c0_0 = arith.constant 0 : index
    %0 = vector.load %arg1[%c0, %c0_0] : memref<4x2xf32, #tpu.memory_space<vmem>>, vector<4x2xf32>
    %c0_1 = arith.constant 0 : index
    %c0_2 = arith.constant 0 : index
    %c0_3 = arith.constant 0 : index
    %1 = vector.load %arg2[%c0_1, %c0_2, %c0_3] : memref<1x2x256xf32, #tpu.memory_space<vmem>>, vector<1x2x256xf32>
    %2 = vector.shape_cast %1 : vector<1x2x256xf32> to vector<2x256xf32>
    %cst = arith.constant dense<0.000000e+00> : vector<4x256xf32>
    %3 = tpu.matmul %0, %2, %cst {dimension_numbers = #tpu.dot_dimension_numbers<[1], [0], [0], [1], [0, 0, 1, 1], [], []>} : vector<4x2xf32>, vector<2x256xf32>, vector<4x256xf32> -> vector<4x256xf32>
    %c0_4 = arith.constant 0 : index
    %c0_5 = arith.constant 0 : index
    %c0_6 = arith.constant 0 : index
    %4 = vector.load %arg3[%c0_4, %c0_5, %c0_6] : memref<1x4x256xf32, #tpu.memory_space<vmem>>, vector<1x4x256xf32>
    %5 = vector.shape_cast %4 : vector<1x4x256xf32> to vector<4x256xf32>
    %6 = vector.shape_cast %3 : vector<4x256xf32> to vector<1x4x256xf32>
    tpu.vector_store %arg3[%c0_4, %c0_5, %c0_6], %6 {strides = array<i32>} : memref<1x4x256xf32, #tpu.memory_space<vmem>>, vector<1x4x256xf32>,
    return
  }
  func.func @transform_0(%arg0: i32) -> (i32, i32) {
    %c0_i32 = arith.constant 0 : i32
    %c0_i32_0 = arith.constant 0 : i32
    %c0_i32_1 = arith.constant 0 : i32
    return %c0_i32, %c0_i32_0 : i32, i32
  }
  func.func @transform_1(%arg0: i32) -> (i32, i32, i32) {
    %c0_i32 = arith.constant 0 : i32
    %c0_i32_0 = arith.constant 0 : i32
    %c0_i32_1 = arith.constant 0 : i32
    return %arg0, %c0_i32, %c0_i32_0 : i32, i32, i32
  }
  func.func @transform_2(%arg0: i32) -> (i32, i32, i32) {
    %c0_i32 = arith.constant 0 : i32
    %c0_i32_0 = arith.constant 0 : i32
    %c0_i32_1 = arith.constant 0 : i32
    return %arg0, %c0_i32, %c0_i32_0 : i32, i32, i32
  }
}

module attributes {stable_mosaic.version = 11 : i64} {
  func.func @_col_pass_kernel(%arg0: i32, %arg1: memref<4x16xf32, #tpu.memory_space<vmem>>, %arg2: memref<1x4x16x128xf32, #tpu.memory_space<vmem>>, %arg3: memref<1x4x4x128xf32, #tpu.memory_space<vmem>>) attributes {dimension_semantics = [#tpu.dimension_semantics<parallel>], iteration_bounds = array<i64: 2>, scalar_prefetch = 0 : i64, scratch_operands = 0 : i64, tpu.core_type = #tpu.core_type<tc>, window_params = [{pipeline_mode = #tpu.pipeline_mode<synchronous>, transform_indices = @transform_0, window_bounds = array<i64: 4, 16>}, {transform_indices = @transform_1, window_bounds = array<i64: 1, 4, 16, 128>}, {transform_indices = @transform_2, window_bounds = array<i64: 1, 4, 4, 128>}]} {
    %c0 = arith.constant 0 : index
    %c0_0 = arith.constant 0 : index
    %0 = vector.load %arg1[%c0, %c0_0] : memref<4x16xf32, #tpu.memory_space<vmem>>, vector<4x16xf32>
    %c0_1 = arith.constant 0 : index
    %c0_2 = arith.constant 0 : index
    %c0_3 = arith.constant 0 : index
    %c0_4 = arith.constant 0 : index
    %1 = vector.load %arg2[%c0_1, %c0_2, %c0_3, %c0_4] : memref<1x4x16x128xf32, #tpu.memory_space<vmem>>, vector<1x1x16x128xf32>
    %2 = vector.shape_cast %1 : vector<1x1x16x128xf32> to vector<16x128xf32>
    %cst = arith.constant dense<0.000000e+00> : vector<4x128xf32>
    %3 = tpu.matmul %0, %2, %cst {dimension_numbers = #tpu.dot_dimension_numbers<[1], [0], [0], [1], [0, 0, 1, 1], [], []>} : vector<4x16xf32>, vector<16x128xf32>, vector<4x128xf32> -> vector<4x128xf32>
    %c0_5 = arith.constant 0 : index
    %c0_6 = arith.constant 0 : index
    %c0_7 = arith.constant 0 : index
    %c0_8 = arith.constant 0 : index
    %4 = vector.load %arg3[%c0_5, %c0_6, %c0_7, %c0_8] : memref<1x4x4x128xf32, #tpu.memory_space<vmem>>, vector<1x1x4x128xf32>
    %5 = vector.shape_cast %4 : vector<1x1x4x128xf32> to vector<4x128xf32>
    %6 = vector.shape_cast %3 : vector<4x128xf32> to vector<1x1x4x128xf32>
    tpu.vector_store %arg3[%c0_5, %c0_6, %c0_7, %c0_8], %6 {strides = array<i32>} : memref<1x4x4x128xf32, #tpu.memory_space<vmem>>, vector<1x1x4x128xf32>,
    %c0_9 = arith.constant 0 : index
    %c1 = arith.constant 1 : index
    %c0_10 = arith.constant 0 : index
    %c0_11 = arith.constant 0 : index
    %7 = vector.load %arg2[%c0_9, %c1, %c0_10, %c0_11] : memref<1x4x16x128xf32, #tpu.memory_space<vmem>>, vector<1x1x16x128xf32>
    %8 = vector.shape_cast %7 : vector<1x1x16x128xf32> to vector<16x128xf32>
    %cst_12 = arith.constant dense<0.000000e+00> : vector<4x128xf32>
    %9 = tpu.matmul %0, %8, %cst_12 {dimension_numbers = #tpu.dot_dimension_numbers<[1], [0], [0], [1], [0, 0, 1, 1], [], []>} : vector<4x16xf32>, vector<16x128xf32>, vector<4x128xf32> -> vector<4x128xf32>
    %c0_13 = arith.constant 0 : index
    %c1_14 = arith.constant 1 : index
    %c0_15 = arith.constant 0 : index
    %c0_16 = arith.constant 0 : index
    %10 = vector.load %arg3[%c0_13, %c1_14, %c0_15, %c0_16] : memref<1x4x4x128xf32, #tpu.memory_space<vmem>>, vector<1x1x4x128xf32>
    %11 = vector.shape_cast %10 : vector<1x1x4x128xf32> to vector<4x128xf32>
    %12 = vector.shape_cast %9 : vector<4x128xf32> to vector<1x1x4x128xf32>
    tpu.vector_store %arg3[%c0_13, %c1_14, %c0_15, %c0_16], %12 {strides = array<i32>} : memref<1x4x4x128xf32, #tpu.memory_space<vmem>>, vector<1x1x4x128xf32>,
    %c0_17 = arith.constant 0 : index
    %c2 = arith.constant 2 : index
    %c0_18 = arith.constant 0 : index
    %c0_19 = arith.constant 0 : index
    %13 = vector.load %arg2[%c0_17, %c2, %c0_18, %c0_19] : memref<1x4x16x128xf32, #tpu.memory_space<vmem>>, vector<1x1x16x128xf32>
    %14 = vector.shape_cast %13 : vector<1x1x16x128xf32> to vector<16x128xf32>
    %cst_20 = arith.constant dense<0.000000e+00> : vector<4x128xf32>
    %15 = tpu.matmul %0, %14, %cst_20 {dimension_numbers = #tpu.dot_dimension_numbers<[1], [0], [0], [1], [0, 0, 1, 1], [], []>} : vector<4x16xf32>, vector<16x128xf32>, vector<4x128xf32> -> vector<4x128xf32>
    %c0_21 = arith.constant 0 : index
    %c2_22 = arith.constant 2 : index
    %c0_23 = arith.constant 0 : index
    %c0_24 = arith.constant 0 : index
    %16 = vector.load %arg3[%c0_21, %c2_22, %c0_23, %c0_24] : memref<1x4x4x128xf32, #tpu.memory_space<vmem>>, vector<1x1x4x128xf32>
    %17 = vector.shape_cast %16 : vector<1x1x4x128xf32> to vector<4x128xf32>
    %18 = vector.shape_cast %15 : vector<4x128xf32> to vector<1x1x4x128xf32>
    tpu.vector_store %arg3[%c0_21, %c2_22, %c0_23, %c0_24], %18 {strides = array<i32>} : memref<1x4x4x128xf32, #tpu.memory_space<vmem>>, vector<1x1x4x128xf32>,
    %c0_25 = arith.constant 0 : index
    %c3 = arith.constant 3 : index
    %c0_26 = arith.constant 0 : index
    %c0_27 = arith.constant 0 : index
    %19 = vector.load %arg2[%c0_25, %c3, %c0_26, %c0_27] : memref<1x4x16x128xf32, #tpu.memory_space<vmem>>, vector<1x1x16x128xf32>
    %20 = vector.shape_cast %19 : vector<1x1x16x128xf32> to vector<16x128xf32>
    %cst_28 = arith.constant dense<0.000000e+00> : vector<4x128xf32>
    %21 = tpu.matmul %0, %20, %cst_28 {dimension_numbers = #tpu.dot_dimension_numbers<[1], [0], [0], [1], [0, 0, 1, 1], [], []>} : vector<4x16xf32>, vector<16x128xf32>, vector<4x128xf32> -> vector<4x128xf32>
    %c0_29 = arith.constant 0 : index
    %c3_30 = arith.constant 3 : index
    %c0_31 = arith.constant 0 : index
    %c0_32 = arith.constant 0 : index
    %22 = vector.load %arg3[%c0_29, %c3_30, %c0_31, %c0_32] : memref<1x4x4x128xf32, #tpu.memory_space<vmem>>, vector<1x1x4x128xf32>
    %23 = vector.shape_cast %22 : vector<1x1x4x128xf32> to vector<4x128xf32>
    %24 = vector.shape_cast %21 : vector<4x128xf32> to vector<1x1x4x128xf32>
    tpu.vector_store %arg3[%c0_29, %c3_30, %c0_31, %c0_32], %24 {strides = array<i32>} : memref<1x4x4x128xf32, #tpu.memory_space<vmem>>, vector<1x1x4x128xf32>,
    return
  }
  func.func @transform_0(%arg0: i32) -> (i32, i32) {
    %c0_i32 = arith.constant 0 : i32
    %c0_i32_0 = arith.constant 0 : i32
    %c0_i32_1 = arith.constant 0 : i32
    return %c0_i32, %c0_i32_0 : i32, i32
  }
  func.func @transform_1(%arg0: i32) -> (i32, i32, i32, i32) {
    %c0_i32 = arith.constant 0 : i32
    %c0_i32_0 = arith.constant 0 : i32
    %c0_i32_1 = arith.constant 0 : i32
    %c0_i32_2 = arith.constant 0 : i32
    return %arg0, %c0_i32, %c0_i32_0, %c0_i32_1 : i32, i32, i32, i32
  }
  func.func @transform_2(%arg0: i32) -> (i32, i32, i32, i32) {
    %c0_i32 = arith.constant 0 : i32
    %c0_i32_0 = arith.constant 0 : i32
    %c0_i32_1 = arith.constant 0 : i32
    %c0_i32_2 = arith.constant 0 : i32
    return %arg0, %c0_i32, %c0_i32_0, %c0_i32_1 : i32, i32, i32, i32
  }
}

module attributes {stable_mosaic.version = 11 : i64} {
  func.func @_col_pass_res_kernel(%arg0: i32, %arg1: memref<4x2xf32, #tpu.memory_space<vmem>>, %arg2: memref<1x4x2x128xf32, #tpu.memory_space<vmem>>, %arg3: memref<1x4x4x128xf32, #tpu.memory_space<vmem>>, %arg4: memref<1x4x4x128xf32, #tpu.memory_space<vmem>>) attributes {dimension_semantics = [#tpu.dimension_semantics<parallel>], iteration_bounds = array<i64: 2>, scalar_prefetch = 0 : i64, scratch_operands = 0 : i64, tpu.core_type = #tpu.core_type<tc>, window_params = [{pipeline_mode = #tpu.pipeline_mode<synchronous>, transform_indices = @transform_0, window_bounds = array<i64: 4, 2>}, {transform_indices = @transform_1, window_bounds = array<i64: 1, 4, 2, 128>}, {transform_indices = @transform_2, window_bounds = array<i64: 1, 4, 4, 128>}, {transform_indices = @transform_3, window_bounds = array<i64: 1, 4, 4, 128>}]} {
    %c0 = arith.constant 0 : index
    %c0_0 = arith.constant 0 : index
    %0 = vector.load %arg1[%c0, %c0_0] : memref<4x2xf32, #tpu.memory_space<vmem>>, vector<4x2xf32>
    %c0_1 = arith.constant 0 : index
    %c0_2 = arith.constant 0 : index
    %c0_3 = arith.constant 0 : index
    %c0_4 = arith.constant 0 : index
    %1 = vector.load %arg2[%c0_1, %c0_2, %c0_3, %c0_4] : memref<1x4x2x128xf32, #tpu.memory_space<vmem>>, vector<1x1x2x128xf32>
    %2 = vector.shape_cast %1 : vector<1x1x2x128xf32> to vector<2x128xf32>
    %cst = arith.constant dense<0.000000e+00> : vector<4x128xf32>
    %3 = tpu.matmul %0, %2, %cst {dimension_numbers = #tpu.dot_dimension_numbers<[1], [0], [0], [1], [0, 0, 1, 1], [], []>} : vector<4x2xf32>, vector<2x128xf32>, vector<4x128xf32> -> vector<4x128xf32>
    %c0_5 = arith.constant 0 : index
    %c0_6 = arith.constant 0 : index
    %c0_7 = arith.constant 0 : index
    %c0_8 = arith.constant 0 : index
    %4 = vector.load %arg3[%c0_5, %c0_6, %c0_7, %c0_8] : memref<1x4x4x128xf32, #tpu.memory_space<vmem>>, vector<1x1x4x128xf32>
    %5 = vector.shape_cast %4 : vector<1x1x4x128xf32> to vector<4x128xf32>
    %6 = arith.addf %3, %5 : vector<4x128xf32>
    %c0_9 = arith.constant 0 : index
    %c0_10 = arith.constant 0 : index
    %c0_11 = arith.constant 0 : index
    %c0_12 = arith.constant 0 : index
    %7 = vector.load %arg4[%c0_9, %c0_10, %c0_11, %c0_12] : memref<1x4x4x128xf32, #tpu.memory_space<vmem>>, vector<1x1x4x128xf32>
    %8 = vector.shape_cast %7 : vector<1x1x4x128xf32> to vector<4x128xf32>
    %9 = vector.shape_cast %6 : vector<4x128xf32> to vector<1x1x4x128xf32>
    tpu.vector_store %arg4[%c0_9, %c0_10, %c0_11, %c0_12], %9 {strides = array<i32>} : memref<1x4x4x128xf32, #tpu.memory_space<vmem>>, vector<1x1x4x128xf32>,
    %c0_13 = arith.constant 0 : index
    %c1 = arith.constant 1 : index
    %c0_14 = arith.constant 0 : index
    %c0_15 = arith.constant 0 : index
    %10 = vector.load %arg2[%c0_13, %c1, %c0_14, %c0_15] : memref<1x4x2x128xf32, #tpu.memory_space<vmem>>, vector<1x1x2x128xf32>
    %11 = vector.shape_cast %10 : vector<1x1x2x128xf32> to vector<2x128xf32>
    %cst_16 = arith.constant dense<0.000000e+00> : vector<4x128xf32>
    %12 = tpu.matmul %0, %11, %cst_16 {dimension_numbers = #tpu.dot_dimension_numbers<[1], [0], [0], [1], [0, 0, 1, 1], [], []>} : vector<4x2xf32>, vector<2x128xf32>, vector<4x128xf32> -> vector<4x128xf32>
    %c0_17 = arith.constant 0 : index
    %c1_18 = arith.constant 1 : index
    %c0_19 = arith.constant 0 : index
    %c0_20 = arith.constant 0 : index
    %13 = vector.load %arg3[%c0_17, %c1_18, %c0_19, %c0_20] : memref<1x4x4x128xf32, #tpu.memory_space<vmem>>, vector<1x1x4x128xf32>
    %14 = vector.shape_cast %13 : vector<1x1x4x128xf32> to vector<4x128xf32>
    %15 = arith.addf %12, %14 : vector<4x128xf32>
    %c0_21 = arith.constant 0 : index
    %c1_22 = arith.constant 1 : index
    %c0_23 = arith.constant 0 : index
    %c0_24 = arith.constant 0 : index
    %16 = vector.load %arg4[%c0_21, %c1_22, %c0_23, %c0_24] : memref<1x4x4x128xf32, #tpu.memory_space<vmem>>, vector<1x1x4x128xf32>
    %17 = vector.shape_cast %16 : vector<1x1x4x128xf32> to vector<4x128xf32>
    %18 = vector.shape_cast %15 : vector<4x128xf32> to vector<1x1x4x128xf32>
    tpu.vector_store %arg4[%c0_21, %c1_22, %c0_23, %c0_24], %18 {strides = array<i32>} : memref<1x4x4x128xf32, #tpu.memory_space<vmem>>, vector<1x1x4x128xf32>,
    %c0_25 = arith.constant 0 : index
    %c2 = arith.constant 2 : index
    %c0_26 = arith.constant 0 : index
    %c0_27 = arith.constant 0 : index
    %19 = vector.load %arg2[%c0_25, %c2, %c0_26, %c0_27] : memref<1x4x2x128xf32, #tpu.memory_space<vmem>>, vector<1x1x2x128xf32>
    %20 = vector.shape_cast %19 : vector<1x1x2x128xf32> to vector<2x128xf32>
    %cst_28 = arith.constant dense<0.000000e+00> : vector<4x128xf32>
    %21 = tpu.matmul %0, %20, %cst_28 {dimension_numbers = #tpu.dot_dimension_numbers<[1], [0], [0], [1], [0, 0, 1, 1], [], []>} : vector<4x2xf32>, vector<2x128xf32>, vector<4x128xf32> -> vector<4x128xf32>
    %c0_29 = arith.constant 0 : index
    %c2_30 = arith.constant 2 : index
    %c0_31 = arith.constant 0 : index
    %c0_32 = arith.constant 0 : index
    %22 = vector.load %arg3[%c0_29, %c2_30, %c0_31, %c0_32] : memref<1x4x4x128xf32, #tpu.memory_space<vmem>>, vector<1x1x4x128xf32>
    %23 = vector.shape_cast %22 : vector<1x1x4x128xf32> to vector<4x128xf32>
    %24 = arith.addf %21, %23 : vector<4x128xf32>
    %c0_33 = arith.constant 0 : index
    %c2_34 = arith.constant 2 : index
    %c0_35 = arith.constant 0 : index
    %c0_36 = arith.constant 0 : index
    %25 = vector.load %arg4[%c0_33, %c2_34, %c0_35, %c0_36] : memref<1x4x4x128xf32, #tpu.memory_space<vmem>>, vector<1x1x4x128xf32>
    %26 = vector.shape_cast %25 : vector<1x1x4x128xf32> to vector<4x128xf32>
    %27 = vector.shape_cast %24 : vector<4x128xf32> to vector<1x1x4x128xf32>
    tpu.vector_store %arg4[%c0_33, %c2_34, %c0_35, %c0_36], %27 {strides = array<i32>} : memref<1x4x4x128xf32, #tpu.memory_space<vmem>>, vector<1x1x4x128xf32>,
    %c0_37 = arith.constant 0 : index
    %c3 = arith.constant 3 : index
    %c0_38 = arith.constant 0 : index
    %c0_39 = arith.constant 0 : index
    %28 = vector.load %arg2[%c0_37, %c3, %c0_38, %c0_39] : memref<1x4x2x128xf32, #tpu.memory_space<vmem>>, vector<1x1x2x128xf32>
    %29 = vector.shape_cast %28 : vector<1x1x2x128xf32> to vector<2x128xf32>
    %cst_40 = arith.constant dense<0.000000e+00> : vector<4x128xf32>
    %30 = tpu.matmul %0, %29, %cst_40 {dimension_numbers = #tpu.dot_dimension_numbers<[1], [0], [0], [1], [0, 0, 1, 1], [], []>} : vector<4x2xf32>, vector<2x128xf32>, vector<4x128xf32> -> vector<4x128xf32>
    %c0_41 = arith.constant 0 : index
    %c3_42 = arith.constant 3 : index
    %c0_43 = arith.constant 0 : index
    %c0_44 = arith.constant 0 : index
    %31 = vector.load %arg3[%c0_41, %c3_42, %c0_43, %c0_44] : memref<1x4x4x128xf32, #tpu.memory_space<vmem>>, vector<1x1x4x128xf32>
    %32 = vector.shape_cast %31 : vector<1x1x4x128xf32> to vector<4x128xf32>
    %33 = arith.addf %30, %32 : vector<4x128xf32>
    %c0_45 = arith.constant 0 : index
    %c3_46 = arith.constant 3 : index
    %c0_47 = arith.constant 0 : index
    %c0_48 = arith.constant 0 : index
    %34 = vector.load %arg4[%c0_45, %c3_46, %c0_47, %c0_48] : memref<1x4x4x128xf32, #tpu.memory_space<vmem>>, vector<1x1x4x128xf32>
    %35 = vector.shape_cast %34 : vector<1x1x4x128xf32> to vector<4x128xf32>
    %36 = vector.shape_cast %33 : vector<4x128xf32> to vector<1x1x4x128xf32>
    tpu.vector_store %arg4[%c0_45, %c3_46, %c0_47, %c0_48], %36 {strides = array<i32>} : memref<1x4x4x128xf32, #tpu.memory_space<vmem>>, vector<1x1x4x128xf32>,
    return
  }
  func.func @transform_0(%arg0: i32) -> (i32, i32) {
    %c0_i32 = arith.constant 0 : i32
    %c0_i32_0 = arith.constant 0 : i32
    %c0_i32_1 = arith.constant 0 : i32
    return %c0_i32, %c0_i32_0 : i32, i32
  }
  func.func @transform_1(%arg0: i32) -> (i32, i32, i32, i32) {
    %c0_i32 = arith.constant 0 : i32
    %c0_i32_0 = arith.constant 0 : i32
    %c0_i32_1 = arith.constant 0 : i32
    %c0_i32_2 = arith.constant 0 : i32
    return %arg0, %c0_i32, %c0_i32_0, %c0_i32_1 : i32, i32, i32, i32
  }
  func.func @transform_2(%arg0: i32) -> (i32, i32, i32, i32) {
    %c0_i32 = arith.constant 0 : i32
    %c0_i32_0 = arith.constant 0 : i32
    %c0_i32_1 = arith.constant 0 : i32
    %c0_i32_2 = arith.constant 0 : i32
    return %arg0, %c0_i32, %c0_i32_0, %c0_i32_1 : i32, i32, i32, i32
  }
  func.func @transform_3(%arg0: i32) -> (i32, i32, i32, i32) {
    %c0_i32 = arith.constant 0 : i32
    %c0_i32_0 = arith.constant 0 : i32
    %c0_i32_1 = arith.constant 0 : i32
    %c0_i32_2 = arith.constant 0 : i32
    return %arg0, %c0_i32, %c0_i32_0, %c0_i32_1 : i32, i32, i32, i32
  }
}

module attributes {stable_mosaic.version = 11 : i64} {
  func.func @_col_pass_kernel(%arg0: i32, %arg1: memref<8x16xf32, #tpu.memory_space<vmem>>, %arg2: memref<1x8x16x128xf32, #tpu.memory_space<vmem>>, %arg3: memref<1x8x8x128xf32, #tpu.memory_space<vmem>>) attributes {dimension_semantics = [#tpu.dimension_semantics<parallel>], iteration_bounds = array<i64: 2>, scalar_prefetch = 0 : i64, scratch_operands = 0 : i64, tpu.core_type = #tpu.core_type<tc>, window_params = [{pipeline_mode = #tpu.pipeline_mode<synchronous>, transform_indices = @transform_0, window_bounds = array<i64: 8, 16>}, {transform_indices = @transform_1, window_bounds = array<i64: 1, 8, 16, 128>}, {transform_indices = @transform_2, window_bounds = array<i64: 1, 8, 8, 128>}]} {
    %c0 = arith.constant 0 : index
    %c0_0 = arith.constant 0 : index
    %0 = vector.load %arg1[%c0, %c0_0] : memref<8x16xf32, #tpu.memory_space<vmem>>, vector<8x16xf32>
    %c0_1 = arith.constant 0 : index
    %c0_2 = arith.constant 0 : index
    %c0_3 = arith.constant 0 : index
    %c0_4 = arith.constant 0 : index
    %1 = vector.load %arg2[%c0_1, %c0_2, %c0_3, %c0_4] : memref<1x8x16x128xf32, #tpu.memory_space<vmem>>, vector<1x1x16x128xf32>
    %2 = vector.shape_cast %1 : vector<1x1x16x128xf32> to vector<16x128xf32>
    %cst = arith.constant dense<0.000000e+00> : vector<8x128xf32>
    %3 = tpu.matmul %0, %2, %cst {dimension_numbers = #tpu.dot_dimension_numbers<[1], [0], [0], [1], [0, 0, 1, 1], [], []>} : vector<8x16xf32>, vector<16x128xf32>, vector<8x128xf32> -> vector<8x128xf32>
    %c0_5 = arith.constant 0 : index
    %c0_6 = arith.constant 0 : index
    %c0_7 = arith.constant 0 : index
    %c0_8 = arith.constant 0 : index
    %4 = vector.load %arg3[%c0_5, %c0_6, %c0_7, %c0_8] : memref<1x8x8x128xf32, #tpu.memory_space<vmem>>, vector<1x1x8x128xf32>
    %5 = vector.shape_cast %4 : vector<1x1x8x128xf32> to vector<8x128xf32>
    %6 = vector.shape_cast %3 : vector<8x128xf32> to vector<1x1x8x128xf32>
    tpu.vector_store %arg3[%c0_5, %c0_6, %c0_7, %c0_8], %6 {strides = array<i32>} : memref<1x8x8x128xf32, #tpu.memory_space<vmem>>, vector<1x1x8x128xf32>,
    %c0_9 = arith.constant 0 : index
    %c1 = arith.constant 1 : index
    %c0_10 = arith.constant 0 : index
    %c0_11 = arith.constant 0 : index
    %7 = vector.load %arg2[%c0_9, %c1, %c0_10, %c0_11] : memref<1x8x16x128xf32, #tpu.memory_space<vmem>>, vector<1x1x16x128xf32>
    %8 = vector.shape_cast %7 : vector<1x1x16x128xf32> to vector<16x128xf32>
    %cst_12 = arith.constant dense<0.000000e+00> : vector<8x128xf32>
    %9 = tpu.matmul %0, %8, %cst_12 {dimension_numbers = #tpu.dot_dimension_numbers<[1], [0], [0], [1], [0, 0, 1, 1], [], []>} : vector<8x16xf32>, vector<16x128xf32>, vector<8x128xf32> -> vector<8x128xf32>
    %c0_13 = arith.constant 0 : index
    %c1_14 = arith.constant 1 : index
    %c0_15 = arith.constant 0 : index
    %c0_16 = arith.constant 0 : index
    %10 = vector.load %arg3[%c0_13, %c1_14, %c0_15, %c0_16] : memref<1x8x8x128xf32, #tpu.memory_space<vmem>>, vector<1x1x8x128xf32>
    %11 = vector.shape_cast %10 : vector<1x1x8x128xf32> to vector<8x128xf32>
    %12 = vector.shape_cast %9 : vector<8x128xf32> to vector<1x1x8x128xf32>
    tpu.vector_store %arg3[%c0_13, %c1_14, %c0_15, %c0_16], %12 {strides = array<i32>} : memref<1x8x8x128xf32, #tpu.memory_space<vmem>>, vector<1x1x8x128xf32>,
    %c0_17 = arith.constant 0 : index
    %c2 = arith.constant 2 : index
    %c0_18 = arith.constant 0 : index
    %c0_19 = arith.constant 0 : index
    %13 = vector.load %arg2[%c0_17, %c2, %c0_18, %c0_19] : memref<1x8x16x128xf32, #tpu.memory_space<vmem>>, vector<1x1x16x128xf32>
    %14 = vector.shape_cast %13 : vector<1x1x16x128xf32> to vector<16x128xf32>
    %cst_20 = arith.constant dense<0.000000e+00> : vector<8x128xf32>
    %15 = tpu.matmul %0, %14, %cst_20 {dimension_numbers = #tpu.dot_dimension_numbers<[1], [0], [0], [1], [0, 0, 1, 1], [], []>} : vector<8x16xf32>, vector<16x128xf32>, vector<8x128xf32> -> vector<8x128xf32>
    %c0_21 = arith.constant 0 : index
    %c2_22 = arith.constant 2 : index
    %c0_23 = arith.constant 0 : index
    %c0_24 = arith.constant 0 : index
    %16 = vector.load %arg3[%c0_21, %c2_22, %c0_23, %c0_24] : memref<1x8x8x128xf32, #tpu.memory_space<vmem>>, vector<1x1x8x128xf32>
    %17 = vector.shape_cast %16 : vector<1x1x8x128xf32> to vector<8x128xf32>
    %18 = vector.shape_cast %15 : vector<8x128xf32> to vector<1x1x8x128xf32>
    tpu.vector_store %arg3[%c0_21, %c2_22, %c0_23, %c0_24], %18 {strides = array<i32>} : memref<1x8x8x128xf32, #tpu.memory_space<vmem>>, vector<1x1x8x128xf32>,
    %c0_25 = arith.constant 0 : index
    %c3 = arith.constant 3 : index
    %c0_26 = arith.constant 0 : index
    %c0_27 = arith.constant 0 : index
    %19 = vector.load %arg2[%c0_25, %c3, %c0_26, %c0_27] : memref<1x8x16x128xf32, #tpu.memory_space<vmem>>, vector<1x1x16x128xf32>
    %20 = vector.shape_cast %19 : vector<1x1x16x128xf32> to vector<16x128xf32>
    %cst_28 = arith.constant dense<0.000000e+00> : vector<8x128xf32>
    %21 = tpu.matmul %0, %20, %cst_28 {dimension_numbers = #tpu.dot_dimension_numbers<[1], [0], [0], [1], [0, 0, 1, 1], [], []>} : vector<8x16xf32>, vector<16x128xf32>, vector<8x128xf32> -> vector<8x128xf32>
    %c0_29 = arith.constant 0 : index
    %c3_30 = arith.constant 3 : index
    %c0_31 = arith.constant 0 : index
    %c0_32 = arith.constant 0 : index
    %22 = vector.load %arg3[%c0_29, %c3_30, %c0_31, %c0_32] : memref<1x8x8x128xf32, #tpu.memory_space<vmem>>, vector<1x1x8x128xf32>
    %23 = vector.shape_cast %22 : vector<1x1x8x128xf32> to vector<8x128xf32>
    %24 = vector.shape_cast %21 : vector<8x128xf32> to vector<1x1x8x128xf32>
    tpu.vector_store %arg3[%c0_29, %c3_30, %c0_31, %c0_32], %24 {strides = array<i32>} : memref<1x8x8x128xf32, #tpu.memory_space<vmem>>, vector<1x1x8x128xf32>,
    %c0_33 = arith.constant 0 : index
    %c4 = arith.constant 4 : index
    %c0_34 = arith.constant 0 : index
    %c0_35 = arith.constant 0 : index
    %25 = vector.load %arg2[%c0_33, %c4, %c0_34, %c0_35] : memref<1x8x16x128xf32, #tpu.memory_space<vmem>>, vector<1x1x16x128xf32>
    %26 = vector.shape_cast %25 : vector<1x1x16x128xf32> to vector<16x128xf32>
    %cst_36 = arith.constant dense<0.000000e+00> : vector<8x128xf32>
    %27 = tpu.matmul %0, %26, %cst_36 {dimension_numbers = #tpu.dot_dimension_numbers<[1], [0], [0], [1], [0, 0, 1, 1], [], []>} : vector<8x16xf32>, vector<16x128xf32>, vector<8x128xf32> -> vector<8x128xf32>
    %c0_37 = arith.constant 0 : index
    %c4_38 = arith.constant 4 : index
    %c0_39 = arith.constant 0 : index
    %c0_40 = arith.constant 0 : index
    %28 = vector.load %arg3[%c0_37, %c4_38, %c0_39, %c0_40] : memref<1x8x8x128xf32, #tpu.memory_space<vmem>>, vector<1x1x8x128xf32>
    %29 = vector.shape_cast %28 : vector<1x1x8x128xf32> to vector<8x128xf32>
    %30 = vector.shape_cast %27 : vector<8x128xf32> to vector<1x1x8x128xf32>
    tpu.vector_store %arg3[%c0_37, %c4_38, %c0_39, %c0_40], %30 {strides = array<i32>} : memref<1x8x8x128xf32, #tpu.memory_space<vmem>>, vector<1x1x8x128xf32>,
    %c0_41 = arith.constant 0 : index
    %c5 = arith.constant 5 : index
    %c0_42 = arith.constant 0 : index
    %c0_43 = arith.constant 0 : index
    %31 = vector.load %arg2[%c0_41, %c5, %c0_42, %c0_43] : memref<1x8x16x128xf32, #tpu.memory_space<vmem>>, vector<1x1x16x128xf32>
    %32 = vector.shape_cast %31 : vector<1x1x16x128xf32> to vector<16x128xf32>
    %cst_44 = arith.constant dense<0.000000e+00> : vector<8x128xf32>
    %33 = tpu.matmul %0, %32, %cst_44 {dimension_numbers = #tpu.dot_dimension_numbers<[1], [0], [0], [1], [0, 0, 1, 1], [], []>} : vector<8x16xf32>, vector<16x128xf32>, vector<8x128xf32> -> vector<8x128xf32>
    %c0_45 = arith.constant 0 : index
    %c5_46 = arith.constant 5 : index
    %c0_47 = arith.constant 0 : index
    %c0_48 = arith.constant 0 : index
    %34 = vector.load %arg3[%c0_45, %c5_46, %c0_47, %c0_48] : memref<1x8x8x128xf32, #tpu.memory_space<vmem>>, vector<1x1x8x128xf32>
    %35 = vector.shape_cast %34 : vector<1x1x8x128xf32> to vector<8x128xf32>
    %36 = vector.shape_cast %33 : vector<8x128xf32> to vector<1x1x8x128xf32>
    tpu.vector_store %arg3[%c0_45, %c5_46, %c0_47, %c0_48], %36 {strides = array<i32>} : memref<1x8x8x128xf32, #tpu.memory_space<vmem>>, vector<1x1x8x128xf32>,
    %c0_49 = arith.constant 0 : index
    %c6 = arith.constant 6 : index
    %c0_50 = arith.constant 0 : index
    %c0_51 = arith.constant 0 : index
    %37 = vector.load %arg2[%c0_49, %c6, %c0_50, %c0_51] : memref<1x8x16x128xf32, #tpu.memory_space<vmem>>, vector<1x1x16x128xf32>
    %38 = vector.shape_cast %37 : vector<1x1x16x128xf32> to vector<16x128xf32>
    %cst_52 = arith.constant dense<0.000000e+00> : vector<8x128xf32>
    %39 = tpu.matmul %0, %38, %cst_52 {dimension_numbers = #tpu.dot_dimension_numbers<[1], [0], [0], [1], [0, 0, 1, 1], [], []>} : vector<8x16xf32>, vector<16x128xf32>, vector<8x128xf32> -> vector<8x128xf32>
    %c0_53 = arith.constant 0 : index
    %c6_54 = arith.constant 6 : index
    %c0_55 = arith.constant 0 : index
    %c0_56 = arith.constant 0 : index
    %40 = vector.load %arg3[%c0_53, %c6_54, %c0_55, %c0_56] : memref<1x8x8x128xf32, #tpu.memory_space<vmem>>, vector<1x1x8x128xf32>
    %41 = vector.shape_cast %40 : vector<1x1x8x128xf32> to vector<8x128xf32>
    %42 = vector.shape_cast %39 : vector<8x128xf32> to vector<1x1x8x128xf32>
    tpu.vector_store %arg3[%c0_53, %c6_54, %c0_55, %c0_56], %42 {strides = array<i32>} : memref<1x8x8x128xf32, #tpu.memory_space<vmem>>, vector<1x1x8x128xf32>,
    %c0_57 = arith.constant 0 : index
    %c7 = arith.constant 7 : index
    %c0_58 = arith.constant 0 : index
    %c0_59 = arith.constant 0 : index
    %43 = vector.load %arg2[%c0_57, %c7, %c0_58, %c0_59] : memref<1x8x16x128xf32, #tpu.memory_space<vmem>>, vector<1x1x16x128xf32>
    %44 = vector.shape_cast %43 : vector<1x1x16x128xf32> to vector<16x128xf32>
    %cst_60 = arith.constant dense<0.000000e+00> : vector<8x128xf32>
    %45 = tpu.matmul %0, %44, %cst_60 {dimension_numbers = #tpu.dot_dimension_numbers<[1], [0], [0], [1], [0, 0, 1, 1], [], []>} : vector<8x16xf32>, vector<16x128xf32>, vector<8x128xf32> -> vector<8x128xf32>
    %c0_61 = arith.constant 0 : index
    %c7_62 = arith.constant 7 : index
    %c0_63 = arith.constant 0 : index
    %c0_64 = arith.constant 0 : index
    %46 = vector.load %arg3[%c0_61, %c7_62, %c0_63, %c0_64] : memref<1x8x8x128xf32, #tpu.memory_space<vmem>>, vector<1x1x8x128xf32>
    %47 = vector.shape_cast %46 : vector<1x1x8x128xf32> to vector<8x128xf32>
    %48 = vector.shape_cast %45 : vector<8x128xf32> to vector<1x1x8x128xf32>
    tpu.vector_store %arg3[%c0_61, %c7_62, %c0_63, %c0_64], %48 {strides = array<i32>} : memref<1x8x8x128xf32, #tpu.memory_space<vmem>>, vector<1x1x8x128xf32>,
    return
  }
  func.func @transform_0(%arg0: i32) -> (i32, i32) {
    %c0_i32 = arith.constant 0 : i32
    %c0_i32_0 = arith.constant 0 : i32
    %c0_i32_1 = arith.constant 0 : i32
    return %c0_i32, %c0_i32_0 : i32, i32
  }
  func.func @transform_1(%arg0: i32) -> (i32, i32, i32, i32) {
    %c0_i32 = arith.constant 0 : i32
    %c0_i32_0 = arith.constant 0 : i32
    %c0_i32_1 = arith.constant 0 : i32
    %c0_i32_2 = arith.constant 0 : i32
    return %arg0, %c0_i32, %c0_i32_0, %c0_i32_1 : i32, i32, i32, i32
  }
  func.func @transform_2(%arg0: i32) -> (i32, i32, i32, i32) {
    %c0_i32 = arith.constant 0 : i32
    %c0_i32_0 = arith.constant 0 : i32
    %c0_i32_1 = arith.constant 0 : i32
    %c0_i32_2 = arith.constant 0 : i32
    return %arg0, %c0_i32, %c0_i32_0, %c0_i32_1 : i32, i32, i32, i32
  }
}

module attributes {stable_mosaic.version = 11 : i64} {
  func.func @_dw3x3_bn_kernel(%arg0: i32, %arg1: memref<1x6x6x128xf32, #tpu.memory_space<vmem>>, %arg2: memref<9x128xf32, #tpu.memory_space<vmem>>, %arg3: memref<1x128xf32, #tpu.memory_space<vmem>>, %arg4: memref<1x4x4x128xf32, #tpu.memory_space<vmem>>) attributes {dimension_semantics = [#tpu.dimension_semantics<parallel>], iteration_bounds = array<i64: 2>, scalar_prefetch = 0 : i64, scratch_operands = 0 : i64, tpu.core_type = #tpu.core_type<tc>, window_params = [{transform_indices = @transform_0, window_bounds = array<i64: 1, 6, 6, 128>}, {pipeline_mode = #tpu.pipeline_mode<synchronous>, transform_indices = @transform_1, window_bounds = array<i64: 9, 128>}, {pipeline_mode = #tpu.pipeline_mode<synchronous>, transform_indices = @transform_2, window_bounds = array<i64: 1, 128>}, {transform_indices = @transform_3, window_bounds = array<i64: 1, 4, 4, 128>}]} {
    %c0 = arith.constant 0 : index
    %c0_0 = arith.constant 0 : index
    %c0_1 = arith.constant 0 : index
    %c0_2 = arith.constant 0 : index
    %0 = vector.load %arg1[%c0, %c0_0, %c0_1, %c0_2] : memref<1x6x6x128xf32, #tpu.memory_space<vmem>>, vector<1x6x6x128xf32>
    %1 = vector.shape_cast %0 : vector<1x6x6x128xf32> to vector<6x6x128xf32>
    %c0_3 = arith.constant 0 : index
    %c0_4 = arith.constant 0 : index
    %2 = vector.load %arg2[%c0_3, %c0_4] : memref<9x128xf32, #tpu.memory_space<vmem>>, vector<9x128xf32>
    %cst = arith.constant 0.000000e+00 : f32
    %3 = vector.broadcast %cst : f32 to vector<4x4x128xf32>
    %4 = vector.extract_strided_slice %1 {offsets = [0, 0, 0], sizes = [4, 4, 128], strides = [1, 1, 1]} : vector<6x6x128xf32> to vector<4x4x128xf32>
    %5 = vector.extract_strided_slice %2 {offsets = [0, 0], sizes = [1, 128], strides = [1, 1]} : vector<9x128xf32> to vector<1x128xf32>
    %6 = vector.shape_cast %5 : vector<1x128xf32> to vector<1x1x128xf32>
    %7 = vector.broadcast %6 : vector<1x1x128xf32> to vector<4x4x128xf32>
    %8 = arith.mulf %4, %7 : vector<4x4x128xf32>
    %9 = arith.addf %3, %8 : vector<4x4x128xf32>
    %10 = vector.extract_strided_slice %1 {offsets = [0, 1, 0], sizes = [4, 4, 128], strides = [1, 1, 1]} : vector<6x6x128xf32> to vector<4x4x128xf32>
    %11 = vector.extract_strided_slice %2 {offsets = [1, 0], sizes = [1, 128], strides = [1, 1]} : vector<9x128xf32> to vector<1x128xf32>
    %12 = vector.shape_cast %11 : vector<1x128xf32> to vector<1x1x128xf32>
    %13 = vector.broadcast %12 : vector<1x1x128xf32> to vector<4x4x128xf32>
    %14 = arith.mulf %10, %13 : vector<4x4x128xf32>
    %15 = arith.addf %9, %14 : vector<4x4x128xf32>
    %16 = vector.extract_strided_slice %1 {offsets = [0, 2, 0], sizes = [4, 4, 128], strides = [1, 1, 1]} : vector<6x6x128xf32> to vector<4x4x128xf32>
    %17 = vector.extract_strided_slice %2 {offsets = [2, 0], sizes = [1, 128], strides = [1, 1]} : vector<9x128xf32> to vector<1x128xf32>
    %18 = vector.shape_cast %17 : vector<1x128xf32> to vector<1x1x128xf32>
    %19 = vector.broadcast %18 : vector<1x1x128xf32> to vector<4x4x128xf32>
    %20 = arith.mulf %16, %19 : vector<4x4x128xf32>
    %21 = arith.addf %15, %20 : vector<4x4x128xf32>
    %22 = vector.extract_strided_slice %1 {offsets = [1, 0, 0], sizes = [4, 4, 128], strides = [1, 1, 1]} : vector<6x6x128xf32> to vector<4x4x128xf32>
    %23 = vector.extract_strided_slice %2 {offsets = [3, 0], sizes = [1, 128], strides = [1, 1]} : vector<9x128xf32> to vector<1x128xf32>
    %24 = vector.shape_cast %23 : vector<1x128xf32> to vector<1x1x128xf32>
    %25 = vector.broadcast %24 : vector<1x1x128xf32> to vector<4x4x128xf32>
    %26 = arith.mulf %22, %25 : vector<4x4x128xf32>
    %27 = arith.addf %21, %26 : vector<4x4x128xf32>
    %28 = vector.extract_strided_slice %1 {offsets = [1, 1, 0], sizes = [4, 4, 128], strides = [1, 1, 1]} : vector<6x6x128xf32> to vector<4x4x128xf32>
    %29 = vector.extract_strided_slice %2 {offsets = [4, 0], sizes = [1, 128], strides = [1, 1]} : vector<9x128xf32> to vector<1x128xf32>
    %30 = vector.shape_cast %29 : vector<1x128xf32> to vector<1x1x128xf32>
    %31 = vector.broadcast %30 : vector<1x1x128xf32> to vector<4x4x128xf32>
    %32 = arith.mulf %28, %31 : vector<4x4x128xf32>
    %33 = arith.addf %27, %32 : vector<4x4x128xf32>
    %34 = vector.extract_strided_slice %1 {offsets = [1, 2, 0], sizes = [4, 4, 128], strides = [1, 1, 1]} : vector<6x6x128xf32> to vector<4x4x128xf32>
    %35 = vector.extract_strided_slice %2 {offsets = [5, 0], sizes = [1, 128], strides = [1, 1]} : vector<9x128xf32> to vector<1x128xf32>
    %36 = vector.shape_cast %35 : vector<1x128xf32> to vector<1x1x128xf32>
    %37 = vector.broadcast %36 : vector<1x1x128xf32> to vector<4x4x128xf32>
    %38 = arith.mulf %34, %37 : vector<4x4x128xf32>
    %39 = arith.addf %33, %38 : vector<4x4x128xf32>
    %40 = vector.extract_strided_slice %1 {offsets = [2, 0, 0], sizes = [4, 4, 128], strides = [1, 1, 1]} : vector<6x6x128xf32> to vector<4x4x128xf32>
    %41 = vector.extract_strided_slice %2 {offsets = [6, 0], sizes = [1, 128], strides = [1, 1]} : vector<9x128xf32> to vector<1x128xf32>
    %42 = vector.shape_cast %41 : vector<1x128xf32> to vector<1x1x128xf32>
    %43 = vector.broadcast %42 : vector<1x1x128xf32> to vector<4x4x128xf32>
    %44 = arith.mulf %40, %43 : vector<4x4x128xf32>
    %45 = arith.addf %39, %44 : vector<4x4x128xf32>
    %46 = vector.extract_strided_slice %1 {offsets = [2, 1, 0], sizes = [4, 4, 128], strides = [1, 1, 1]} : vector<6x6x128xf32> to vector<4x4x128xf32>
    %47 = vector.extract_strided_slice %2 {offsets = [7, 0], sizes = [1, 128], strides = [1, 1]} : vector<9x128xf32> to vector<1x128xf32>
    %48 = vector.shape_cast %47 : vector<1x128xf32> to vector<1x1x128xf32>
    %49 = vector.broadcast %48 : vector<1x1x128xf32> to vector<4x4x128xf32>
    %50 = arith.mulf %46, %49 : vector<4x4x128xf32>
    %51 = arith.addf %45, %50 : vector<4x4x128xf32>
    %52 = vector.extract_strided_slice %1 {offsets = [2, 2, 0], sizes = [4, 4, 128], strides = [1, 1, 1]} : vector<6x6x128xf32> to vector<4x4x128xf32>
    %53 = vector.extract_strided_slice %2 {offsets = [8, 0], sizes = [1, 128], strides = [1, 1]} : vector<9x128xf32> to vector<1x128xf32>
    %54 = vector.shape_cast %53 : vector<1x128xf32> to vector<1x1x128xf32>
    %55 = vector.broadcast %54 : vector<1x1x128xf32> to vector<4x4x128xf32>
    %56 = arith.mulf %52, %55 : vector<4x4x128xf32>
    %57 = arith.addf %51, %56 : vector<4x4x128xf32>
    %c0_5 = arith.constant 0 : index
    %c0_6 = arith.constant 0 : index
    %58 = vector.load %arg3[%c0_5, %c0_6] : memref<1x128xf32, #tpu.memory_space<vmem>>, vector<1x128xf32>
    %59 = vector.shape_cast %58 : vector<1x128xf32> to vector<1x1x128xf32>
    %60 = vector.broadcast %59 : vector<1x1x128xf32> to vector<4x4x128xf32>
    %61 = arith.addf %57, %60 : vector<4x4x128xf32>
    %cst_7 = arith.constant 0.000000e+00 : f32
    %62 = vector.broadcast %cst_7 : f32 to vector<4x4x128xf32>
    %63 = arith.maximumf %61, %62 : vector<4x4x128xf32>
    %c0_8 = arith.constant 0 : index
    %c0_9 = arith.constant 0 : index
    %c0_10 = arith.constant 0 : index
    %c0_11 = arith.constant 0 : index
    %64 = vector.load %arg4[%c0_8, %c0_9, %c0_10, %c0_11] : memref<1x4x4x128xf32, #tpu.memory_space<vmem>>, vector<1x4x4x128xf32>
    %65 = vector.shape_cast %64 : vector<1x4x4x128xf32> to vector<4x4x128xf32>
    %66 = vector.shape_cast %63 : vector<4x4x128xf32> to vector<1x4x4x128xf32>
    tpu.vector_store %arg4[%c0_8, %c0_9, %c0_10, %c0_11], %66 {strides = array<i32>} : memref<1x4x4x128xf32, #tpu.memory_space<vmem>>, vector<1x4x4x128xf32>,
    return
  }
  func.func @transform_0(%arg0: i32) -> (i32, i32, i32, i32) {
    %c0_i32 = arith.constant 0 : i32
    %c0_i32_0 = arith.constant 0 : i32
    %c0_i32_1 = arith.constant 0 : i32
    %c0_i32_2 = arith.constant 0 : i32
    return %arg0, %c0_i32, %c0_i32_0, %c0_i32_1 : i32, i32, i32, i32
  }
  func.func @transform_1(%arg0: i32) -> (i32, i32) {
    %c0_i32 = arith.constant 0 : i32
    %c0_i32_0 = arith.constant 0 : i32
    %c0_i32_1 = arith.constant 0 : i32
    return %c0_i32, %c0_i32_0 : i32, i32
  }
  func.func @transform_2(%arg0: i32) -> (i32, i32) {
    %c0_i32 = arith.constant 0 : i32
    %c0_i32_0 = arith.constant 0 : i32
    %c0_i32_1 = arith.constant 0 : i32
    return %c0_i32, %c0_i32_0 : i32, i32
  }
  func.func @transform_3(%arg0: i32) -> (i32, i32, i32, i32) {
    %c0_i32 = arith.constant 0 : i32
    %c0_i32_0 = arith.constant 0 : i32
    %c0_i32_1 = arith.constant 0 : i32
    %c0_i32_2 = arith.constant 0 : i32
    return %arg0, %c0_i32, %c0_i32_0, %c0_i32_1 : i32, i32, i32, i32
  }
}

module attributes {stable_mosaic.version = 11 : i64} {
  func.func @_row_pass_kernel(%arg0: i32, %arg1: memref<8x4xf32, #tpu.memory_space<vmem>>, %arg2: memref<1x4x512xf32, #tpu.memory_space<vmem>>, %arg3: memref<1x8x512xf32, #tpu.memory_space<vmem>>) attributes {dimension_semantics = [#tpu.dimension_semantics<parallel>], iteration_bounds = array<i64: 2>, scalar_prefetch = 0 : i64, scratch_operands = 0 : i64, tpu.core_type = #tpu.core_type<tc>, window_params = [{pipeline_mode = #tpu.pipeline_mode<synchronous>, transform_indices = @transform_0, window_bounds = array<i64: 8, 4>}, {transform_indices = @transform_1, window_bounds = array<i64: 1, 4, 512>}, {transform_indices = @transform_2, window_bounds = array<i64: 1, 8, 512>}]} {
    %c0 = arith.constant 0 : index
    %c0_0 = arith.constant 0 : index
    %0 = vector.load %arg1[%c0, %c0_0] : memref<8x4xf32, #tpu.memory_space<vmem>>, vector<8x4xf32>
    %c0_1 = arith.constant 0 : index
    %c0_2 = arith.constant 0 : index
    %c0_3 = arith.constant 0 : index
    %1 = vector.load %arg2[%c0_1, %c0_2, %c0_3] : memref<1x4x512xf32, #tpu.memory_space<vmem>>, vector<1x4x512xf32>
    %2 = vector.shape_cast %1 : vector<1x4x512xf32> to vector<4x512xf32>
    %cst = arith.constant dense<0.000000e+00> : vector<8x512xf32>
    %3 = tpu.matmul %0, %2, %cst {dimension_numbers = #tpu.dot_dimension_numbers<[1], [0], [0], [1], [0, 0, 1, 1], [], []>} : vector<8x4xf32>, vector<4x512xf32>, vector<8x512xf32> -> vector<8x512xf32>
    %c0_4 = arith.constant 0 : index
    %c0_5 = arith.constant 0 : index
    %c0_6 = arith.constant 0 : index
    %4 = vector.load %arg3[%c0_4, %c0_5, %c0_6] : memref<1x8x512xf32, #tpu.memory_space<vmem>>, vector<1x8x512xf32>
    %5 = vector.shape_cast %4 : vector<1x8x512xf32> to vector<8x512xf32>
    %6 = vector.shape_cast %3 : vector<8x512xf32> to vector<1x8x512xf32>
    tpu.vector_store %arg3[%c0_4, %c0_5, %c0_6], %6 {strides = array<i32>} : memref<1x8x512xf32, #tpu.memory_space<vmem>>, vector<1x8x512xf32>,
    return
  }
  func.func @transform_0(%arg0: i32) -> (i32, i32) {
    %c0_i32 = arith.constant 0 : i32
    %c0_i32_0 = arith.constant 0 : i32
    %c0_i32_1 = arith.constant 0 : i32
    return %c0_i32, %c0_i32_0 : i32, i32
  }
  func.func @transform_1(%arg0: i32) -> (i32, i32, i32) {
    %c0_i32 = arith.constant 0 : i32
    %c0_i32_0 = arith.constant 0 : i32
    %c0_i32_1 = arith.constant 0 : i32
    return %arg0, %c0_i32, %c0_i32_0 : i32, i32, i32
  }
  func.func @transform_2(%arg0: i32) -> (i32, i32, i32) {
    %c0_i32 = arith.constant 0 : i32
    %c0_i32_0 = arith.constant 0 : i32
    %c0_i32_1 = arith.constant 0 : i32
    return %arg0, %c0_i32, %c0_i32_0 : i32, i32, i32
  }
}

module attributes {stable_mosaic.version = 11 : i64} {
  func.func @_col_pass_res_kernel(%arg0: i32, %arg1: memref<8x4xf32, #tpu.memory_space<vmem>>, %arg2: memref<1x8x4x128xf32, #tpu.memory_space<vmem>>, %arg3: memref<1x8x8x128xf32, #tpu.memory_space<vmem>>, %arg4: memref<1x8x8x128xf32, #tpu.memory_space<vmem>>) attributes {dimension_semantics = [#tpu.dimension_semantics<parallel>], iteration_bounds = array<i64: 2>, scalar_prefetch = 0 : i64, scratch_operands = 0 : i64, tpu.core_type = #tpu.core_type<tc>, window_params = [{pipeline_mode = #tpu.pipeline_mode<synchronous>, transform_indices = @transform_0, window_bounds = array<i64: 8, 4>}, {transform_indices = @transform_1, window_bounds = array<i64: 1, 8, 4, 128>}, {transform_indices = @transform_2, window_bounds = array<i64: 1, 8, 8, 128>}, {transform_indices = @transform_3, window_bounds = array<i64: 1, 8, 8, 128>}]} {
    %c0 = arith.constant 0 : index
    %c0_0 = arith.constant 0 : index
    %0 = vector.load %arg1[%c0, %c0_0] : memref<8x4xf32, #tpu.memory_space<vmem>>, vector<8x4xf32>
    %c0_1 = arith.constant 0 : index
    %c0_2 = arith.constant 0 : index
    %c0_3 = arith.constant 0 : index
    %c0_4 = arith.constant 0 : index
    %1 = vector.load %arg2[%c0_1, %c0_2, %c0_3, %c0_4] : memref<1x8x4x128xf32, #tpu.memory_space<vmem>>, vector<1x1x4x128xf32>
    %2 = vector.shape_cast %1 : vector<1x1x4x128xf32> to vector<4x128xf32>
    %cst = arith.constant dense<0.000000e+00> : vector<8x128xf32>
    %3 = tpu.matmul %0, %2, %cst {dimension_numbers = #tpu.dot_dimension_numbers<[1], [0], [0], [1], [0, 0, 1, 1], [], []>} : vector<8x4xf32>, vector<4x128xf32>, vector<8x128xf32> -> vector<8x128xf32>
    %c0_5 = arith.constant 0 : index
    %c0_6 = arith.constant 0 : index
    %c0_7 = arith.constant 0 : index
    %c0_8 = arith.constant 0 : index
    %4 = vector.load %arg3[%c0_5, %c0_6, %c0_7, %c0_8] : memref<1x8x8x128xf32, #tpu.memory_space<vmem>>, vector<1x1x8x128xf32>
    %5 = vector.shape_cast %4 : vector<1x1x8x128xf32> to vector<8x128xf32>
    %6 = arith.addf %3, %5 : vector<8x128xf32>
    %c0_9 = arith.constant 0 : index
    %c0_10 = arith.constant 0 : index
    %c0_11 = arith.constant 0 : index
    %c0_12 = arith.constant 0 : index
    %7 = vector.load %arg4[%c0_9, %c0_10, %c0_11, %c0_12] : memref<1x8x8x128xf32, #tpu.memory_space<vmem>>, vector<1x1x8x128xf32>
    %8 = vector.shape_cast %7 : vector<1x1x8x128xf32> to vector<8x128xf32>
    %9 = vector.shape_cast %6 : vector<8x128xf32> to vector<1x1x8x128xf32>
    tpu.vector_store %arg4[%c0_9, %c0_10, %c0_11, %c0_12], %9 {strides = array<i32>} : memref<1x8x8x128xf32, #tpu.memory_space<vmem>>, vector<1x1x8x128xf32>,
    %c0_13 = arith.constant 0 : index
    %c1 = arith.constant 1 : index
    %c0_14 = arith.constant 0 : index
    %c0_15 = arith.constant 0 : index
    %10 = vector.load %arg2[%c0_13, %c1, %c0_14, %c0_15] : memref<1x8x4x128xf32, #tpu.memory_space<vmem>>, vector<1x1x4x128xf32>
    %11 = vector.shape_cast %10 : vector<1x1x4x128xf32> to vector<4x128xf32>
    %cst_16 = arith.constant dense<0.000000e+00> : vector<8x128xf32>
    %12 = tpu.matmul %0, %11, %cst_16 {dimension_numbers = #tpu.dot_dimension_numbers<[1], [0], [0], [1], [0, 0, 1, 1], [], []>} : vector<8x4xf32>, vector<4x128xf32>, vector<8x128xf32> -> vector<8x128xf32>
    %c0_17 = arith.constant 0 : index
    %c1_18 = arith.constant 1 : index
    %c0_19 = arith.constant 0 : index
    %c0_20 = arith.constant 0 : index
    %13 = vector.load %arg3[%c0_17, %c1_18, %c0_19, %c0_20] : memref<1x8x8x128xf32, #tpu.memory_space<vmem>>, vector<1x1x8x128xf32>
    %14 = vector.shape_cast %13 : vector<1x1x8x128xf32> to vector<8x128xf32>
    %15 = arith.addf %12, %14 : vector<8x128xf32>
    %c0_21 = arith.constant 0 : index
    %c1_22 = arith.constant 1 : index
    %c0_23 = arith.constant 0 : index
    %c0_24 = arith.constant 0 : index
    %16 = vector.load %arg4[%c0_21, %c1_22, %c0_23, %c0_24] : memref<1x8x8x128xf32, #tpu.memory_space<vmem>>, vector<1x1x8x128xf32>
    %17 = vector.shape_cast %16 : vector<1x1x8x128xf32> to vector<8x128xf32>
    %18 = vector.shape_cast %15 : vector<8x128xf32> to vector<1x1x8x128xf32>
    tpu.vector_store %arg4[%c0_21, %c1_22, %c0_23, %c0_24], %18 {strides = array<i32>} : memref<1x8x8x128xf32, #tpu.memory_space<vmem>>, vector<1x1x8x128xf32>,
    %c0_25 = arith.constant 0 : index
    %c2 = arith.constant 2 : index
    %c0_26 = arith.constant 0 : index
    %c0_27 = arith.constant 0 : index
    %19 = vector.load %arg2[%c0_25, %c2, %c0_26, %c0_27] : memref<1x8x4x128xf32, #tpu.memory_space<vmem>>, vector<1x1x4x128xf32>
    %20 = vector.shape_cast %19 : vector<1x1x4x128xf32> to vector<4x128xf32>
    %cst_28 = arith.constant dense<0.000000e+00> : vector<8x128xf32>
    %21 = tpu.matmul %0, %20, %cst_28 {dimension_numbers = #tpu.dot_dimension_numbers<[1], [0], [0], [1], [0, 0, 1, 1], [], []>} : vector<8x4xf32>, vector<4x128xf32>, vector<8x128xf32> -> vector<8x128xf32>
    %c0_29 = arith.constant 0 : index
    %c2_30 = arith.constant 2 : index
    %c0_31 = arith.constant 0 : index
    %c0_32 = arith.constant 0 : index
    %22 = vector.load %arg3[%c0_29, %c2_30, %c0_31, %c0_32] : memref<1x8x8x128xf32, #tpu.memory_space<vmem>>, vector<1x1x8x128xf32>
    %23 = vector.shape_cast %22 : vector<1x1x8x128xf32> to vector<8x128xf32>
    %24 = arith.addf %21, %23 : vector<8x128xf32>
    %c0_33 = arith.constant 0 : index
    %c2_34 = arith.constant 2 : index
    %c0_35 = arith.constant 0 : index
    %c0_36 = arith.constant 0 : index
    %25 = vector.load %arg4[%c0_33, %c2_34, %c0_35, %c0_36] : memref<1x8x8x128xf32, #tpu.memory_space<vmem>>, vector<1x1x8x128xf32>
    %26 = vector.shape_cast %25 : vector<1x1x8x128xf32> to vector<8x128xf32>
    %27 = vector.shape_cast %24 : vector<8x128xf32> to vector<1x1x8x128xf32>
    tpu.vector_store %arg4[%c0_33, %c2_34, %c0_35, %c0_36], %27 {strides = array<i32>} : memref<1x8x8x128xf32, #tpu.memory_space<vmem>>, vector<1x1x8x128xf32>,
    %c0_37 = arith.constant 0 : index
    %c3 = arith.constant 3 : index
    %c0_38 = arith.constant 0 : index
    %c0_39 = arith.constant 0 : index
    %28 = vector.load %arg2[%c0_37, %c3, %c0_38, %c0_39] : memref<1x8x4x128xf32, #tpu.memory_space<vmem>>, vector<1x1x4x128xf32>
    %29 = vector.shape_cast %28 : vector<1x1x4x128xf32> to vector<4x128xf32>
    %cst_40 = arith.constant dense<0.000000e+00> : vector<8x128xf32>
    %30 = tpu.matmul %0, %29, %cst_40 {dimension_numbers = #tpu.dot_dimension_numbers<[1], [0], [0], [1], [0, 0, 1, 1], [], []>} : vector<8x4xf32>, vector<4x128xf32>, vector<8x128xf32> -> vector<8x128xf32>
    %c0_41 = arith.constant 0 : index
    %c3_42 = arith.constant 3 : index
    %c0_43 = arith.constant 0 : index
    %c0_44 = arith.constant 0 : index
    %31 = vector.load %arg3[%c0_41, %c3_42, %c0_43, %c0_44] : memref<1x8x8x128xf32, #tpu.memory_space<vmem>>, vector<1x1x8x128xf32>
    %32 = vector.shape_cast %31 : vector<1x1x8x128xf32> to vector<8x128xf32>
    %33 = arith.addf %30, %32 : vector<8x128xf32>
    %c0_45 = arith.constant 0 : index
    %c3_46 = arith.constant 3 : index
    %c0_47 = arith.constant 0 : index
    %c0_48 = arith.constant 0 : index
    %34 = vector.load %arg4[%c0_45, %c3_46, %c0_47, %c0_48] : memref<1x8x8x128xf32, #tpu.memory_space<vmem>>, vector<1x1x8x128xf32>
    %35 = vector.shape_cast %34 : vector<1x1x8x128xf32> to vector<8x128xf32>
    %36 = vector.shape_cast %33 : vector<8x128xf32> to vector<1x1x8x128xf32>
    tpu.vector_store %arg4[%c0_45, %c3_46, %c0_47, %c0_48], %36 {strides = array<i32>} : memref<1x8x8x128xf32, #tpu.memory_space<vmem>>, vector<1x1x8x128xf32>,
    %c0_49 = arith.constant 0 : index
    %c4 = arith.constant 4 : index
    %c0_50 = arith.constant 0 : index
    %c0_51 = arith.constant 0 : index
    %37 = vector.load %arg2[%c0_49, %c4, %c0_50, %c0_51] : memref<1x8x4x128xf32, #tpu.memory_space<vmem>>, vector<1x1x4x128xf32>
    %38 = vector.shape_cast %37 : vector<1x1x4x128xf32> to vector<4x128xf32>
    %cst_52 = arith.constant dense<0.000000e+00> : vector<8x128xf32>
    %39 = tpu.matmul %0, %38, %cst_52 {dimension_numbers = #tpu.dot_dimension_numbers<[1], [0], [0], [1], [0, 0, 1, 1], [], []>} : vector<8x4xf32>, vector<4x128xf32>, vector<8x128xf32> -> vector<8x128xf32>
    %c0_53 = arith.constant 0 : index
    %c4_54 = arith.constant 4 : index
    %c0_55 = arith.constant 0 : index
    %c0_56 = arith.constant 0 : index
    %40 = vector.load %arg3[%c0_53, %c4_54, %c0_55, %c0_56] : memref<1x8x8x128xf32, #tpu.memory_space<vmem>>, vector<1x1x8x128xf32>
    %41 = vector.shape_cast %40 : vector<1x1x8x128xf32> to vector<8x128xf32>
    %42 = arith.addf %39, %41 : vector<8x128xf32>
    %c0_57 = arith.constant 0 : index
    %c4_58 = arith.constant 4 : index
    %c0_59 = arith.constant 0 : index
    %c0_60 = arith.constant 0 : index
    %43 = vector.load %arg4[%c0_57, %c4_58, %c0_59, %c0_60] : memref<1x8x8x128xf32, #tpu.memory_space<vmem>>, vector<1x1x8x128xf32>
    %44 = vector.shape_cast %43 : vector<1x1x8x128xf32> to vector<8x128xf32>
    %45 = vector.shape_cast %42 : vector<8x128xf32> to vector<1x1x8x128xf32>
    tpu.vector_store %arg4[%c0_57, %c4_58, %c0_59, %c0_60], %45 {strides = array<i32>} : memref<1x8x8x128xf32, #tpu.memory_space<vmem>>, vector<1x1x8x128xf32>,
    %c0_61 = arith.constant 0 : index
    %c5 = arith.constant 5 : index
    %c0_62 = arith.constant 0 : index
    %c0_63 = arith.constant 0 : index
    %46 = vector.load %arg2[%c0_61, %c5, %c0_62, %c0_63] : memref<1x8x4x128xf32, #tpu.memory_space<vmem>>, vector<1x1x4x128xf32>
    %47 = vector.shape_cast %46 : vector<1x1x4x128xf32> to vector<4x128xf32>
    %cst_64 = arith.constant dense<0.000000e+00> : vector<8x128xf32>
    %48 = tpu.matmul %0, %47, %cst_64 {dimension_numbers = #tpu.dot_dimension_numbers<[1], [0], [0], [1], [0, 0, 1, 1], [], []>} : vector<8x4xf32>, vector<4x128xf32>, vector<8x128xf32> -> vector<8x128xf32>
    %c0_65 = arith.constant 0 : index
    %c5_66 = arith.constant 5 : index
    %c0_67 = arith.constant 0 : index
    %c0_68 = arith.constant 0 : index
    %49 = vector.load %arg3[%c0_65, %c5_66, %c0_67, %c0_68] : memref<1x8x8x128xf32, #tpu.memory_space<vmem>>, vector<1x1x8x128xf32>
    %50 = vector.shape_cast %49 : vector<1x1x8x128xf32> to vector<8x128xf32>
    %51 = arith.addf %48, %50 : vector<8x128xf32>
    %c0_69 = arith.constant 0 : index
    %c5_70 = arith.constant 5 : index
    %c0_71 = arith.constant 0 : index
    %c0_72 = arith.constant 0 : index
    %52 = vector.load %arg4[%c0_69, %c5_70, %c0_71, %c0_72] : memref<1x8x8x128xf32, #tpu.memory_space<vmem>>, vector<1x1x8x128xf32>
    %53 = vector.shape_cast %52 : vector<1x1x8x128xf32> to vector<8x128xf32>
    %54 = vector.shape_cast %51 : vector<8x128xf32> to vector<1x1x8x128xf32>
    tpu.vector_store %arg4[%c0_69, %c5_70, %c0_71, %c0_72], %54 {strides = array<i32>} : memref<1x8x8x128xf32, #tpu.memory_space<vmem>>, vector<1x1x8x128xf32>,
    %c0_73 = arith.constant 0 : index
    %c6 = arith.constant 6 : index
    %c0_74 = arith.constant 0 : index
    %c0_75 = arith.constant 0 : index
    %55 = vector.load %arg2[%c0_73, %c6, %c0_74, %c0_75] : memref<1x8x4x128xf32, #tpu.memory_space<vmem>>, vector<1x1x4x128xf32>
    %56 = vector.shape_cast %55 : vector<1x1x4x128xf32> to vector<4x128xf32>
    %cst_76 = arith.constant dense<0.000000e+00> : vector<8x128xf32>
    %57 = tpu.matmul %0, %56, %cst_76 {dimension_numbers = #tpu.dot_dimension_numbers<[1], [0], [0], [1], [0, 0, 1, 1], [], []>} : vector<8x4xf32>, vector<4x128xf32>, vector<8x128xf32> -> vector<8x128xf32>
    %c0_77 = arith.constant 0 : index
    %c6_78 = arith.constant 6 : index
    %c0_79 = arith.constant 0 : index
    %c0_80 = arith.constant 0 : index
    %58 = vector.load %arg3[%c0_77, %c6_78, %c0_79, %c0_80] : memref<1x8x8x128xf32, #tpu.memory_space<vmem>>, vector<1x1x8x128xf32>
    %59 = vector.shape_cast %58 : vector<1x1x8x128xf32> to vector<8x128xf32>
    %60 = arith.addf %57, %59 : vector<8x128xf32>
    %c0_81 = arith.constant 0 : index
    %c6_82 = arith.constant 6 : index
    %c0_83 = arith.constant 0 : index
    %c0_84 = arith.constant 0 : index
    %61 = vector.load %arg4[%c0_81, %c6_82, %c0_83, %c0_84] : memref<1x8x8x128xf32, #tpu.memory_space<vmem>>, vector<1x1x8x128xf32>
    %62 = vector.shape_cast %61 : vector<1x1x8x128xf32> to vector<8x128xf32>
    %63 = vector.shape_cast %60 : vector<8x128xf32> to vector<1x1x8x128xf32>
    tpu.vector_store %arg4[%c0_81, %c6_82, %c0_83, %c0_84], %63 {strides = array<i32>} : memref<1x8x8x128xf32, #tpu.memory_space<vmem>>, vector<1x1x8x128xf32>,
    %c0_85 = arith.constant 0 : index
    %c7 = arith.constant 7 : index
    %c0_86 = arith.constant 0 : index
    %c0_87 = arith.constant 0 : index
    %64 = vector.load %arg2[%c0_85, %c7, %c0_86, %c0_87] : memref<1x8x4x128xf32, #tpu.memory_space<vmem>>, vector<1x1x4x128xf32>
    %65 = vector.shape_cast %64 : vector<1x1x4x128xf32> to vector<4x128xf32>
    %cst_88 = arith.constant dense<0.000000e+00> : vector<8x128xf32>
    %66 = tpu.matmul %0, %65, %cst_88 {dimension_numbers = #tpu.dot_dimension_numbers<[1], [0], [0], [1], [0, 0, 1, 1], [], []>} : vector<8x4xf32>, vector<4x128xf32>, vector<8x128xf32> -> vector<8x128xf32>
    %c0_89 = arith.constant 0 : index
    %c7_90 = arith.constant 7 : index
    %c0_91 = arith.constant 0 : index
    %c0_92 = arith.constant 0 : index
    %67 = vector.load %arg3[%c0_89, %c7_90, %c0_91, %c0_92] : memref<1x8x8x128xf32, #tpu.memory_space<vmem>>, vector<1x1x8x128xf32>
    %68 = vector.shape_cast %67 : vector<1x1x8x128xf32> to vector<8x128xf32>
    %69 = arith.addf %66, %68 : vector<8x128xf32>
    %c0_93 = arith.constant 0 : index
    %c7_94 = arith.constant 7 : index
    %c0_95 = arith.constant 0 : index
    %c0_96 = arith.constant 0 : index
    %70 = vector.load %arg4[%c0_93, %c7_94, %c0_95, %c0_96] : memref<1x8x8x128xf32, #tpu.memory_space<vmem>>, vector<1x1x8x128xf32>
    %71 = vector.shape_cast %70 : vector<1x1x8x128xf32> to vector<8x128xf32>
    %72 = vector.shape_cast %69 : vector<8x128xf32> to vector<1x1x8x128xf32>
    tpu.vector_store %arg4[%c0_93, %c7_94, %c0_95, %c0_96], %72 {strides = array<i32>} : memref<1x8x8x128xf32, #tpu.memory_space<vmem>>, vector<1x1x8x128xf32>,
    return
  }
  func.func @transform_0(%arg0: i32) -> (i32, i32) {
    %c0_i32 = arith.constant 0 : i32
    %c0_i32_0 = arith.constant 0 : i32
    %c0_i32_1 = arith.constant 0 : i32
    return %c0_i32, %c0_i32_0 : i32, i32
  }
  func.func @transform_1(%arg0: i32) -> (i32, i32, i32, i32) {
    %c0_i32 = arith.constant 0 : i32
    %c0_i32_0 = arith.constant 0 : i32
    %c0_i32_1 = arith.constant 0 : i32
    %c0_i32_2 = arith.constant 0 : i32
    return %arg0, %c0_i32, %c0_i32_0, %c0_i32_1 : i32, i32, i32, i32
  }
  func.func @transform_2(%arg0: i32) -> (i32, i32, i32, i32) {
    %c0_i32 = arith.constant 0 : i32
    %c0_i32_0 = arith.constant 0 : i32
    %c0_i32_1 = arith.constant 0 : i32
    %c0_i32_2 = arith.constant 0 : i32
    return %arg0, %c0_i32, %c0_i32_0, %c0_i32_1 : i32, i32, i32, i32
  }
  func.func @transform_3(%arg0: i32) -> (i32, i32, i32, i32) {
    %c0_i32 = arith.constant 0 : i32
    %c0_i32_0 = arith.constant 0 : i32
    %c0_i32_1 = arith.constant 0 : i32
    %c0_i32_2 = arith.constant 0 : i32
    return %arg0, %c0_i32, %c0_i32_0, %c0_i32_1 : i32, i32, i32, i32
  }
}

module attributes {stable_mosaic.version = 11 : i64} {
  func.func @_process8_kernel(%arg0: i32, %arg1: memref<1x10x10x128xf32, #tpu.memory_space<vmem>>, %arg2: memref<9x128xf32, #tpu.memory_space<vmem>>, %arg3: memref<1x128xf32, #tpu.memory_space<vmem>>, %arg4: memref<128x128xf32, #tpu.memory_space<vmem>>, %arg5: memref<1x128xf32, #tpu.memory_space<vmem>>, %arg6: memref<1x8x8x128xf32, #tpu.memory_space<vmem>>) attributes {dimension_semantics = [#tpu.dimension_semantics<parallel>], iteration_bounds = array<i64: 2>, scalar_prefetch = 0 : i64, scratch_operands = 0 : i64, tpu.core_type = #tpu.core_type<tc>, window_params = [{transform_indices = @transform_0, window_bounds = array<i64: 1, 10, 10, 128>}, {pipeline_mode = #tpu.pipeline_mode<synchronous>, transform_indices = @transform_1, window_bounds = array<i64: 9, 128>}, {pipeline_mode = #tpu.pipeline_mode<synchronous>, transform_indices = @transform_2, window_bounds = array<i64: 1, 128>}, {pipeline_mode = #tpu.pipeline_mode<synchronous>, transform_indices = @transform_3, window_bounds = array<i64: 128, 128>}, {pipeline_mode = #tpu.pipeline_mode<synchronous>, transform_indices = @transform_4, window_bounds = array<i64: 1, 128>}, {transform_indices = @transform_5, window_bounds = array<i64: 1, 8, 8, 128>}]} {
    %c0 = arith.constant 0 : index
    %c0_0 = arith.constant 0 : index
    %c0_1 = arith.constant 0 : index
    %c0_2 = arith.constant 0 : index
    %0 = vector.load %arg1[%c0, %c0_0, %c0_1, %c0_2] : memref<1x10x10x128xf32, #tpu.memory_space<vmem>>, vector<1x10x10x128xf32>
    %1 = vector.shape_cast %0 : vector<1x10x10x128xf32> to vector<10x10x128xf32>
    %c0_3 = arith.constant 0 : index
    %c0_4 = arith.constant 0 : index
    %2 = vector.load %arg2[%c0_3, %c0_4] : memref<9x128xf32, #tpu.memory_space<vmem>>, vector<9x128xf32>
    %cst = arith.constant 0.000000e+00 : f32
    %3 = vector.broadcast %cst : f32 to vector<8x8x128xf32>
    %4 = vector.extract_strided_slice %1 {offsets = [0, 0, 0], sizes = [8, 8, 128], strides = [1, 1, 1]} : vector<10x10x128xf32> to vector<8x8x128xf32>
    %5 = vector.extract_strided_slice %2 {offsets = [0, 0], sizes = [1, 128], strides = [1, 1]} : vector<9x128xf32> to vector<1x128xf32>
    %6 = vector.shape_cast %5 : vector<1x128xf32> to vector<1x1x128xf32>
    %7 = vector.broadcast %6 : vector<1x1x128xf32> to vector<8x8x128xf32>
    %8 = arith.mulf %4, %7 : vector<8x8x128xf32>
    %9 = arith.addf %3, %8 : vector<8x8x128xf32>
    %10 = vector.extract_strided_slice %1 {offsets = [0, 1, 0], sizes = [8, 8, 128], strides = [1, 1, 1]} : vector<10x10x128xf32> to vector<8x8x128xf32>
    %11 = vector.extract_strided_slice %2 {offsets = [1, 0], sizes = [1, 128], strides = [1, 1]} : vector<9x128xf32> to vector<1x128xf32>
    %12 = vector.shape_cast %11 : vector<1x128xf32> to vector<1x1x128xf32>
    %13 = vector.broadcast %12 : vector<1x1x128xf32> to vector<8x8x128xf32>
    %14 = arith.mulf %10, %13 : vector<8x8x128xf32>
    %15 = arith.addf %9, %14 : vector<8x8x128xf32>
    %16 = vector.extract_strided_slice %1 {offsets = [0, 2, 0], sizes = [8, 8, 128], strides = [1, 1, 1]} : vector<10x10x128xf32> to vector<8x8x128xf32>
    %17 = vector.extract_strided_slice %2 {offsets = [2, 0], sizes = [1, 128], strides = [1, 1]} : vector<9x128xf32> to vector<1x128xf32>
    %18 = vector.shape_cast %17 : vector<1x128xf32> to vector<1x1x128xf32>
    %19 = vector.broadcast %18 : vector<1x1x128xf32> to vector<8x8x128xf32>
    %20 = arith.mulf %16, %19 : vector<8x8x128xf32>
    %21 = arith.addf %15, %20 : vector<8x8x128xf32>
    %22 = vector.extract_strided_slice %1 {offsets = [1, 0, 0], sizes = [8, 8, 128], strides = [1, 1, 1]} : vector<10x10x128xf32> to vector<8x8x128xf32>
    %23 = vector.extract_strided_slice %2 {offsets = [3, 0], sizes = [1, 128], strides = [1, 1]} : vector<9x128xf32> to vector<1x128xf32>
    %24 = vector.shape_cast %23 : vector<1x128xf32> to vector<1x1x128xf32>
    %25 = vector.broadcast %24 : vector<1x1x128xf32> to vector<8x8x128xf32>
    %26 = arith.mulf %22, %25 : vector<8x8x128xf32>
    %27 = arith.addf %21, %26 : vector<8x8x128xf32>
    %28 = vector.extract_strided_slice %1 {offsets = [1, 1, 0], sizes = [8, 8, 128], strides = [1, 1, 1]} : vector<10x10x128xf32> to vector<8x8x128xf32>
    %29 = vector.extract_strided_slice %2 {offsets = [4, 0], sizes = [1, 128], strides = [1, 1]} : vector<9x128xf32> to vector<1x128xf32>
    %30 = vector.shape_cast %29 : vector<1x128xf32> to vector<1x1x128xf32>
    %31 = vector.broadcast %30 : vector<1x1x128xf32> to vector<8x8x128xf32>
    %32 = arith.mulf %28, %31 : vector<8x8x128xf32>
    %33 = arith.addf %27, %32 : vector<8x8x128xf32>
    %34 = vector.extract_strided_slice %1 {offsets = [1, 2, 0], sizes = [8, 8, 128], strides = [1, 1, 1]} : vector<10x10x128xf32> to vector<8x8x128xf32>
    %35 = vector.extract_strided_slice %2 {offsets = [5, 0], sizes = [1, 128], strides = [1, 1]} : vector<9x128xf32> to vector<1x128xf32>
    %36 = vector.shape_cast %35 : vector<1x128xf32> to vector<1x1x128xf32>
    %37 = vector.broadcast %36 : vector<1x1x128xf32> to vector<8x8x128xf32>
    %38 = arith.mulf %34, %37 : vector<8x8x128xf32>
    %39 = arith.addf %33, %38 : vector<8x8x128xf32>
    %40 = vector.extract_strided_slice %1 {offsets = [2, 0, 0], sizes = [8, 8, 128], strides = [1, 1, 1]} : vector<10x10x128xf32> to vector<8x8x128xf32>
    %41 = vector.extract_strided_slice %2 {offsets = [6, 0], sizes = [1, 128], strides = [1, 1]} : vector<9x128xf32> to vector<1x128xf32>
    %42 = vector.shape_cast %41 : vector<1x128xf32> to vector<1x1x128xf32>
    %43 = vector.broadcast %42 : vector<1x1x128xf32> to vector<8x8x128xf32>
    %44 = arith.mulf %40, %43 : vector<8x8x128xf32>
    %45 = arith.addf %39, %44 : vector<8x8x128xf32>
    %46 = vector.extract_strided_slice %1 {offsets = [2, 1, 0], sizes = [8, 8, 128], strides = [1, 1, 1]} : vector<10x10x128xf32> to vector<8x8x128xf32>
    %47 = vector.extract_strided_slice %2 {offsets = [7, 0], sizes = [1, 128], strides = [1, 1]} : vector<9x128xf32> to vector<1x128xf32>
    %48 = vector.shape_cast %47 : vector<1x128xf32> to vector<1x1x128xf32>
    %49 = vector.broadcast %48 : vector<1x1x128xf32> to vector<8x8x128xf32>
    %50 = arith.mulf %46, %49 : vector<8x8x128xf32>
    %51 = arith.addf %45, %50 : vector<8x8x128xf32>
    %52 = vector.extract_strided_slice %1 {offsets = [2, 2, 0], sizes = [8, 8, 128], strides = [1, 1, 1]} : vector<10x10x128xf32> to vector<8x8x128xf32>
    %53 = vector.extract_strided_slice %2 {offsets = [8, 0], sizes = [1, 128], strides = [1, 1]} : vector<9x128xf32> to vector<1x128xf32>
    %54 = vector.shape_cast %53 : vector<1x128xf32> to vector<1x1x128xf32>
    %55 = vector.broadcast %54 : vector<1x1x128xf32> to vector<8x8x128xf32>
    %56 = arith.mulf %52, %55 : vector<8x8x128xf32>
    %57 = arith.addf %51, %56 : vector<8x8x128xf32>
    %c0_5 = arith.constant 0 : index
    %c0_6 = arith.constant 0 : index
    %58 = vector.load %arg3[%c0_5, %c0_6] : memref<1x128xf32, #tpu.memory_space<vmem>>, vector<1x128xf32>
    %59 = vector.shape_cast %58 : vector<1x128xf32> to vector<1x1x128xf32>
    %60 = vector.broadcast %59 : vector<1x1x128xf32> to vector<8x8x128xf32>
    %61 = arith.addf %57, %60 : vector<8x8x128xf32>
    %c0_7 = arith.constant 0 : index
    %c0_8 = arith.constant 0 : index
    %62 = vector.load %arg4[%c0_7, %c0_8] : memref<128x128xf32, #tpu.memory_space<vmem>>, vector<128x128xf32>
    %c0_9 = arith.constant 0 : index
    %c0_10 = arith.constant 0 : index
    %63 = vector.load %arg5[%c0_9, %c0_10] : memref<1x128xf32, #tpu.memory_space<vmem>>, vector<1x128xf32>
    %64 = vector.extract_strided_slice %61 {offsets = [0, 0, 0], sizes = [1, 8, 128], strides = [1, 1, 1]} : vector<8x8x128xf32> to vector<1x8x128xf32>
    %65 = vector.shape_cast %64 : vector<1x8x128xf32> to vector<8x128xf32>
    %cst_11 = arith.constant dense<0.000000e+00> : vector<8x128xf32>
    %66 = tpu.matmul %65, %62, %cst_11 {dimension_numbers = #tpu.dot_dimension_numbers<[1], [0], [0], [1], [0, 0, 1, 1], [], []>} : vector<8x128xf32>, vector<128x128xf32>, vector<8x128xf32> -> vector<8x128xf32>
    %67 = vector.broadcast %63 : vector<1x128xf32> to vector<8x128xf32>
    %68 = arith.addf %66, %67 : vector<8x128xf32>
    %cst_12 = arith.constant 0.000000e+00 : f32
    %69 = vector.broadcast %cst_12 : f32 to vector<8x128xf32>
    %70 = arith.maximumf %68, %69 : vector<8x128xf32>
    %c0_13 = arith.constant 0 : index
    %c0_14 = arith.constant 0 : index
    %c0_15 = arith.constant 0 : index
    %c0_16 = arith.constant 0 : index
    %71 = vector.load %arg6[%c0_13, %c0_14, %c0_15, %c0_16] : memref<1x8x8x128xf32, #tpu.memory_space<vmem>>, vector<1x1x8x128xf32>
    %72 = vector.shape_cast %71 : vector<1x1x8x128xf32> to vector<8x128xf32>
    %73 = vector.shape_cast %70 : vector<8x128xf32> to vector<1x1x8x128xf32>
    tpu.vector_store %arg6[%c0_13, %c0_14, %c0_15, %c0_16], %73 {strides = array<i32>} : memref<1x8x8x128xf32, #tpu.memory_space<vmem>>, vector<1x1x8x128xf32>,
    %74 = vector.extract_strided_slice %61 {offsets = [1, 0, 0], sizes = [1, 8, 128], strides = [1, 1, 1]} : vector<8x8x128xf32> to vector<1x8x128xf32>
    %75 = vector.shape_cast %74 : vector<1x8x128xf32> to vector<8x128xf32>
    %cst_17 = arith.constant dense<0.000000e+00> : vector<8x128xf32>
    %76 = tpu.matmul %75, %62, %cst_17 {dimension_numbers = #tpu.dot_dimension_numbers<[1], [0], [0], [1], [0, 0, 1, 1], [], []>} : vector<8x128xf32>, vector<128x128xf32>, vector<8x128xf32> -> vector<8x128xf32>
    %77 = vector.broadcast %63 : vector<1x128xf32> to vector<8x128xf32>
    %78 = arith.addf %76, %77 : vector<8x128xf32>
    %cst_18 = arith.constant 0.000000e+00 : f32
    %79 = vector.broadcast %cst_18 : f32 to vector<8x128xf32>
    %80 = arith.maximumf %78, %79 : vector<8x128xf32>
    %c0_19 = arith.constant 0 : index
    %c1 = arith.constant 1 : index
    %c0_20 = arith.constant 0 : index
    %c0_21 = arith.constant 0 : index
    %81 = vector.load %arg6[%c0_19, %c1, %c0_20, %c0_21] : memref<1x8x8x128xf32, #tpu.memory_space<vmem>>, vector<1x1x8x128xf32>
    %82 = vector.shape_cast %81 : vector<1x1x8x128xf32> to vector<8x128xf32>
    %83 = vector.shape_cast %80 : vector<8x128xf32> to vector<1x1x8x128xf32>
    tpu.vector_store %arg6[%c0_19, %c1, %c0_20, %c0_21], %83 {strides = array<i32>} : memref<1x8x8x128xf32, #tpu.memory_space<vmem>>, vector<1x1x8x128xf32>,
    %84 = vector.extract_strided_slice %61 {offsets = [2, 0, 0], sizes = [1, 8, 128], strides = [1, 1, 1]} : vector<8x8x128xf32> to vector<1x8x128xf32>
    %85 = vector.shape_cast %84 : vector<1x8x128xf32> to vector<8x128xf32>
    %cst_22 = arith.constant dense<0.000000e+00> : vector<8x128xf32>
    %86 = tpu.matmul %85, %62, %cst_22 {dimension_numbers = #tpu.dot_dimension_numbers<[1], [0], [0], [1], [0, 0, 1, 1], [], []>} : vector<8x128xf32>, vector<128x128xf32>, vector<8x128xf32> -> vector<8x128xf32>
    %87 = vector.broadcast %63 : vector<1x128xf32> to vector<8x128xf32>
    %88 = arith.addf %86, %87 : vector<8x128xf32>
    %cst_23 = arith.constant 0.000000e+00 : f32
    %89 = vector.broadcast %cst_23 : f32 to vector<8x128xf32>
    %90 = arith.maximumf %88, %89 : vector<8x128xf32>
    %c0_24 = arith.constant 0 : index
    %c2 = arith.constant 2 : index
    %c0_25 = arith.constant 0 : index
    %c0_26 = arith.constant 0 : index
    %91 = vector.load %arg6[%c0_24, %c2, %c0_25, %c0_26] : memref<1x8x8x128xf32, #tpu.memory_space<vmem>>, vector<1x1x8x128xf32>
    %92 = vector.shape_cast %91 : vector<1x1x8x128xf32> to vector<8x128xf32>
    %93 = vector.shape_cast %90 : vector<8x128xf32> to vector<1x1x8x128xf32>
    tpu.vector_store %arg6[%c0_24, %c2, %c0_25, %c0_26], %93 {strides = array<i32>} : memref<1x8x8x128xf32, #tpu.memory_space<vmem>>, vector<1x1x8x128xf32>,
    %94 = vector.extract_strided_slice %61 {offsets = [3, 0, 0], sizes = [1, 8, 128], strides = [1, 1, 1]} : vector<8x8x128xf32> to vector<1x8x128xf32>
    %95 = vector.shape_cast %94 : vector<1x8x128xf32> to vector<8x128xf32>
    %cst_27 = arith.constant dense<0.000000e+00> : vector<8x128xf32>
    %96 = tpu.matmul %95, %62, %cst_27 {dimension_numbers = #tpu.dot_dimension_numbers<[1], [0], [0], [1], [0, 0, 1, 1], [], []>} : vector<8x128xf32>, vector<128x128xf32>, vector<8x128xf32> -> vector<8x128xf32>
    %97 = vector.broadcast %63 : vector<1x128xf32> to vector<8x128xf32>
    %98 = arith.addf %96, %97 : vector<8x128xf32>
    %cst_28 = arith.constant 0.000000e+00 : f32
    %99 = vector.broadcast %cst_28 : f32 to vector<8x128xf32>
    %100 = arith.maximumf %98, %99 : vector<8x128xf32>
    %c0_29 = arith.constant 0 : index
    %c3 = arith.constant 3 : index
    %c0_30 = arith.constant 0 : index
    %c0_31 = arith.constant 0 : index
    %101 = vector.load %arg6[%c0_29, %c3, %c0_30, %c0_31] : memref<1x8x8x128xf32, #tpu.memory_space<vmem>>, vector<1x1x8x128xf32>
    %102 = vector.shape_cast %101 : vector<1x1x8x128xf32> to vector<8x128xf32>
    %103 = vector.shape_cast %100 : vector<8x128xf32> to vector<1x1x8x128xf32>
    tpu.vector_store %arg6[%c0_29, %c3, %c0_30, %c0_31], %103 {strides = array<i32>} : memref<1x8x8x128xf32, #tpu.memory_space<vmem>>, vector<1x1x8x128xf32>,
    %104 = vector.extract_strided_slice %61 {offsets = [4, 0, 0], sizes = [1, 8, 128], strides = [1, 1, 1]} : vector<8x8x128xf32> to vector<1x8x128xf32>
    %105 = vector.shape_cast %104 : vector<1x8x128xf32> to vector<8x128xf32>
    %cst_32 = arith.constant dense<0.000000e+00> : vector<8x128xf32>
    %106 = tpu.matmul %105, %62, %cst_32 {dimension_numbers = #tpu.dot_dimension_numbers<[1], [0], [0], [1], [0, 0, 1, 1], [], []>} : vector<8x128xf32>, vector<128x128xf32>, vector<8x128xf32> -> vector<8x128xf32>
    %107 = vector.broadcast %63 : vector<1x128xf32> to vector<8x128xf32>
    %108 = arith.addf %106, %107 : vector<8x128xf32>
    %cst_33 = arith.constant 0.000000e+00 : f32
    %109 = vector.broadcast %cst_33 : f32 to vector<8x128xf32>
    %110 = arith.maximumf %108, %109 : vector<8x128xf32>
    %c0_34 = arith.constant 0 : index
    %c4 = arith.constant 4 : index
    %c0_35 = arith.constant 0 : index
    %c0_36 = arith.constant 0 : index
    %111 = vector.load %arg6[%c0_34, %c4, %c0_35, %c0_36] : memref<1x8x8x128xf32, #tpu.memory_space<vmem>>, vector<1x1x8x128xf32>
    %112 = vector.shape_cast %111 : vector<1x1x8x128xf32> to vector<8x128xf32>
    %113 = vector.shape_cast %110 : vector<8x128xf32> to vector<1x1x8x128xf32>
    tpu.vector_store %arg6[%c0_34, %c4, %c0_35, %c0_36], %113 {strides = array<i32>} : memref<1x8x8x128xf32, #tpu.memory_space<vmem>>, vector<1x1x8x128xf32>,
    %114 = vector.extract_strided_slice %61 {offsets = [5, 0, 0], sizes = [1, 8, 128], strides = [1, 1, 1]} : vector<8x8x128xf32> to vector<1x8x128xf32>
    %115 = vector.shape_cast %114 : vector<1x8x128xf32> to vector<8x128xf32>
    %cst_37 = arith.constant dense<0.000000e+00> : vector<8x128xf32>
    %116 = tpu.matmul %115, %62, %cst_37 {dimension_numbers = #tpu.dot_dimension_numbers<[1], [0], [0], [1], [0, 0, 1, 1], [], []>} : vector<8x128xf32>, vector<128x128xf32>, vector<8x128xf32> -> vector<8x128xf32>
    %117 = vector.broadcast %63 : vector<1x128xf32> to vector<8x128xf32>
    %118 = arith.addf %116, %117 : vector<8x128xf32>
    %cst_38 = arith.constant 0.000000e+00 : f32
    %119 = vector.broadcast %cst_38 : f32 to vector<8x128xf32>
    %120 = arith.maximumf %118, %119 : vector<8x128xf32>
    %c0_39 = arith.constant 0 : index
    %c5 = arith.constant 5 : index
    %c0_40 = arith.constant 0 : index
    %c0_41 = arith.constant 0 : index
    %121 = vector.load %arg6[%c0_39, %c5, %c0_40, %c0_41] : memref<1x8x8x128xf32, #tpu.memory_space<vmem>>, vector<1x1x8x128xf32>
    %122 = vector.shape_cast %121 : vector<1x1x8x128xf32> to vector<8x128xf32>
    %123 = vector.shape_cast %120 : vector<8x128xf32> to vector<1x1x8x128xf32>
    tpu.vector_store %arg6[%c0_39, %c5, %c0_40, %c0_41], %123 {strides = array<i32>} : memref<1x8x8x128xf32, #tpu.memory_space<vmem>>, vector<1x1x8x128xf32>,
    %124 = vector.extract_strided_slice %61 {offsets = [6, 0, 0], sizes = [1, 8, 128], strides = [1, 1, 1]} : vector<8x8x128xf32> to vector<1x8x128xf32>
    %125 = vector.shape_cast %124 : vector<1x8x128xf32> to vector<8x128xf32>
    %cst_42 = arith.constant dense<0.000000e+00> : vector<8x128xf32>
    %126 = tpu.matmul %125, %62, %cst_42 {dimension_numbers = #tpu.dot_dimension_numbers<[1], [0], [0], [1], [0, 0, 1, 1], [], []>} : vector<8x128xf32>, vector<128x128xf32>, vector<8x128xf32> -> vector<8x128xf32>
    %127 = vector.broadcast %63 : vector<1x128xf32> to vector<8x128xf32>
    %128 = arith.addf %126, %127 : vector<8x128xf32>
    %cst_43 = arith.constant 0.000000e+00 : f32
    %129 = vector.broadcast %cst_43 : f32 to vector<8x128xf32>
    %130 = arith.maximumf %128, %129 : vector<8x128xf32>
    %c0_44 = arith.constant 0 : index
    %c6 = arith.constant 6 : index
    %c0_45 = arith.constant 0 : index
    %c0_46 = arith.constant 0 : index
    %131 = vector.load %arg6[%c0_44, %c6, %c0_45, %c0_46] : memref<1x8x8x128xf32, #tpu.memory_space<vmem>>, vector<1x1x8x128xf32>
    %132 = vector.shape_cast %131 : vector<1x1x8x128xf32> to vector<8x128xf32>
    %133 = vector.shape_cast %130 : vector<8x128xf32> to vector<1x1x8x128xf32>
    tpu.vector_store %arg6[%c0_44, %c6, %c0_45, %c0_46], %133 {strides = array<i32>} : memref<1x8x8x128xf32, #tpu.memory_space<vmem>>, vector<1x1x8x128xf32>,
    %134 = vector.extract_strided_slice %61 {offsets = [7, 0, 0], sizes = [1, 8, 128], strides = [1, 1, 1]} : vector<8x8x128xf32> to vector<1x8x128xf32>
    %135 = vector.shape_cast %134 : vector<1x8x128xf32> to vector<8x128xf32>
    %cst_47 = arith.constant dense<0.000000e+00> : vector<8x128xf32>
    %136 = tpu.matmul %135, %62, %cst_47 {dimension_numbers = #tpu.dot_dimension_numbers<[1], [0], [0], [1], [0, 0, 1, 1], [], []>} : vector<8x128xf32>, vector<128x128xf32>, vector<8x128xf32> -> vector<8x128xf32>
    %137 = vector.broadcast %63 : vector<1x128xf32> to vector<8x128xf32>
    %138 = arith.addf %136, %137 : vector<8x128xf32>
    %cst_48 = arith.constant 0.000000e+00 : f32
    %139 = vector.broadcast %cst_48 : f32 to vector<8x128xf32>
    %140 = arith.maximumf %138, %139 : vector<8x128xf32>
    %c0_49 = arith.constant 0 : index
    %c7 = arith.constant 7 : index
    %c0_50 = arith.constant 0 : index
    %c0_51 = arith.constant 0 : index
    %141 = vector.load %arg6[%c0_49, %c7, %c0_50, %c0_51] : memref<1x8x8x128xf32, #tpu.memory_space<vmem>>, vector<1x1x8x128xf32>
    %142 = vector.shape_cast %141 : vector<1x1x8x128xf32> to vector<8x128xf32>
    %143 = vector.shape_cast %140 : vector<8x128xf32> to vector<1x1x8x128xf32>
    tpu.vector_store %arg6[%c0_49, %c7, %c0_50, %c0_51], %143 {strides = array<i32>} : memref<1x8x8x128xf32, #tpu.memory_space<vmem>>, vector<1x1x8x128xf32>,
    return
  }
  func.func @transform_0(%arg0: i32) -> (i32, i32, i32, i32) {
    %c0_i32 = arith.constant 0 : i32
    %c0_i32_0 = arith.constant 0 : i32
    %c0_i32_1 = arith.constant 0 : i32
    %c0_i32_2 = arith.constant 0 : i32
    return %arg0, %c0_i32, %c0_i32_0, %c0_i32_1 : i32, i32, i32, i32
  }
  func.func @transform_1(%arg0: i32) -> (i32, i32) {
    %c0_i32 = arith.constant 0 : i32
    %c0_i32_0 = arith.constant 0 : i32
    %c0_i32_1 = arith.constant 0 : i32
    return %c0_i32, %c0_i32_0 : i32, i32
  }
  func.func @transform_2(%arg0: i32) -> (i32, i32) {
    %c0_i32 = arith.constant 0 : i32
    %c0_i32_0 = arith.constant 0 : i32
    %c0_i32_1 = arith.constant 0 : i32
    return %c0_i32, %c0_i32_0 : i32, i32
  }
  func.func @transform_3(%arg0: i32) -> (i32, i32) {
    %c0_i32 = arith.constant 0 : i32
    %c0_i32_0 = arith.constant 0 : i32
    %c0_i32_1 = arith.constant 0 : i32
    return %c0_i32, %c0_i32_0 : i32, i32
  }
  func.func @transform_4(%arg0: i32) -> (i32, i32) {
    %c0_i32 = arith.constant 0 : i32
    %c0_i32_0 = arith.constant 0 : i32
    %c0_i32_1 = arith.constant 0 : i32
    return %c0_i32, %c0_i32_0 : i32, i32
  }
  func.func @transform_5(%arg0: i32) -> (i32, i32, i32, i32) {
    %c0_i32 = arith.constant 0 : i32
    %c0_i32_0 = arith.constant 0 : i32
    %c0_i32_1 = arith.constant 0 : i32
    %c0_i32_2 = arith.constant 0 : i32
    return %arg0, %c0_i32, %c0_i32_0, %c0_i32_1 : i32, i32, i32, i32
  }
}

module attributes {stable_mosaic.version = 11 : i64} {
  func.func @_row_pass_kernel(%arg0: i32, %arg1: memref<16x8xf32, #tpu.memory_space<vmem>>, %arg2: memref<1x8x1024xf32, #tpu.memory_space<vmem>>, %arg3: memref<1x16x1024xf32, #tpu.memory_space<vmem>>) attributes {dimension_semantics = [#tpu.dimension_semantics<parallel>], iteration_bounds = array<i64: 2>, scalar_prefetch = 0 : i64, scratch_operands = 0 : i64, tpu.core_type = #tpu.core_type<tc>, window_params = [{pipeline_mode = #tpu.pipeline_mode<synchronous>, transform_indices = @transform_0, window_bounds = array<i64: 16, 8>}, {transform_indices = @transform_1, window_bounds = array<i64: 1, 8, 1024>}, {transform_indices = @transform_2, window_bounds = array<i64: 1, 16, 1024>}]} {
    %c0 = arith.constant 0 : index
    %c0_0 = arith.constant 0 : index
    %0 = vector.load %arg1[%c0, %c0_0] : memref<16x8xf32, #tpu.memory_space<vmem>>, vector<16x8xf32>
    %c0_1 = arith.constant 0 : index
    %c0_2 = arith.constant 0 : index
    %c0_3 = arith.constant 0 : index
    %1 = vector.load %arg2[%c0_1, %c0_2, %c0_3] : memref<1x8x1024xf32, #tpu.memory_space<vmem>>, vector<1x8x1024xf32>
    %2 = vector.shape_cast %1 : vector<1x8x1024xf32> to vector<8x1024xf32>
    %cst = arith.constant dense<0.000000e+00> : vector<16x1024xf32>
    %3 = tpu.matmul %0, %2, %cst {dimension_numbers = #tpu.dot_dimension_numbers<[1], [0], [0], [1], [0, 0, 1, 1], [], []>} : vector<16x8xf32>, vector<8x1024xf32>, vector<16x1024xf32> -> vector<16x1024xf32>
    %c0_4 = arith.constant 0 : index
    %c0_5 = arith.constant 0 : index
    %c0_6 = arith.constant 0 : index
    %4 = vector.load %arg3[%c0_4, %c0_5, %c0_6] : memref<1x16x1024xf32, #tpu.memory_space<vmem>>, vector<1x16x1024xf32>
    %5 = vector.shape_cast %4 : vector<1x16x1024xf32> to vector<16x1024xf32>
    %6 = vector.shape_cast %3 : vector<16x1024xf32> to vector<1x16x1024xf32>
    tpu.vector_store %arg3[%c0_4, %c0_5, %c0_6], %6 {strides = array<i32>} : memref<1x16x1024xf32, #tpu.memory_space<vmem>>, vector<1x16x1024xf32>,
    return
  }
  func.func @transform_0(%arg0: i32) -> (i32, i32) {
    %c0_i32 = arith.constant 0 : i32
    %c0_i32_0 = arith.constant 0 : i32
    %c0_i32_1 = arith.constant 0 : i32
    return %c0_i32, %c0_i32_0 : i32, i32
  }
  func.func @transform_1(%arg0: i32) -> (i32, i32, i32) {
    %c0_i32 = arith.constant 0 : i32
    %c0_i32_0 = arith.constant 0 : i32
    %c0_i32_1 = arith.constant 0 : i32
    return %arg0, %c0_i32, %c0_i32_0 : i32, i32, i32
  }
  func.func @transform_2(%arg0: i32) -> (i32, i32, i32) {
    %c0_i32 = arith.constant 0 : i32
    %c0_i32_0 = arith.constant 0 : i32
    %c0_i32_1 = arith.constant 0 : i32
    return %arg0, %c0_i32, %c0_i32_0 : i32, i32, i32
  }
}

module attributes {stable_mosaic.version = 11 : i64} {
  func.func @_col_pass_res_kernel(%arg0: i32, %arg1: memref<16x8xf32, #tpu.memory_space<vmem>>, %arg2: memref<1x16x8x128xf32, #tpu.memory_space<vmem>>, %arg3: memref<1x16x16x128xf32, #tpu.memory_space<vmem>>, %arg4: memref<1x16x16x128xf32, #tpu.memory_space<vmem>>) attributes {dimension_semantics = [#tpu.dimension_semantics<parallel>], iteration_bounds = array<i64: 2>, scalar_prefetch = 0 : i64, scratch_operands = 0 : i64, tpu.core_type = #tpu.core_type<tc>, window_params = [{pipeline_mode = #tpu.pipeline_mode<synchronous>, transform_indices = @transform_0, window_bounds = array<i64: 16, 8>}, {transform_indices = @transform_1, window_bounds = array<i64: 1, 16, 8, 128>}, {transform_indices = @transform_2, window_bounds = array<i64: 1, 16, 16, 128>}, {transform_indices = @transform_3, window_bounds = array<i64: 1, 16, 16, 128>}]} {
    %c0 = arith.constant 0 : index
    %c0_0 = arith.constant 0 : index
    %0 = vector.load %arg1[%c0, %c0_0] : memref<16x8xf32, #tpu.memory_space<vmem>>, vector<16x8xf32>
    %c0_1 = arith.constant 0 : index
    %c0_2 = arith.constant 0 : index
    %c0_3 = arith.constant 0 : index
    %c0_4 = arith.constant 0 : index
    %1 = vector.load %arg2[%c0_1, %c0_2, %c0_3, %c0_4] : memref<1x16x8x128xf32, #tpu.memory_space<vmem>>, vector<1x1x8x128xf32>
    %2 = vector.shape_cast %1 : vector<1x1x8x128xf32> to vector<8x128xf32>
    %cst = arith.constant dense<0.000000e+00> : vector<16x128xf32>
    %3 = tpu.matmul %0, %2, %cst {dimension_numbers = #tpu.dot_dimension_numbers<[1], [0], [0], [1], [0, 0, 1, 1], [], []>} : vector<16x8xf32>, vector<8x128xf32>, vector<16x128xf32> -> vector<16x128xf32>
    %c0_5 = arith.constant 0 : index
    %c0_6 = arith.constant 0 : index
    %c0_7 = arith.constant 0 : index
    %c0_8 = arith.constant 0 : index
    %4 = vector.load %arg3[%c0_5, %c0_6, %c0_7, %c0_8] : memref<1x16x16x128xf32, #tpu.memory_space<vmem>>, vector<1x1x16x128xf32>
    %5 = vector.shape_cast %4 : vector<1x1x16x128xf32> to vector<16x128xf32>
    %6 = arith.addf %3, %5 : vector<16x128xf32>
    %c0_9 = arith.constant 0 : index
    %c0_10 = arith.constant 0 : index
    %c0_11 = arith.constant 0 : index
    %c0_12 = arith.constant 0 : index
    %7 = vector.load %arg4[%c0_9, %c0_10, %c0_11, %c0_12] : memref<1x16x16x128xf32, #tpu.memory_space<vmem>>, vector<1x1x16x128xf32>
    %8 = vector.shape_cast %7 : vector<1x1x16x128xf32> to vector<16x128xf32>
    %9 = vector.shape_cast %6 : vector<16x128xf32> to vector<1x1x16x128xf32>
    tpu.vector_store %arg4[%c0_9, %c0_10, %c0_11, %c0_12], %9 {strides = array<i32>} : memref<1x16x16x128xf32, #tpu.memory_space<vmem>>, vector<1x1x16x128xf32>,
    %c0_13 = arith.constant 0 : index
    %c1 = arith.constant 1 : index
    %c0_14 = arith.constant 0 : index
    %c0_15 = arith.constant 0 : index
    %10 = vector.load %arg2[%c0_13, %c1, %c0_14, %c0_15] : memref<1x16x8x128xf32, #tpu.memory_space<vmem>>, vector<1x1x8x128xf32>
    %11 = vector.shape_cast %10 : vector<1x1x8x128xf32> to vector<8x128xf32>
    %cst_16 = arith.constant dense<0.000000e+00> : vector<16x128xf32>
    %12 = tpu.matmul %0, %11, %cst_16 {dimension_numbers = #tpu.dot_dimension_numbers<[1], [0], [0], [1], [0, 0, 1, 1], [], []>} : vector<16x8xf32>, vector<8x128xf32>, vector<16x128xf32> -> vector<16x128xf32>
    %c0_17 = arith.constant 0 : index
    %c1_18 = arith.constant 1 : index
    %c0_19 = arith.constant 0 : index
    %c0_20 = arith.constant 0 : index
    %13 = vector.load %arg3[%c0_17, %c1_18, %c0_19, %c0_20] : memref<1x16x16x128xf32, #tpu.memory_space<vmem>>, vector<1x1x16x128xf32>
    %14 = vector.shape_cast %13 : vector<1x1x16x128xf32> to vector<16x128xf32>
    %15 = arith.addf %12, %14 : vector<16x128xf32>
    %c0_21 = arith.constant 0 : index
    %c1_22 = arith.constant 1 : index
    %c0_23 = arith.constant 0 : index
    %c0_24 = arith.constant 0 : index
    %16 = vector.load %arg4[%c0_21, %c1_22, %c0_23, %c0_24] : memref<1x16x16x128xf32, #tpu.memory_space<vmem>>, vector<1x1x16x128xf32>
    %17 = vector.shape_cast %16 : vector<1x1x16x128xf32> to vector<16x128xf32>
    %18 = vector.shape_cast %15 : vector<16x128xf32> to vector<1x1x16x128xf32>
    tpu.vector_store %arg4[%c0_21, %c1_22, %c0_23, %c0_24], %18 {strides = array<i32>} : memref<1x16x16x128xf32, #tpu.memory_space<vmem>>, vector<1x1x16x128xf32>,
    %c0_25 = arith.constant 0 : index
    %c2 = arith.constant 2 : index
    %c0_26 = arith.constant 0 : index
    %c0_27 = arith.constant 0 : index
    %19 = vector.load %arg2[%c0_25, %c2, %c0_26, %c0_27] : memref<1x16x8x128xf32, #tpu.memory_space<vmem>>, vector<1x1x8x128xf32>
    %20 = vector.shape_cast %19 : vector<1x1x8x128xf32> to vector<8x128xf32>
    %cst_28 = arith.constant dense<0.000000e+00> : vector<16x128xf32>
    %21 = tpu.matmul %0, %20, %cst_28 {dimension_numbers = #tpu.dot_dimension_numbers<[1], [0], [0], [1], [0, 0, 1, 1], [], []>} : vector<16x8xf32>, vector<8x128xf32>, vector<16x128xf32> -> vector<16x128xf32>
    %c0_29 = arith.constant 0 : index
    %c2_30 = arith.constant 2 : index
    %c0_31 = arith.constant 0 : index
    %c0_32 = arith.constant 0 : index
    %22 = vector.load %arg3[%c0_29, %c2_30, %c0_31, %c0_32] : memref<1x16x16x128xf32, #tpu.memory_space<vmem>>, vector<1x1x16x128xf32>
    %23 = vector.shape_cast %22 : vector<1x1x16x128xf32> to vector<16x128xf32>
    %24 = arith.addf %21, %23 : vector<16x128xf32>
    %c0_33 = arith.constant 0 : index
    %c2_34 = arith.constant 2 : index
    %c0_35 = arith.constant 0 : index
    %c0_36 = arith.constant 0 : index
    %25 = vector.load %arg4[%c0_33, %c2_34, %c0_35, %c0_36] : memref<1x16x16x128xf32, #tpu.memory_space<vmem>>, vector<1x1x16x128xf32>
    %26 = vector.shape_cast %25 : vector<1x1x16x128xf32> to vector<16x128xf32>
    %27 = vector.shape_cast %24 : vector<16x128xf32> to vector<1x1x16x128xf32>
    tpu.vector_store %arg4[%c0_33, %c2_34, %c0_35, %c0_36], %27 {strides = array<i32>} : memref<1x16x16x128xf32, #tpu.memory_space<vmem>>, vector<1x1x16x128xf32>,
    %c0_37 = arith.constant 0 : index
    %c3 = arith.constant 3 : index
    %c0_38 = arith.constant 0 : index
    %c0_39 = arith.constant 0 : index
    %28 = vector.load %arg2[%c0_37, %c3, %c0_38, %c0_39] : memref<1x16x8x128xf32, #tpu.memory_space<vmem>>, vector<1x1x8x128xf32>
    %29 = vector.shape_cast %28 : vector<1x1x8x128xf32> to vector<8x128xf32>
    %cst_40 = arith.constant dense<0.000000e+00> : vector<16x128xf32>
    %30 = tpu.matmul %0, %29, %cst_40 {dimension_numbers = #tpu.dot_dimension_numbers<[1], [0], [0], [1], [0, 0, 1, 1], [], []>} : vector<16x8xf32>, vector<8x128xf32>, vector<16x128xf32> -> vector<16x128xf32>
    %c0_41 = arith.constant 0 : index
    %c3_42 = arith.constant 3 : index
    %c0_43 = arith.constant 0 : index
    %c0_44 = arith.constant 0 : index
    %31 = vector.load %arg3[%c0_41, %c3_42, %c0_43, %c0_44] : memref<1x16x16x128xf32, #tpu.memory_space<vmem>>, vector<1x1x16x128xf32>
    %32 = vector.shape_cast %31 : vector<1x1x16x128xf32> to vector<16x128xf32>
    %33 = arith.addf %30, %32 : vector<16x128xf32>
    %c0_45 = arith.constant 0 : index
    %c3_46 = arith.constant 3 : index
    %c0_47 = arith.constant 0 : index
    %c0_48 = arith.constant 0 : index
    %34 = vector.load %arg4[%c0_45, %c3_46, %c0_47, %c0_48] : memref<1x16x16x128xf32, #tpu.memory_space<vmem>>, vector<1x1x16x128xf32>
    %35 = vector.shape_cast %34 : vector<1x1x16x128xf32> to vector<16x128xf32>
    %36 = vector.shape_cast %33 : vector<16x128xf32> to vector<1x1x16x128xf32>
    tpu.vector_store %arg4[%c0_45, %c3_46, %c0_47, %c0_48], %36 {strides = array<i32>} : memref<1x16x16x128xf32, #tpu.memory_space<vmem>>, vector<1x1x16x128xf32>,
    %c0_49 = arith.constant 0 : index
    %c4 = arith.constant 4 : index
    %c0_50 = arith.constant 0 : index
    %c0_51 = arith.constant 0 : index
    %37 = vector.load %arg2[%c0_49, %c4, %c0_50, %c0_51] : memref<1x16x8x128xf32, #tpu.memory_space<vmem>>, vector<1x1x8x128xf32>
    %38 = vector.shape_cast %37 : vector<1x1x8x128xf32> to vector<8x128xf32>
    %cst_52 = arith.constant dense<0.000000e+00> : vector<16x128xf32>
    %39 = tpu.matmul %0, %38, %cst_52 {dimension_numbers = #tpu.dot_dimension_numbers<[1], [0], [0], [1], [0, 0, 1, 1], [], []>} : vector<16x8xf32>, vector<8x128xf32>, vector<16x128xf32> -> vector<16x128xf32>
    %c0_53 = arith.constant 0 : index
    %c4_54 = arith.constant 4 : index
    %c0_55 = arith.constant 0 : index
    %c0_56 = arith.constant 0 : index
    %40 = vector.load %arg3[%c0_53, %c4_54, %c0_55, %c0_56] : memref<1x16x16x128xf32, #tpu.memory_space<vmem>>, vector<1x1x16x128xf32>
    %41 = vector.shape_cast %40 : vector<1x1x16x128xf32> to vector<16x128xf32>
    %42 = arith.addf %39, %41 : vector<16x128xf32>
    %c0_57 = arith.constant 0 : index
    %c4_58 = arith.constant 4 : index
    %c0_59 = arith.constant 0 : index
    %c0_60 = arith.constant 0 : index
    %43 = vector.load %arg4[%c0_57, %c4_58, %c0_59, %c0_60] : memref<1x16x16x128xf32, #tpu.memory_space<vmem>>, vector<1x1x16x128xf32>
    %44 = vector.shape_cast %43 : vector<1x1x16x128xf32> to vector<16x128xf32>
    %45 = vector.shape_cast %42 : vector<16x128xf32> to vector<1x1x16x128xf32>
    tpu.vector_store %arg4[%c0_57, %c4_58, %c0_59, %c0_60], %45 {strides = array<i32>} : memref<1x16x16x128xf32, #tpu.memory_space<vmem>>, vector<1x1x16x128xf32>,
    %c0_61 = arith.constant 0 : index
    %c5 = arith.constant 5 : index
    %c0_62 = arith.constant 0 : index
    %c0_63 = arith.constant 0 : index
    %46 = vector.load %arg2[%c0_61, %c5, %c0_62, %c0_63] : memref<1x16x8x128xf32, #tpu.memory_space<vmem>>, vector<1x1x8x128xf32>
    %47 = vector.shape_cast %46 : vector<1x1x8x128xf32> to vector<8x128xf32>
    %cst_64 = arith.constant dense<0.000000e+00> : vector<16x128xf32>
    %48 = tpu.matmul %0, %47, %cst_64 {dimension_numbers = #tpu.dot_dimension_numbers<[1], [0], [0], [1], [0, 0, 1, 1], [], []>} : vector<16x8xf32>, vector<8x128xf32>, vector<16x128xf32> -> vector<16x128xf32>
    %c0_65 = arith.constant 0 : index
    %c5_66 = arith.constant 5 : index
    %c0_67 = arith.constant 0 : index
    %c0_68 = arith.constant 0 : index
    %49 = vector.load %arg3[%c0_65, %c5_66, %c0_67, %c0_68] : memref<1x16x16x128xf32, #tpu.memory_space<vmem>>, vector<1x1x16x128xf32>
    %50 = vector.shape_cast %49 : vector<1x1x16x128xf32> to vector<16x128xf32>
    %51 = arith.addf %48, %50 : vector<16x128xf32>
    %c0_69 = arith.constant 0 : index
    %c5_70 = arith.constant 5 : index
    %c0_71 = arith.constant 0 : index
    %c0_72 = arith.constant 0 : index
    %52 = vector.load %arg4[%c0_69, %c5_70, %c0_71, %c0_72] : memref<1x16x16x128xf32, #tpu.memory_space<vmem>>, vector<1x1x16x128xf32>
    %53 = vector.shape_cast %52 : vector<1x1x16x128xf32> to vector<16x128xf32>
    %54 = vector.shape_cast %51 : vector<16x128xf32> to vector<1x1x16x128xf32>
    tpu.vector_store %arg4[%c0_69, %c5_70, %c0_71, %c0_72], %54 {strides = array<i32>} : memref<1x16x16x128xf32, #tpu.memory_space<vmem>>, vector<1x1x16x128xf32>,
    %c0_73 = arith.constant 0 : index
    %c6 = arith.constant 6 : index
    %c0_74 = arith.constant 0 : index
    %c0_75 = arith.constant 0 : index
    %55 = vector.load %arg2[%c0_73, %c6, %c0_74, %c0_75] : memref<1x16x8x128xf32, #tpu.memory_space<vmem>>, vector<1x1x8x128xf32>
    %56 = vector.shape_cast %55 : vector<1x1x8x128xf32> to vector<8x128xf32>
    %cst_76 = arith.constant dense<0.000000e+00> : vector<16x128xf32>
    %57 = tpu.matmul %0, %56, %cst_76 {dimension_numbers = #tpu.dot_dimension_numbers<[1], [0], [0], [1], [0, 0, 1, 1], [], []>} : vector<16x8xf32>, vector<8x128xf32>, vector<16x128xf32> -> vector<16x128xf32>
    %c0_77 = arith.constant 0 : index
    %c6_78 = arith.constant 6 : index
    %c0_79 = arith.constant 0 : index
    %c0_80 = arith.constant 0 : index
    %58 = vector.load %arg3[%c0_77, %c6_78, %c0_79, %c0_80] : memref<1x16x16x128xf32, #tpu.memory_space<vmem>>, vector<1x1x16x128xf32>
    %59 = vector.shape_cast %58 : vector<1x1x16x128xf32> to vector<16x128xf32>
    %60 = arith.addf %57, %59 : vector<16x128xf32>
    %c0_81 = arith.constant 0 : index
    %c6_82 = arith.constant 6 : index
    %c0_83 = arith.constant 0 : index
    %c0_84 = arith.constant 0 : index
    %61 = vector.load %arg4[%c0_81, %c6_82, %c0_83, %c0_84] : memref<1x16x16x128xf32, #tpu.memory_space<vmem>>, vector<1x1x16x128xf32>
    %62 = vector.shape_cast %61 : vector<1x1x16x128xf32> to vector<16x128xf32>
    %63 = vector.shape_cast %60 : vector<16x128xf32> to vector<1x1x16x128xf32>
    tpu.vector_store %arg4[%c0_81, %c6_82, %c0_83, %c0_84], %63 {strides = array<i32>} : memref<1x16x16x128xf32, #tpu.memory_space<vmem>>, vector<1x1x16x128xf32>,
    %c0_85 = arith.constant 0 : index
    %c7 = arith.constant 7 : index
    %c0_86 = arith.constant 0 : index
    %c0_87 = arith.constant 0 : index
    %64 = vector.load %arg2[%c0_85, %c7, %c0_86, %c0_87] : memref<1x16x8x128xf32, #tpu.memory_space<vmem>>, vector<1x1x8x128xf32>
    %65 = vector.shape_cast %64 : vector<1x1x8x128xf32> to vector<8x128xf32>
    %cst_88 = arith.constant dense<0.000000e+00> : vector<16x128xf32>
    %66 = tpu.matmul %0, %65, %cst_88 {dimension_numbers = #tpu.dot_dimension_numbers<[1], [0], [0], [1], [0, 0, 1, 1], [], []>} : vector<16x8xf32>, vector<8x128xf32>, vector<16x128xf32> -> vector<16x128xf32>
    %c0_89 = arith.constant 0 : index
    %c7_90 = arith.constant 7 : index
    %c0_91 = arith.constant 0 : index
    %c0_92 = arith.constant 0 : index
    %67 = vector.load %arg3[%c0_89, %c7_90, %c0_91, %c0_92] : memref<1x16x16x128xf32, #tpu.memory_space<vmem>>, vector<1x1x16x128xf32>
    %68 = vector.shape_cast %67 : vector<1x1x16x128xf32> to vector<16x128xf32>
    %69 = arith.addf %66, %68 : vector<16x128xf32>
    %c0_93 = arith.constant 0 : index
    %c7_94 = arith.constant 7 : index
    %c0_95 = arith.constant 0 : index
    %c0_96 = arith.constant 0 : index
    %70 = vector.load %arg4[%c0_93, %c7_94, %c0_95, %c0_96] : memref<1x16x16x128xf32, #tpu.memory_space<vmem>>, vector<1x1x16x128xf32>
    %71 = vector.shape_cast %70 : vector<1x1x16x128xf32> to vector<16x128xf32>
    %72 = vector.shape_cast %69 : vector<16x128xf32> to vector<1x1x16x128xf32>
    tpu.vector_store %arg4[%c0_93, %c7_94, %c0_95, %c0_96], %72 {strides = array<i32>} : memref<1x16x16x128xf32, #tpu.memory_space<vmem>>, vector<1x1x16x128xf32>,
    %c0_97 = arith.constant 0 : index
    %c8 = arith.constant 8 : index
    %c0_98 = arith.constant 0 : index
    %c0_99 = arith.constant 0 : index
    %73 = vector.load %arg2[%c0_97, %c8, %c0_98, %c0_99] : memref<1x16x8x128xf32, #tpu.memory_space<vmem>>, vector<1x1x8x128xf32>
    %74 = vector.shape_cast %73 : vector<1x1x8x128xf32> to vector<8x128xf32>
    %cst_100 = arith.constant dense<0.000000e+00> : vector<16x128xf32>
    %75 = tpu.matmul %0, %74, %cst_100 {dimension_numbers = #tpu.dot_dimension_numbers<[1], [0], [0], [1], [0, 0, 1, 1], [], []>} : vector<16x8xf32>, vector<8x128xf32>, vector<16x128xf32> -> vector<16x128xf32>
    %c0_101 = arith.constant 0 : index
    %c8_102 = arith.constant 8 : index
    %c0_103 = arith.constant 0 : index
    %c0_104 = arith.constant 0 : index
    %76 = vector.load %arg3[%c0_101, %c8_102, %c0_103, %c0_104] : memref<1x16x16x128xf32, #tpu.memory_space<vmem>>, vector<1x1x16x128xf32>
    %77 = vector.shape_cast %76 : vector<1x1x16x128xf32> to vector<16x128xf32>
    %78 = arith.addf %75, %77 : vector<16x128xf32>
    %c0_105 = arith.constant 0 : index
    %c8_106 = arith.constant 8 : index
    %c0_107 = arith.constant 0 : index
    %c0_108 = arith.constant 0 : index
    %79 = vector.load %arg4[%c0_105, %c8_106, %c0_107, %c0_108] : memref<1x16x16x128xf32, #tpu.memory_space<vmem>>, vector<1x1x16x128xf32>
    %80 = vector.shape_cast %79 : vector<1x1x16x128xf32> to vector<16x128xf32>
    %81 = vector.shape_cast %78 : vector<16x128xf32> to vector<1x1x16x128xf32>
    tpu.vector_store %arg4[%c0_105, %c8_106, %c0_107, %c0_108], %81 {strides = array<i32>} : memref<1x16x16x128xf32, #tpu.memory_space<vmem>>, vector<1x1x16x128xf32>,
    %c0_109 = arith.constant 0 : index
    %c9 = arith.constant 9 : index
    %c0_110 = arith.constant 0 : index
    %c0_111 = arith.constant 0 : index
    %82 = vector.load %arg2[%c0_109, %c9, %c0_110, %c0_111] : memref<1x16x8x128xf32, #tpu.memory_space<vmem>>, vector<1x1x8x128xf32>
    %83 = vector.shape_cast %82 : vector<1x1x8x128xf32> to vector<8x128xf32>
    %cst_112 = arith.constant dense<0.000000e+00> : vector<16x128xf32>
    %84 = tpu.matmul %0, %83, %cst_112 {dimension_numbers = #tpu.dot_dimension_numbers<[1], [0], [0], [1], [0, 0, 1, 1], [], []>} : vector<16x8xf32>, vector<8x128xf32>, vector<16x128xf32> -> vector<16x128xf32>
    %c0_113 = arith.constant 0 : index
    %c9_114 = arith.constant 9 : index
    %c0_115 = arith.constant 0 : index
    %c0_116 = arith.constant 0 : index
    %85 = vector.load %arg3[%c0_113, %c9_114, %c0_115, %c0_116] : memref<1x16x16x128xf32, #tpu.memory_space<vmem>>, vector<1x1x16x128xf32>
    %86 = vector.shape_cast %85 : vector<1x1x16x128xf32> to vector<16x128xf32>
    %87 = arith.addf %84, %86 : vector<16x128xf32>
    %c0_117 = arith.constant 0 : index
    %c9_118 = arith.constant 9 : index
    %c0_119 = arith.constant 0 : index
    %c0_120 = arith.constant 0 : index
    %88 = vector.load %arg4[%c0_117, %c9_118, %c0_119, %c0_120] : memref<1x16x16x128xf32, #tpu.memory_space<vmem>>, vector<1x1x16x128xf32>
    %89 = vector.shape_cast %88 : vector<1x1x16x128xf32> to vector<16x128xf32>
    %90 = vector.shape_cast %87 : vector<16x128xf32> to vector<1x1x16x128xf32>
    tpu.vector_store %arg4[%c0_117, %c9_118, %c0_119, %c0_120], %90 {strides = array<i32>} : memref<1x16x16x128xf32, #tpu.memory_space<vmem>>, vector<1x1x16x128xf32>,
    %c0_121 = arith.constant 0 : index
    %c10 = arith.constant 10 : index
    %c0_122 = arith.constant 0 : index
    %c0_123 = arith.constant 0 : index
    %91 = vector.load %arg2[%c0_121, %c10, %c0_122, %c0_123] : memref<1x16x8x128xf32, #tpu.memory_space<vmem>>, vector<1x1x8x128xf32>
    %92 = vector.shape_cast %91 : vector<1x1x8x128xf32> to vector<8x128xf32>
    %cst_124 = arith.constant dense<0.000000e+00> : vector<16x128xf32>
    %93 = tpu.matmul %0, %92, %cst_124 {dimension_numbers = #tpu.dot_dimension_numbers<[1], [0], [0], [1], [0, 0, 1, 1], [], []>} : vector<16x8xf32>, vector<8x128xf32>, vector<16x128xf32> -> vector<16x128xf32>
    %c0_125 = arith.constant 0 : index
    %c10_126 = arith.constant 10 : index
    %c0_127 = arith.constant 0 : index
    %c0_128 = arith.constant 0 : index
    %94 = vector.load %arg3[%c0_125, %c10_126, %c0_127, %c0_128] : memref<1x16x16x128xf32, #tpu.memory_space<vmem>>, vector<1x1x16x128xf32>
    %95 = vector.shape_cast %94 : vector<1x1x16x128xf32> to vector<16x128xf32>
    %96 = arith.addf %93, %95 : vector<16x128xf32>
    %c0_129 = arith.constant 0 : index
    %c10_130 = arith.constant 10 : index
    %c0_131 = arith.constant 0 : index
    %c0_132 = arith.constant 0 : index
    %97 = vector.load %arg4[%c0_129, %c10_130, %c0_131, %c0_132] : memref<1x16x16x128xf32, #tpu.memory_space<vmem>>, vector<1x1x16x128xf32>
    %98 = vector.shape_cast %97 : vector<1x1x16x128xf32> to vector<16x128xf32>
    %99 = vector.shape_cast %96 : vector<16x128xf32> to vector<1x1x16x128xf32>
    tpu.vector_store %arg4[%c0_129, %c10_130, %c0_131, %c0_132], %99 {strides = array<i32>} : memref<1x16x16x128xf32, #tpu.memory_space<vmem>>, vector<1x1x16x128xf32>,
    %c0_133 = arith.constant 0 : index
    %c11 = arith.constant 11 : index
    %c0_134 = arith.constant 0 : index
    %c0_135 = arith.constant 0 : index
    %100 = vector.load %arg2[%c0_133, %c11, %c0_134, %c0_135] : memref<1x16x8x128xf32, #tpu.memory_space<vmem>>, vector<1x1x8x128xf32>
    %101 = vector.shape_cast %100 : vector<1x1x8x128xf32> to vector<8x128xf32>
    %cst_136 = arith.constant dense<0.000000e+00> : vector<16x128xf32>
    %102 = tpu.matmul %0, %101, %cst_136 {dimension_numbers = #tpu.dot_dimension_numbers<[1], [0], [0], [1], [0, 0, 1, 1], [], []>} : vector<16x8xf32>, vector<8x128xf32>, vector<16x128xf32> -> vector<16x128xf32>
    %c0_137 = arith.constant 0 : index
    %c11_138 = arith.constant 11 : index
    %c0_139 = arith.constant 0 : index
    %c0_140 = arith.constant 0 : index
    %103 = vector.load %arg3[%c0_137, %c11_138, %c0_139, %c0_140] : memref<1x16x16x128xf32, #tpu.memory_space<vmem>>, vector<1x1x16x128xf32>
    %104 = vector.shape_cast %103 : vector<1x1x16x128xf32> to vector<16x128xf32>
    %105 = arith.addf %102, %104 : vector<16x128xf32>
    %c0_141 = arith.constant 0 : index
    %c11_142 = arith.constant 11 : index
    %c0_143 = arith.constant 0 : index
    %c0_144 = arith.constant 0 : index
    %106 = vector.load %arg4[%c0_141, %c11_142, %c0_143, %c0_144] : memref<1x16x16x128xf32, #tpu.memory_space<vmem>>, vector<1x1x16x128xf32>
    %107 = vector.shape_cast %106 : vector<1x1x16x128xf32> to vector<16x128xf32>
    %108 = vector.shape_cast %105 : vector<16x128xf32> to vector<1x1x16x128xf32>
    tpu.vector_store %arg4[%c0_141, %c11_142, %c0_143, %c0_144], %108 {strides = array<i32>} : memref<1x16x16x128xf32, #tpu.memory_space<vmem>>, vector<1x1x16x128xf32>,
    %c0_145 = arith.constant 0 : index
    %c12 = arith.constant 12 : index
    %c0_146 = arith.constant 0 : index
    %c0_147 = arith.constant 0 : index
    %109 = vector.load %arg2[%c0_145, %c12, %c0_146, %c0_147] : memref<1x16x8x128xf32, #tpu.memory_space<vmem>>, vector<1x1x8x128xf32>
    %110 = vector.shape_cast %109 : vector<1x1x8x128xf32> to vector<8x128xf32>
    %cst_148 = arith.constant dense<0.000000e+00> : vector<16x128xf32>
    %111 = tpu.matmul %0, %110, %cst_148 {dimension_numbers = #tpu.dot_dimension_numbers<[1], [0], [0], [1], [0, 0, 1, 1], [], []>} : vector<16x8xf32>, vector<8x128xf32>, vector<16x128xf32> -> vector<16x128xf32>
    %c0_149 = arith.constant 0 : index
    %c12_150 = arith.constant 12 : index
    %c0_151 = arith.constant 0 : index
    %c0_152 = arith.constant 0 : index
    %112 = vector.load %arg3[%c0_149, %c12_150, %c0_151, %c0_152] : memref<1x16x16x128xf32, #tpu.memory_space<vmem>>, vector<1x1x16x128xf32>
    %113 = vector.shape_cast %112 : vector<1x1x16x128xf32> to vector<16x128xf32>
    %114 = arith.addf %111, %113 : vector<16x128xf32>
    %c0_153 = arith.constant 0 : index
    %c12_154 = arith.constant 12 : index
    %c0_155 = arith.constant 0 : index
    %c0_156 = arith.constant 0 : index
    %115 = vector.load %arg4[%c0_153, %c12_154, %c0_155, %c0_156] : memref<1x16x16x128xf32, #tpu.memory_space<vmem>>, vector<1x1x16x128xf32>
    %116 = vector.shape_cast %115 : vector<1x1x16x128xf32> to vector<16x128xf32>
    %117 = vector.shape_cast %114 : vector<16x128xf32> to vector<1x1x16x128xf32>
    tpu.vector_store %arg4[%c0_153, %c12_154, %c0_155, %c0_156], %117 {strides = array<i32>} : memref<1x16x16x128xf32, #tpu.memory_space<vmem>>, vector<1x1x16x128xf32>,
    %c0_157 = arith.constant 0 : index
    %c13 = arith.constant 13 : index
    %c0_158 = arith.constant 0 : index
    %c0_159 = arith.constant 0 : index
    %118 = vector.load %arg2[%c0_157, %c13, %c0_158, %c0_159] : memref<1x16x8x128xf32, #tpu.memory_space<vmem>>, vector<1x1x8x128xf32>
    %119 = vector.shape_cast %118 : vector<1x1x8x128xf32> to vector<8x128xf32>
    %cst_160 = arith.constant dense<0.000000e+00> : vector<16x128xf32>
    %120 = tpu.matmul %0, %119, %cst_160 {dimension_numbers = #tpu.dot_dimension_numbers<[1], [0], [0], [1], [0, 0, 1, 1], [], []>} : vector<16x8xf32>, vector<8x128xf32>, vector<16x128xf32> -> vector<16x128xf32>
    %c0_161 = arith.constant 0 : index
    %c13_162 = arith.constant 13 : index
    %c0_163 = arith.constant 0 : index
    %c0_164 = arith.constant 0 : index
    %121 = vector.load %arg3[%c0_161, %c13_162, %c0_163, %c0_164] : memref<1x16x16x128xf32, #tpu.memory_space<vmem>>, vector<1x1x16x128xf32>
    %122 = vector.shape_cast %121 : vector<1x1x16x128xf32> to vector<16x128xf32>
    %123 = arith.addf %120, %122 : vector<16x128xf32>
    %c0_165 = arith.constant 0 : index
    %c13_166 = arith.constant 13 : index
    %c0_167 = arith.constant 0 : index
    %c0_168 = arith.constant 0 : index
    %124 = vector.load %arg4[%c0_165, %c13_166, %c0_167, %c0_168] : memref<1x16x16x128xf32, #tpu.memory_space<vmem>>, vector<1x1x16x128xf32>
    %125 = vector.shape_cast %124 : vector<1x1x16x128xf32> to vector<16x128xf32>
    %126 = vector.shape_cast %123 : vector<16x128xf32> to vector<1x1x16x128xf32>
    tpu.vector_store %arg4[%c0_165, %c13_166, %c0_167, %c0_168], %126 {strides = array<i32>} : memref<1x16x16x128xf32, #tpu.memory_space<vmem>>, vector<1x1x16x128xf32>,
    %c0_169 = arith.constant 0 : index
    %c14 = arith.constant 14 : index
    %c0_170 = arith.constant 0 : index
    %c0_171 = arith.constant 0 : index
    %127 = vector.load %arg2[%c0_169, %c14, %c0_170, %c0_171] : memref<1x16x8x128xf32, #tpu.memory_space<vmem>>, vector<1x1x8x128xf32>
    %128 = vector.shape_cast %127 : vector<1x1x8x128xf32> to vector<8x128xf32>
    %cst_172 = arith.constant dense<0.000000e+00> : vector<16x128xf32>
    %129 = tpu.matmul %0, %128, %cst_172 {dimension_numbers = #tpu.dot_dimension_numbers<[1], [0], [0], [1], [0, 0, 1, 1], [], []>} : vector<16x8xf32>, vector<8x128xf32>, vector<16x128xf32> -> vector<16x128xf32>
    %c0_173 = arith.constant 0 : index
    %c14_174 = arith.constant 14 : index
    %c0_175 = arith.constant 0 : index
    %c0_176 = arith.constant 0 : index
    %130 = vector.load %arg3[%c0_173, %c14_174, %c0_175, %c0_176] : memref<1x16x16x128xf32, #tpu.memory_space<vmem>>, vector<1x1x16x128xf32>
    %131 = vector.shape_cast %130 : vector<1x1x16x128xf32> to vector<16x128xf32>
    %132 = arith.addf %129, %131 : vector<16x128xf32>
    %c0_177 = arith.constant 0 : index
    %c14_178 = arith.constant 14 : index
    %c0_179 = arith.constant 0 : index
    %c0_180 = arith.constant 0 : index
    %133 = vector.load %arg4[%c0_177, %c14_178, %c0_179, %c0_180] : memref<1x16x16x128xf32, #tpu.memory_space<vmem>>, vector<1x1x16x128xf32>
    %134 = vector.shape_cast %133 : vector<1x1x16x128xf32> to vector<16x128xf32>
    %135 = vector.shape_cast %132 : vector<16x128xf32> to vector<1x1x16x128xf32>
    tpu.vector_store %arg4[%c0_177, %c14_178, %c0_179, %c0_180], %135 {strides = array<i32>} : memref<1x16x16x128xf32, #tpu.memory_space<vmem>>, vector<1x1x16x128xf32>,
    %c0_181 = arith.constant 0 : index
    %c15 = arith.constant 15 : index
    %c0_182 = arith.constant 0 : index
    %c0_183 = arith.constant 0 : index
    %136 = vector.load %arg2[%c0_181, %c15, %c0_182, %c0_183] : memref<1x16x8x128xf32, #tpu.memory_space<vmem>>, vector<1x1x8x128xf32>
    %137 = vector.shape_cast %136 : vector<1x1x8x128xf32> to vector<8x128xf32>
    %cst_184 = arith.constant dense<0.000000e+00> : vector<16x128xf32>
    %138 = tpu.matmul %0, %137, %cst_184 {dimension_numbers = #tpu.dot_dimension_numbers<[1], [0], [0], [1], [0, 0, 1, 1], [], []>} : vector<16x8xf32>, vector<8x128xf32>, vector<16x128xf32> -> vector<16x128xf32>
    %c0_185 = arith.constant 0 : index
    %c15_186 = arith.constant 15 : index
    %c0_187 = arith.constant 0 : index
    %c0_188 = arith.constant 0 : index
    %139 = vector.load %arg3[%c0_185, %c15_186, %c0_187, %c0_188] : memref<1x16x16x128xf32, #tpu.memory_space<vmem>>, vector<1x1x16x128xf32>
    %140 = vector.shape_cast %139 : vector<1x1x16x128xf32> to vector<16x128xf32>
    %141 = arith.addf %138, %140 : vector<16x128xf32>
    %c0_189 = arith.constant 0 : index
    %c15_190 = arith.constant 15 : index
    %c0_191 = arith.constant 0 : index
    %c0_192 = arith.constant 0 : index
    %142 = vector.load %arg4[%c0_189, %c15_190, %c0_191, %c0_192] : memref<1x16x16x128xf32, #tpu.memory_space<vmem>>, vector<1x1x16x128xf32>
    %143 = vector.shape_cast %142 : vector<1x1x16x128xf32> to vector<16x128xf32>
    %144 = vector.shape_cast %141 : vector<16x128xf32> to vector<1x1x16x128xf32>
    tpu.vector_store %arg4[%c0_189, %c15_190, %c0_191, %c0_192], %144 {strides = array<i32>} : memref<1x16x16x128xf32, #tpu.memory_space<vmem>>, vector<1x1x16x128xf32>,
    return
  }
  func.func @transform_0(%arg0: i32) -> (i32, i32) {
    %c0_i32 = arith.constant 0 : i32
    %c0_i32_0 = arith.constant 0 : i32
    %c0_i32_1 = arith.constant 0 : i32
    return %c0_i32, %c0_i32_0 : i32, i32
  }
  func.func @transform_1(%arg0: i32) -> (i32, i32, i32, i32) {
    %c0_i32 = arith.constant 0 : i32
    %c0_i32_0 = arith.constant 0 : i32
    %c0_i32_1 = arith.constant 0 : i32
    %c0_i32_2 = arith.constant 0 : i32
    return %arg0, %c0_i32, %c0_i32_0, %c0_i32_1 : i32, i32, i32, i32
  }
  func.func @transform_2(%arg0: i32) -> (i32, i32, i32, i32) {
    %c0_i32 = arith.constant 0 : i32
    %c0_i32_0 = arith.constant 0 : i32
    %c0_i32_1 = arith.constant 0 : i32
    %c0_i32_2 = arith.constant 0 : i32
    return %arg0, %c0_i32, %c0_i32_0, %c0_i32_1 : i32, i32, i32, i32
  }
  func.func @transform_3(%arg0: i32) -> (i32, i32, i32, i32) {
    %c0_i32 = arith.constant 0 : i32
    %c0_i32_0 = arith.constant 0 : i32
    %c0_i32_1 = arith.constant 0 : i32
    %c0_i32_2 = arith.constant 0 : i32
    return %arg0, %c0_i32, %c0_i32_0, %c0_i32_1 : i32, i32, i32, i32
  }
}

</mosaic_0001>

<bundles_post_ra>
// kernel: newelppm_forward.14
= control target key start
LH: loop header
LB: loop body
LE: loop exit
PB: predicated region body
PF: predicated region fallthrough
CT: control target
= control target key end

     0   :  { %s555_s12 = smov 0   ;;  %s734_s0 = inlined_call_operand.vmem [shape: f32[512,128], index: 0, kind: input, shape index: {}]   ;;  %s735_s1 = inlined_call_operand.vmem [shape: f32[128,128], index: 1, kind: input, shape index: {}]   ;;  %s736_s2 = inlined_call_operand.vmem [shape: f32[1,128], index: 2, kind: input, shape index: {}]   ;;  %s737_s3 = inlined_call_operand.vmem [shape: f32[512,128], index: 3, kind: output, shape index: {}]  }
   0x1 LB: > { %s459_s13 = sadd.s32 4294967295, %s533_s12   ;;  %p463_p0 = scmp.ge.s32.totalorder %s533_s12, 1  ;;  %s533_s12 = sphi %s555_s12, %s13_s12  }
   0x2   : > { %p138_p1 = scmp.lt.s32.totalorder %s533_s12, 3 }
   0x4   : > { %p139_p2 = pnand %p463_p0, %p138_p1 }
   0x5   : > { %s464_s30 = sshll.u32 (!%p139_p2), %s459_s13, 5 }
   0x6   : > { %142 = sbr.rel (%p139_p2) target bundleno = 237 (0xed), region = 32  ;;  %p163_p3 = scmp.lt.s32.totalorder (!%p139_p2), %s464_s30, 63 }
   0xb   : > { %v221_v0 = vld [vmem:[%s735_s1 + $0x78] sm:$0xff]  ;;  %v220_v1 = vld [vmem:[%s735_s1 + $0x70] sm:$0xff]  ;;  %v219_v2 = vld [vmem:[%s735_s1 + $0x68] sm:$0xff]  ;;  %s739_s30 = smov (!%p163_p3, %s464_s30), 63 }
   0xc   : > { %471 = vmatpush.msra.mxu2 %v221_v0  ;;  %472 = vmatpush.msra.mxu3 %v221_v0  ;;  %v218_v3 = vld [vmem:[%s735_s1 + $0x60] sm:$0xff]  ;;  %v217_v4 = vld [vmem:[%s735_s1 + $0x58] sm:$0xff]  ;;  %v216_v5 = vld [vmem:[%s735_s1 + $0x50] sm:$0xff]  ;;  %s465_s15 = sshll.u32 %s739_s30, 3 }
   0xd   : > { %226 = vmatpush.msra.mxu0 %v221_v0  ;;  %470 = vmatpush.msra.mxu1 %v221_v0  ;;  %v215_v6 = vld [vmem:[%s735_s1 + $0x48] sm:$0xff]  ;;  %v214_v7 = vld [vmem:[%s735_s1 + $0x40] sm:$0xff]  ;;  %v213_v8 = vld [vmem:[%s735_s1 + $0x38] sm:$0xff]  ;;  %s618_s22 = scalar_lea.vmem %s734_s0, %s465_s15  ;;  %s667_s29 = scalar_lea.vmem %s737_s3, %s465_s15 }
   0xe   : > { %474 = vmatpush.msra.mxu2 %v220_v1  ;;  %475 = vmatpush.msra.mxu3 %v220_v1  ;;  %v212_v9 = vld [vmem:[%s735_s1 + $0x30] sm:$0xff]  ;;  %v211_v10 = vld [vmem:[%s735_s1 + $0x28] sm:$0xff]  ;;  %v210_v11 = vld [vmem:[%s735_s1 + $0x20] sm:$0xff] }
   0xf   : > { %227 = vmatpush.msra.mxu0 %v220_v1  ;;  %473 = vmatpush.msra.mxu1 %v220_v1  ;;  %v209_v12 = vld [vmem:[%s735_s1 + $0x18] sm:$0xff]  ;;  %v208_v13 = vld [vmem:[%s735_s1 + $0x10] sm:$0xff]  ;;  %v207_v14 = vld [vmem:[%s735_s1 + $0x8] sm:$0xff] }
  0x10   : > { %477 = vmatpush.msra.mxu2 %v219_v2  ;;  %478 = vmatpush.msra.mxu3 %v219_v2  ;;  %v206_v15 = vld [vmem:[%s735_s1] sm:$0xff]  ;;  %v191_v20 = vld [vmem:[%s618_s22 + $0x88] sm:$0xff]  ;;  %v192_v24 = vld [vmem:[%s618_s22 + $0x90] sm:$0xff] }
  0x11   : > { %228 = vmatpush.msra.mxu0 %v219_v2  ;;  %476 = vmatpush.msra.mxu1 %v219_v2  ;;  %v190_v16 = vld [vmem:[%s618_s22 + $0x80] sm:$0xff]  ;;  %v199_v21 = vld [vmem:[%s618_s22 + $0xc8] sm:$0xff]  ;;  %v200_v25 = vld [vmem:[%s618_s22 + $0xd0] sm:$0xff] }
  0x12   : > { %480 = vmatpush.msra.mxu2 %v218_v3  ;;  %481 = vmatpush.msra.mxu3 %v218_v3  ;;  %v198_v17 = vld [vmem:[%s618_s22 + $0xc0] sm:$0xff]  ;;  %v175_v22 = vld [vmem:[%s618_s22 + $0x8] sm:$0xff]  ;;  %v176_v26 = vld [vmem:[%s618_s22 + $0x10] sm:$0xff] }
  0x13   : > { %229 = vmatpush.msra.mxu0 %v218_v3  ;;  %479 = vmatpush.msra.mxu1 %v218_v3  ;;  %v174_v18 = vld [vmem:[%s618_s22] sm:$0xff]  ;;  %v183_v23 = vld [vmem:[%s618_s22 + $0x48] sm:$0xff]  ;;  %v184_v27 = vld [vmem:[%s618_s22 + $0x50] sm:$0xff] }
  0x14   : > { %483 = vmatpush.msra.mxu2 %v217_v4  ;;  %484 = vmatpush.msra.mxu3 %v217_v4  ;;  %v182_v19 = vld [vmem:[%s618_s22 + $0x40] sm:$0xff]  ;;  %v193_v28 = vld [vmem:[%s618_s22 + $0x98] sm:$0xff]  ;;  %v195_v36 = vld [vmem:[%s618_s22 + $0xa8] sm:$0xff] }
  0x15   : > { %230 = vmatpush.msra.mxu0 %v217_v4  ;;  %482 = vmatpush.msra.mxu1 %v217_v4  ;;  %v201_v29 = vld [vmem:[%s618_s22 + $0xd8] sm:$0xff]  ;;  %v194_v32 = vld [vmem:[%s618_s22 + $0xa0] sm:$0xff]  ;;  %v203_v37 = vld [vmem:[%s618_s22 + $0xe8] sm:$0xff] }
  0x16   : > { %486 = vmatpush.msra.mxu2 %v216_v5  ;;  %487 = vmatpush.msra.mxu3 %v216_v5  ;;  %v177_v30 = vld [vmem:[%s618_s22 + $0x18] sm:$0xff]  ;;  %v202_v33 = vld [vmem:[%s618_s22 + $0xe0] sm:$0xff]  ;;  %v179_v38 = vld [vmem:[%s618_s22 + $0x28] sm:$0xff] }
  0x17   : > { %231 = vmatpush.msra.mxu0 %v216_v5  ;;  %485 = vmatpush.msra.mxu1 %v216_v5  ;;  %v185_v31 = vld [vmem:[%s618_s22 + $0x58] sm:$0xff]  ;;  %v178_v34 = vld [vmem:[%s618_s22 + $0x20] sm:$0xff]  ;;  %v187_v39 = vld [vmem:[%s618_s22 + $0x68] sm:$0xff] }
  0x18   : > { %489 = vmatpush.msra.mxu2 %v215_v6  ;;  %490 = vmatpush.msra.mxu3 %v215_v6  ;;  %v186_v35 = vld [vmem:[%s618_s22 + $0x60] sm:$0xff]  ;;  %v196_v40 = vld [vmem:[%s618_s22 + $0xb0] sm:$0xff]  ;;  %v197_v44 = vld [vmem:[%s618_s22 + $0xb8] sm:$0xff] }
  0x19   : > { %232 = vmatpush.msra.mxu0 %v215_v6  ;;  %488 = vmatpush.msra.mxu1 %v215_v6  ;;  %v204_v41 = vld [vmem:[%s618_s22 + $0xf0] sm:$0xff]  ;;  %v205_v45 = vld [vmem:[%s618_s22 + $0xf8] sm:$0xff]  ;;  %v658_v48 = vld [vmem:[%s736_s2] ss:$0 sm:$0xff] }
  0x1a   : > { %492 = vmatpush.msra.mxu2 %v214_v7  ;;  %493 = vmatpush.msra.mxu3 %v214_v7  ;;  %v180_v42 = vld [vmem:[%s618_s22 + $0x30] sm:$0xff]  ;;  %v181_v46 = vld [vmem:[%s618_s22 + $0x38] sm:$0xff] }
  0x1b   : > { %233 = vmatpush.msra.mxu0 %v214_v7  ;;  %491 = vmatpush.msra.mxu1 %v214_v7  ;;  %v188_v43 = vld [vmem:[%s618_s22 + $0x70] sm:$0xff]  ;;  %v189_v47 = vld [vmem:[%s618_s22 + $0x78] sm:$0xff] }
  0x1c   : > { %495 = vmatpush.msra.mxu2 %v213_v8  ;;  %496 = vmatpush.msra.mxu3 %v213_v8 }
  0x1d   : > { %234 = vmatpush.msra.mxu0 %v213_v8  ;;  %494 = vmatpush.msra.mxu1 %v213_v8 }
  0x1e   : > { %498 = vmatpush.msra.mxu2 %v212_v9  ;;  %499 = vmatpush.msra.mxu3 %v212_v9 }
  0x1f   : > { %235 = vmatpush.msra.mxu0 %v212_v9  ;;  %497 = vmatpush.msra.mxu1 %v212_v9 }
  0x20   : > { %501 = vmatpush.msra.mxu2 %v211_v10  ;;  %502 = vmatpush.msra.mxu3 %v211_v10 }
  0x21   : > { %236 = vmatpush.msra.mxu0 %v211_v10  ;;  %500 = vmatpush.msra.mxu1 %v211_v10 }
  0x22   : > { %504 = vmatpush.msra.mxu2 %v210_v11  ;;  %505 = vmatpush.msra.mxu3 %v210_v11 }
  0x23   : > { %237 = vmatpush.msra.mxu0 %v210_v11  ;;  %503 = vmatpush.msra.mxu1 %v210_v11 }
  0x24   : > { %507 = vmatpush.msra.mxu2 %v209_v12  ;;  %508 = vmatpush.msra.mxu3 %v209_v12 }
  0x25   : > { %238 = vmatpush.msra.mxu0 %v209_v12  ;;  %506 = vmatpush.msra.mxu1 %v209_v12 }
  0x26   : > { %510 = vmatpush.msra.mxu2 %v208_v13  ;;  %511 = vmatpush.msra.mxu3 %v208_v13 }
  0x27   : > { %239 = vmatpush.msra.mxu0 %v208_v13  ;;  %509 = vmatpush.msra.mxu1 %v208_v13 }
  0x28   : > { %513 = vmatpush.msra.mxu2 %v207_v14  ;;  %514 = vmatpush.msra.mxu3 %v207_v14 }
  0x29   : > { %240 = vmatpush.msra.mxu0 %v207_v14  ;;  %512 = vmatpush.msra.mxu1 %v207_v14 }
  0x2a   : > { %516 = vmatpush.msra.mxu2 %v206_v15  ;;  %517 = vmatpush.msra.mxu3 %v206_v15 }
  0x2b   : > { %290 = vmatmul.f32.vlgmr.msra.gmra.mxu2 %v190_v16  ;;  %314 = vmatmul.f32.vlgmr.msra.gmra.mxu3 %v198_v17 }
  0x2c   : > { %241 = vmatpush.msra.mxu0 %v206_v15  ;;  %515 = vmatpush.msra.mxu1 %v206_v15 }
  0x2d   : > { %242 = vmatmul.f32.vlgmr.msra.gmra.mxu0 %v174_v18  ;;  %266 = vmatmul.f32.vlgmr.msra.gmra.mxu1 %v182_v19 }
  0x33   : > { %293 = vmatmul.f32.gmra.mxu2 %v191_v20  ;;  %317 = vmatmul.f32.gmra.mxu3 %v199_v21 }
  0x35   : > { %245 = vmatmul.f32.gmra.mxu0 %v175_v22  ;;  %269 = vmatmul.f32.gmra.mxu1 %v183_v23 }
  0x3b   : > { %296 = vmatmul.f32.gmra.mxu2 %v192_v24  ;;  %320 = vmatmul.f32.gmra.mxu3 %v200_v25 }
  0x3d   : > { %248 = vmatmul.f32.gmra.mxu0 %v176_v26  ;;  %272 = vmatmul.f32.gmra.mxu1 %v184_v27 }
  0x43   : > { %299 = vmatmul.f32.gmra.mxu2 %v193_v28  ;;  %323 = vmatmul.f32.gmra.mxu3 %v201_v29 }
  0x45   : > { %251 = vmatmul.f32.gmra.mxu0 %v177_v30  ;;  %275 = vmatmul.f32.gmra.mxu1 %v185_v31 }
  0x4b   : > { %302 = vmatmul.f32.gmra.mxu2 %v194_v32  ;;  %326 = vmatmul.f32.gmra.mxu3 %v202_v33 }
  0x4d   : > { %254 = vmatmul.f32.gmra.mxu0 %v178_v34  ;;  %278 = vmatmul.f32.gmra.mxu1 %v186_v35 }
  0x53   : > { %305 = vmatmul.f32.gmra.mxu2 %v195_v36  ;;  %329 = vmatmul.f32.gmra.mxu3 %v203_v37 }
  0x55   : > { %257 = vmatmul.f32.gmra.mxu0 %v179_v38  ;;  %281 = vmatmul.f32.gmra.mxu1 %v187_v39 }
  0x5b   : > { %308 = vmatmul.f32.gmra.mxu2 %v196_v40  ;;  %332 = vmatmul.f32.gmra.mxu3 %v204_v41 }
  0x5d   : > { %260 = vmatmul.f32.gmra.mxu0 %v180_v42  ;;  %284 = vmatmul.f32.gmra.mxu1 %v188_v43 }
  0x63   : > { %311 = vmatmul.f32.gmra.mxu2 %v197_v44  ;;  %335 = vmatmul.f32.gmra.mxu3 %v205_v45 }
  0x65   : > { %263 = vmatmul.f32.gmra.mxu0 %v181_v46  ;;  %287 = vmatmul.f32.gmra.mxu1 %v189_v47 }
  0xaa   : > { %v243_v49 = vpop.f32.mrf.mxu0  ;;  %v267_v50 = vpop.f32.mrf.mxu1 }
  0xab   : > { %v244_v51 = vadd.f32 %v658_v48, %v243_v49  ;;  %v268_v52 = vadd.f32 %v658_v48, %v267_v50 }
  0xad   : > { %v339_v53 = vmax.f32 %v244_v51, 0.0  ;;  %v347_v54 = vmax.f32 %v268_v52, 0.0 }
  0xae   : > { %v291_v55 = vpop.f32.mrf.mxu2  ;;  %v315_v56 = vpop.f32.mrf.mxu3 }
  0xaf   : > { %371 = vst [vmem:[%s667_s29] sm:$0xff] %v339_v53  ;;  %v292_v57 = vadd.f32 %v658_v48, %v291_v55  ;;  %v316_v58 = vadd.f32 %v658_v48, %v315_v56 }
  0xb0   : > { %379 = vst [vmem:[%s667_s29 + $0x40] sm:$0xff] %v347_v54 }
  0xb1   : > { %v355_v59 = vmax.f32 %v292_v57, 0.0  ;;  %v363_v60 = vmax.f32 %v316_v58, 0.0 }
  0xb2   : > { %v246_v61 = vpop.f32.mrf.mxu0  ;;  %v270_v62 = vpop.f32.mrf.mxu1 }
  0xb3   : > { %387 = vst [vmem:[%s667_s29 + $0x80] sm:$0xff] %v355_v59  ;;  %v247_v63 = vadd.f32 %v658_v48, %v246_v61  ;;  %v271_v0 = vadd.f32 %v658_v48, %v270_v62 }
  0xb4   : > { %395 = vst [vmem:[%s667_s29 + $0xc0] sm:$0xff] %v363_v60 }
  0xb5   : > { %v340_v1 = vmax.f32 %v247_v63, 0.0  ;;  %v348_v2 = vmax.f32 %v271_v0, 0.0 }
  0xb6   : > { %v294_v3 = vpop.f32.mrf.mxu2  ;;  %v318_v4 = vpop.f32.mrf.mxu3 }
  0xb7   : > { %372 = vst [vmem:[%s667_s29 + $0x8] sm:$0xff] %v340_v1  ;;  %v295_v5 = vadd.f32 %v658_v48, %v294_v3  ;;  %v319_v6 = vadd.f32 %v658_v48, %v318_v4 }
  0xb8   : > { %380 = vst [vmem:[%s667_s29 + $0x48] sm:$0xff] %v348_v2 }
  0xb9   : > { %v356_v7 = vmax.f32 %v295_v5, 0.0  ;;  %v364_v8 = vmax.f32 %v319_v6, 0.0 }
  0xba   : > { %v249_v9 = vpop.f32.mrf.mxu0  ;;  %v273_v10 = vpop.f32.mrf.mxu1 }
  0xbb   : > { %388 = vst [vmem:[%s667_s29 + $0x88] sm:$0xff] %v356_v7  ;;  %v250_v11 = vadd.f32 %v658_v48, %v249_v9  ;;  %v274_v12 = vadd.f32 %v658_v48, %v273_v10 }
  0xbc   : > { %396 = vst [vmem:[%s667_s29 + $0xc8] sm:$0xff] %v364_v8 }
  0xbd   : > { %v341_v13 = vmax.f32 %v250_v11, 0.0  ;;  %v349_v14 = vmax.f32 %v274_v12, 0.0 }
  0xbe   : > { %v297_v15 = vpop.f32.mrf.mxu2  ;;  %v321_v16 = vpop.f32.mrf.mxu3 }
  0xbf   : > { %373 = vst [vmem:[%s667_s29 + $0x10] sm:$0xff] %v341_v13  ;;  %v298_v17 = vadd.f32 %v658_v48, %v297_v15  ;;  %v322_v18 = vadd.f32 %v658_v48, %v321_v16 }
  0xc0   : > { %381 = vst [vmem:[%s667_s29 + $0x50] sm:$0xff] %v349_v14 }
  0xc1   : > { %v357_v19 = vmax.f32 %v298_v17, 0.0  ;;  %v365_v20 = vmax.f32 %v322_v18, 0.0 }
  0xc2   : > { %v252_v21 = vpop.f32.mrf.mxu0  ;;  %v276_v22 = vpop.f32.mrf.mxu1 }
  0xc3   : > { %389 = vst [vmem:[%s667_s29 + $0x90] sm:$0xff] %v357_v19  ;;  %v253_v23 = vadd.f32 %v658_v48, %v252_v21  ;;  %v277_v24 = vadd.f32 %v658_v48, %v276_v22 }
  0xc4   : > { %397 = vst [vmem:[%s667_s29 + $0xd0] sm:$0xff] %v365_v20 }
  0xc5   : > { %v342_v25 = vmax.f32 %v253_v23, 0.0  ;;  %v350_v26 = vmax.f32 %v277_v24, 0.0 }
  0xc6   : > { %v300_v27 = vpop.f32.mrf.mxu2  ;;  %v324_v28 = vpop.f32.mrf.mxu3 }
  0xc7   : > { %374 = vst [vmem:[%s667_s29 + $0x18] sm:$0xff] %v342_v25  ;;  %v301_v29 = vadd.f32 %v658_v48, %v300_v27  ;;  %v325_v30 = vadd.f32 %v658_v48, %v324_v28 }
  0xc8   : > { %382 = vst [vmem:[%s667_s29 + $0x58] sm:$0xff] %v350_v26 }
  0xc9   : > { %v358_v31 = vmax.f32 %v301_v29, 0.0  ;;  %v366_v32 = vmax.f32 %v325_v30, 0.0 }
  0xca   : > { %v255_v33 = vpop.f32.mrf.mxu0  ;;  %v279_v34 = vpop.f32.mrf.mxu1 }
  0xcb   : > { %390 = vst [vmem:[%s667_s29 + $0x98] sm:$0xff] %v358_v31  ;;  %v256_v35 = vadd.f32 %v658_v48, %v255_v33  ;;  %v280_v36 = vadd.f32 %v658_v48, %v279_v34 }
  0xcc   : > { %398 = vst [vmem:[%s667_s29 + $0xd8] sm:$0xff] %v366_v32 }
  0xcd   : > { %v343_v37 = vmax.f32 %v256_v35, 0.0  ;;  %v351_v38 = vmax.f32 %v280_v36, 0.0 }
  0xce   : > { %v303_v39 = vpop.f32.mrf.mxu2  ;;  %v327_v40 = vpop.f32.mrf.mxu3 }
  0xcf   : > { %375 = vst [vmem:[%s667_s29 + $0x20] sm:$0xff] %v343_v37  ;;  %v304_v41 = vadd.f32 %v658_v48, %v303_v39  ;;  %v328_v42 = vadd.f32 %v658_v48, %v327_v40 }
  0xd0   : > { %383 = vst [vmem:[%s667_s29 + $0x60] sm:$0xff] %v351_v38 }
  0xd1   : > { %v359_v43 = vmax.f32 %v304_v41, 0.0  ;;  %v367_v44 = vmax.f32 %v328_v42, 0.0 }
  0xd2   : > { %v258_v45 = vpop.f32.mrf.mxu0  ;;  %v282_v46 = vpop.f32.mrf.mxu1 }
  0xd3   : > { %391 = vst [vmem:[%s667_s29 + $0xa0] sm:$0xff] %v359_v43  ;;  %v259_v47 = vadd.f32 %v658_v48, %v258_v45  ;;  %v283_v49 = vadd.f32 %v658_v48, %v282_v46 }
  0xd4   : > { %399 = vst [vmem:[%s667_s29 + $0xe0] sm:$0xff] %v367_v44 }
  0xd5   : > { %v344_v50 = vmax.f32 %v259_v47, 0.0  ;;  %v352_v51 = vmax.f32 %v283_v49, 0.0 }
  0xd6   : > { %v306_v52 = vpop.f32.mrf.mxu2  ;;  %v330_v53 = vpop.f32.mrf.mxu3 }
  0xd7   : > { %376 = vst [vmem:[%s667_s29 + $0x28] sm:$0xff] %v344_v50  ;;  %v307_v54 = vadd.f32 %v658_v48, %v306_v52  ;;  %v331_v55 = vadd.f32 %v658_v48, %v330_v53 }
  0xd8   : > { %384 = vst [vmem:[%s667_s29 + $0x68] sm:$0xff] %v352_v51 }
  0xd9   : > { %v360_v56 = vmax.f32 %v307_v54, 0.0  ;;  %v368_v57 = vmax.f32 %v331_v55, 0.0 }
  0xda   : > { %v261_v58 = vpop.f32.mrf.mxu0  ;;  %v285_v59 = vpop.f32.mrf.mxu1 }
  0xdb   : > { %392 = vst [vmem:[%s667_s29 + $0xa8] sm:$0xff] %v360_v56  ;;  %v262_v60 = vadd.f32 %v658_v48, %v261_v58  ;;  %v286_v61 = vadd.f32 %v658_v48, %v285_v59 }
  0xdc   : > { %400 = vst [vmem:[%s667_s29 + $0xe8] sm:$0xff] %v368_v57 }
  0xdd   : > { %v345_v62 = vmax.f32 %v262_v60, 0.0  ;;  %v353_v63 = vmax.f32 %v286_v61, 0.0 }
  0xde   : > { %v309_v0 = vpop.f32.mrf.mxu2  ;;  %v333_v1 = vpop.f32.mrf.mxu3 }
  0xdf   : > { %377 = vst [vmem:[%s667_s29 + $0x30] sm:$0xff] %v345_v62  ;;  %v310_v2 = vadd.f32 %v658_v48, %v309_v0  ;;  %v334_v3 = vadd.f32 %v658_v48, %v333_v1 }
  0xe0   : > { %385 = vst [vmem:[%s667_s29 + $0x70] sm:$0xff] %v353_v63 }
  0xe1   : > { %v361_v4 = vmax.f32 %v310_v2, 0.0  ;;  %v369_v5 = vmax.f32 %v334_v3, 0.0 }
  0xe2   : > { %v264_v6 = vpop.f32.mrf.mxu0  ;;  %v288_v7 = vpop.f32.mrf.mxu1 }
  0xe3   : > { %393 = vst [vmem:[%s667_s29 + $0xb0] sm:$0xff] %v361_v4  ;;  %v265_v8 = vadd.f32 %v658_v48, %v264_v6  ;;  %v289_v9 = vadd.f32 %v658_v48, %v288_v7 }
  0xe4   : > { %401 = vst [vmem:[%s667_s29 + $0xf0] sm:$0xff] %v369_v5 }
  0xe5   : > { %v346_v10 = vmax.f32 %v265_v8, 0.0  ;;  %v354_v11 = vmax.f32 %v289_v9, 0.0 }
  0xe6   : > { %v312_v12 = vpop.f32.mrf.mxu2  ;;  %v336_v13 = vpop.f32.mrf.mxu3 }
  0xe7   : > { %378 = vst [vmem:[%s667_s29 + $0x38] sm:$0xff] %v346_v10  ;;  %v313_v14 = vadd.f32 %v658_v48, %v312_v12  ;;  %v337_v15 = vadd.f32 %v658_v48, %v336_v13 }
  0xe8   : > { %386 = vst [vmem:[%s667_s29 + $0x78] sm:$0xff] %v354_v11 }
  0xe9   : > { %v362_v16 = vmax.f32 %v313_v14, 0.0  ;;  %v370_v17 = vmax.f32 %v337_v15, 0.0 }
  0xeb   : > { %394 = vst [vmem:[%s667_s29 + $0xb8] sm:$0xff] %v362_v16 }
  0xec   : > { %402 = vst [vmem:[%s667_s29 + $0xf8] sm:$0xff] %v370_v17 }
  0xed PF: > { %s13_s12 = sadd.s32 1, %s533_s12  }
  0xee   : > { %p10_p4 = scmp.ge.s32.totalorder %s13_s12, 4  }
  0xf0   :  { %12 = sbr.rel (!%p10_p4) target bundleno = 1 (0x1), region = 62 }

// kernel: newelppm_forward.15
= control target key start
LH: loop header
LB: loop body
LE: loop exit
PB: predicated region body
PF: predicated region fallthrough
CT: control target
= control target key end

     0   :  { %s716_s9 = smov 0   ;;  %s882_s0 = inlined_call_operand.vmem [shape: f32[15,16], index: 0, kind: input, shape index: {}]   ;;  %s883_s1 = inlined_call_operand.vmem [shape: f32[2,16,2048], index: 1, kind: input, shape index: {}]   ;;  %s884_s2 = inlined_call_operand.vmem [shape: f32[2,15,2048], index: 2, kind: output, shape index: {}]  }
   0x1 LB: > { %s640_s10 = sadd.s32 4294967295, %s699_s9   ;;  %p644_p0 = scmp.ge.s32.totalorder %s699_s9, 1  ;;  %s699_s9 = sphi %s716_s9, %s12_s9  }
   0x2   : > { %p112_p1 = scmp.lt.s32.totalorder %s699_s9, 3 }
   0x4   : > { %p113_p2 = pnand %p644_p0, %p112_p1 }
   0x5   : > { %p134_p3 = scmp.lt.s32.totalorder (!%p113_p2), %s640_s10, 1 }
   0x6   : > { %116 = sbr.rel (%p113_p2) target bundleno = 208 (0xd0), region = 28 }
   0xb   : > { %s886_s10 = smov (!%p134_p3, %s640_s10), 1  ;;  %v741_v4 = vld [vmem:[%s882_s0] sm:$0xff]  ;;  %vm178_vm0 = vcmask 130048   ;;  %v766_v17 = vld [vmem:[%s882_s0 + $0x8] sm:$0x7f] }
   0xc   : > { %s683_s11 = sshll.u32 %s886_s10, 8 }
   0xd   : > { %s732_s14 = scalar_lea.vmem %s883_s1, %s683_s11  ;;  %s845_s21 = scalar_lea.vmem %s884_s2, %s683_s11 }
   0xe   : > { %v164_v0 = vld [vmem:[%s732_s14 + $0x90] sm:$0xff]  ;;  %v165_v1 = vld [vmem:[%s732_s14 + $0x98] sm:$0xff]  ;;  %v162_v7 = vld [vmem:[%s732_s14 + $0x80] sm:$0xff] }
   0xf   : > { %v148_v2 = vld [vmem:[%s732_s14 + $0x10] sm:$0xff]  ;;  %245 = vmatpush.msra.mxu2 %v164_v0  ;;  %268 = vmatpush.msra.mxu3 %v165_v1  ;;  %v149_v3 = vld [vmem:[%s732_s14 + $0x18] sm:$0xff]  ;;  %v163_v8 = vld [vmem:[%s732_s14 + $0x88] sm:$0xff] }
  0x10   : > { %v168_v5 = vld [vmem:[%s732_s14 + $0xb0] sm:$0xff]  ;;  %v169_v6 = vld [vmem:[%s732_s14 + $0xb8] sm:$0xff]  ;;  %v146_v11 = vld [vmem:[%s732_s14] sm:$0xff]  ;;  %199 = vmatpush.msra.mxu0 %v162_v7  ;;  %222 = vmatpush.msra.mxu1 %v163_v8 }
  0x11   : > { %246 = vmatpush.msra.mxu2 %v148_v2  ;;  %269 = vmatpush.msra.mxu3 %v149_v3  ;;  %v152_v9 = vld [vmem:[%s732_s14 + $0x30] sm:$0xff]  ;;  %v153_v10 = vld [vmem:[%s732_s14 + $0x38] sm:$0xff]  ;;  %v147_v12 = vld [vmem:[%s732_s14 + $0x8] sm:$0xff] }
  0x12   : > { %653 = vmatmul.msk.f32.vlgmr.msra.gmra.mxu2 %vm178_vm0, %v741_v4  ;;  %655 = vmatmul.msk.f32.vlgmr.msra.gmra.mxu3 %vm178_vm0, %v741_v4  ;;  %v166_v13 = vld [vmem:[%s732_s14 + $0xa0] sm:$0xff]  ;;  %v167_v14 = vld [vmem:[%s732_s14 + $0xa8] sm:$0xff]  ;;  %v172_v15 = vld [vmem:[%s732_s14 + $0xd0] sm:$0xff] }
  0x13   : > { %337 = vmatpush.msrb.mxu2 %v168_v5  ;;  %360 = vmatpush.msrb.mxu3 %v169_v6  ;;  %v173_v16 = vld [vmem:[%s732_s14 + $0xd8] sm:$0xff]  ;;  %v150_v18 = vld [vmem:[%s732_s14 + $0x20] sm:$0xff]  ;;  %v151_v19 = vld [vmem:[%s732_s14 + $0x28] sm:$0xff] }
  0x14   : > { %200 = vmatpush.msra.mxu0 %v146_v11  ;;  %223 = vmatpush.msra.mxu1 %v147_v12  ;;  %v170_v20 = vld [vmem:[%s732_s14 + $0xc0] sm:$0xff]  ;;  %v171_v21 = vld [vmem:[%s732_s14 + $0xc8] sm:$0xff]  ;;  %v156_v22 = vld [vmem:[%s732_s14 + $0x50] sm:$0xff] }
  0x15   : > { %338 = vmatpush.msrb.mxu2 %v152_v9  ;;  %361 = vmatpush.msrb.mxu3 %v153_v10  ;;  %v157_v23 = vld [vmem:[%s732_s14 + $0x58] sm:$0xff]  ;;  %v154_v24 = vld [vmem:[%s732_s14 + $0x40] sm:$0xff]  ;;  %v155_v25 = vld [vmem:[%s732_s14 + $0x48] sm:$0xff] }
  0x16   : > { %649 = vmatmul.msk.f32.vlgmr.msra.gmra.mxu0 %vm178_vm0, %v741_v4  ;;  %651 = vmatmul.msk.f32.vlgmr.msra.gmra.mxu1 %vm178_vm0, %v741_v4  ;;  %v176_v26 = vld [vmem:[%s732_s14 + $0xf0] sm:$0xff]  ;;  %v177_v27 = vld [vmem:[%s732_s14 + $0xf8] sm:$0xff]  ;;  %v174_v30 = vld [vmem:[%s732_s14 + $0xe0] sm:$0xff] }
  0x17   : > { %291 = vmatpush.msrb.mxu0 %v166_v13  ;;  %314 = vmatpush.msrb.mxu1 %v167_v14  ;;  %v160_v28 = vld [vmem:[%s732_s14 + $0x70] sm:$0xff]  ;;  %v161_v29 = vld [vmem:[%s732_s14 + $0x78] sm:$0xff]  ;;  %v175_v31 = vld [vmem:[%s732_s14 + $0xe8] sm:$0xff] }
  0x18   : > { %429 = vmatpush.msra.mxu2 %v172_v15  ;;  %452 = vmatpush.msra.mxu3 %v173_v16  ;;  %v158_v32 = vld [vmem:[%s732_s14 + $0x60] sm:$0xff]  ;;  %v159_v33 = vld [vmem:[%s732_s14 + $0x68] sm:$0xff] }
  0x19   : > { %292 = vmatpush.msrb.mxu0 %v150_v18  ;;  %315 = vmatpush.msrb.mxu1 %v151_v19 }
  0x1a   : > { %654 = vmatmul.msk.f32.gmra.mxu2 %vm178_vm0, %v766_v17  ;;  %656 = vmatmul.msk.f32.gmra.mxu3 %vm178_vm0, %v766_v17 }
  0x1b   : > { %383 = vmatpush.msra.mxu0 %v170_v20  ;;  %406 = vmatpush.msra.mxu1 %v171_v21 }
  0x1c   : > { %430 = vmatpush.msra.mxu2 %v156_v22  ;;  %453 = vmatpush.msra.mxu3 %v157_v23 }
  0x1d   : > { %384 = vmatpush.msra.mxu0 %v154_v24  ;;  %407 = vmatpush.msra.mxu1 %v155_v25 }
  0x1e   : > { %650 = vmatmul.msk.f32.gmra.mxu0 %vm178_vm0, %v766_v17  ;;  %652 = vmatmul.msk.f32.gmra.mxu1 %vm178_vm0, %v766_v17 }
  0x22   : > { %661 = vmatmul.msk.f32.vlgmr.msrb.gmra.mxu2 %vm178_vm0, %v741_v4  ;;  %663 = vmatmul.msk.f32.vlgmr.msrb.gmra.mxu3 %vm178_vm0, %v741_v4 }
  0x23   : > { %521 = vmatpush.msrb.mxu2 %v176_v26  ;;  %544 = vmatpush.msrb.mxu3 %v177_v27 }
  0x25   : > { %522 = vmatpush.msrb.mxu2 %v160_v28  ;;  %545 = vmatpush.msrb.mxu3 %v161_v29 }
  0x26   : > { %657 = vmatmul.msk.f32.vlgmr.msrb.gmra.mxu0 %vm178_vm0, %v741_v4  ;;  %659 = vmatmul.msk.f32.vlgmr.msrb.gmra.mxu1 %vm178_vm0, %v741_v4 }
  0x27   : > { %475 = vmatpush.msrb.mxu0 %v174_v30  ;;  %498 = vmatpush.msrb.mxu1 %v175_v31 }
  0x29   : > { %476 = vmatpush.msrb.mxu0 %v158_v32  ;;  %499 = vmatpush.msrb.mxu1 %v159_v33 }
  0x2a   : > { %662 = vmatmul.msk.f32.gmra.mxu2 %vm178_vm0, %v766_v17  ;;  %664 = vmatmul.msk.f32.gmra.mxu3 %vm178_vm0, %v766_v17 }
  0x2e   : > { %658 = vmatmul.msk.f32.gmra.mxu0 %vm178_vm0, %v766_v17  ;;  %660 = vmatmul.msk.f32.gmra.mxu1 %vm178_vm0, %v766_v17 }
  0x32   : > { %669 = vmatmul.msk.f32.vlgmr.msra.gmra.mxu2 %vm178_vm0, %v741_v4  ;;  %671 = vmatmul.msk.f32.vlgmr.msra.gmra.mxu3 %vm178_vm0, %v741_v4 }
  0x36   : > { %665 = vmatmul.msk.f32.vlgmr.msra.gmra.mxu0 %vm178_vm0, %v741_v4  ;;  %667 = vmatmul.msk.f32.vlgmr.msra.gmra.mxu1 %vm178_vm0, %v741_v4 }
  0x3a   : > { %670 = vmatmul.msk.f32.gmra.mxu2 %vm178_vm0, %v766_v17  ;;  %672 = vmatmul.msk.f32.gmra.mxu3 %vm178_vm0, %v766_v17 }
  0x3e   : > { %666 = vmatmul.msk.f32.gmra.mxu0 %vm178_vm0, %v766_v17  ;;  %668 = vmatmul.msk.f32.gmra.mxu1 %vm178_vm0, %v766_v17 }
  0x42   : > { %677 = vmatmul.msk.f32.vlgmr.msrb.gmra.mxu2 %vm178_vm0, %v741_v4  ;;  %679 = vmatmul.msk.f32.vlgmr.msrb.gmra.mxu3 %vm178_vm0, %v741_v4 }
  0x46   : > { %673 = vmatmul.msk.f32.vlgmr.msrb.gmra.mxu0 %vm178_vm0, %v741_v4  ;;  %675 = vmatmul.msk.f32.vlgmr.msrb.gmra.mxu1 %vm178_vm0, %v741_v4 }
  0x4a   : > { %678 = vmatmul.msk.f32.gmra.mxu2 %vm178_vm0, %v766_v17  ;;  %680 = vmatmul.msk.f32.gmra.mxu3 %vm178_vm0, %v766_v17 }
  0x4e   : > { %674 = vmatmul.msk.f32.gmra.mxu0 %vm178_vm0, %v766_v17  ;;  %676 = vmatmul.msk.f32.gmra.mxu1 %vm178_vm0, %v766_v17 }
  0x93   : > { %v202_v34 = vpop.f32.mrf.mxu0  ;;  %v225_v35 = vpop.f32.mrf.mxu1 }
  0x94   : > { %553 = vst [vmem:[%s845_s21] sm:$0xff] %v202_v34 }
  0x95   : > { %v248_v36 = vpop.f32.mrf.mxu2  ;;  %v271_v37 = vpop.f32.mrf.mxu3  ;;  %554 = vst [vmem:[%s845_s21 + $0x8] sm:$0xff] %v225_v35 }
  0x96   : > { %555 = vst [vmem:[%s845_s21 + $0x10] sm:$0xff] %v248_v36 }
  0x97   : > { %556 = vst [vmem:[%s845_s21 + $0x18] sm:$0xff] %v271_v37 }
  0x9b   : > { %v205_v38 = vpop.f32.mrf.mxu0  ;;  %v228_v39 = vpop.f32.mrf.mxu1 }
  0x9c   : > { %569 = vst [vmem:[%s845_s21 + $0x80] sm:$0x7f] %v205_v38 }
  0x9d   : > { %v251_v40 = vpop.f32.mrf.mxu2  ;;  %v274_v41 = vpop.f32.mrf.mxu3  ;;  %570 = vst [vmem:[%s845_s21 + $0x88] sm:$0x7f] %v228_v39 }
  0x9e   : > { %571 = vst [vmem:[%s845_s21 + $0x90] sm:$0x7f] %v251_v40 }
  0x9f   : > { %572 = vst [vmem:[%s845_s21 + $0x98] sm:$0x7f] %v274_v41 }
  0xa3   : > { %v294_v42 = vpop.f32.mrf.mxu0  ;;  %v317_v43 = vpop.f32.mrf.mxu1 }
  0xa4   : > { %557 = vst [vmem:[%s845_s21 + $0x20] sm:$0xff] %v294_v42 }
  0xa5   : > { %v340_v44 = vpop.f32.mrf.mxu2  ;;  %v363_v45 = vpop.f32.mrf.mxu3  ;;  %558 = vst [vmem:[%s845_s21 + $0x28] sm:$0xff] %v317_v43 }
  0xa6   : > { %559 = vst [vmem:[%s845_s21 + $0x30] sm:$0xff] %v340_v44 }
  0xa7   : > { %560 = vst [vmem:[%s845_s21 + $0x38] sm:$0xff] %v363_v45 }
  0xab   : > { %v297_v46 = vpop.f32.mrf.mxu0  ;;  %v320_v47 = vpop.f32.mrf.mxu1 }
  0xac   : > { %573 = vst [vmem:[%s845_s21 + $0xa0] sm:$0x7f] %v297_v46 }
  0xad   : > { %v343_v48 = vpop.f32.mrf.mxu2  ;;  %v366_v49 = vpop.f32.mrf.mxu3  ;;  %574 = vst [vmem:[%s845_s21 + $0xa8] sm:$0x7f] %v320_v47 }
  0xae   : > { %575 = vst [vmem:[%s845_s21 + $0xb0] sm:$0x7f] %v343_v48 }
  0xaf   : > { %576 = vst [vmem:[%s845_s21 + $0xb8] sm:$0x7f] %v366_v49 }
  0xb3   : > { %v386_v50 = vpop.f32.mrf.mxu0  ;;  %v409_v51 = vpop.f32.mrf.mxu1 }
  0xb4   : > { %561 = vst [vmem:[%s845_s21 + $0x40] sm:$0xff] %v386_v50 }
  0xb5   : > { %v432_v52 = vpop.f32.mrf.mxu2  ;;  %v455_v53 = vpop.f32.mrf.mxu3  ;;  %562 = vst [vmem:[%s845_s21 + $0x48] sm:$0xff] %v409_v51 }
  0xb6   : > { %563 = vst [vmem:[%s845_s21 + $0x50] sm:$0xff] %v432_v52 }
  0xb7   : > { %564 = vst [vmem:[%s845_s21 + $0x58] sm:$0xff] %v455_v53 }
  0xbb   : > { %v389_v54 = vpop.f32.mrf.mxu0  ;;  %v412_v55 = vpop.f32.mrf.mxu1 }
  0xbc   : > { %577 = vst [vmem:[%s845_s21 + $0xc0] sm:$0x7f] %v389_v54 }
  0xbd   : > { %v435_v56 = vpop.f32.mrf.mxu2  ;;  %v458_v57 = vpop.f32.mrf.mxu3  ;;  %578 = vst [vmem:[%s845_s21 + $0xc8] sm:$0x7f] %v412_v55 }
  0xbe   : > { %579 = vst [vmem:[%s845_s21 + $0xd0] sm:$0x7f] %v435_v56 }
  0xbf   : > { %580 = vst [vmem:[%s845_s21 + $0xd8] sm:$0x7f] %v458_v57 }
  0xc3   : > { %v478_v58 = vpop.f32.mrf.mxu0  ;;  %v501_v59 = vpop.f32.mrf.mxu1 }
  0xc4   : > { %565 = vst [vmem:[%s845_s21 + $0x60] sm:$0xff] %v478_v58 }
  0xc5   : > { %v524_v60 = vpop.f32.mrf.mxu2  ;;  %v547_v61 = vpop.f32.mrf.mxu3  ;;  %566 = vst [vmem:[%s845_s21 + $0x68] sm:$0xff] %v501_v59 }
  0xc6   : > { %567 = vst [vmem:[%s845_s21 + $0x70] sm:$0xff] %v524_v60 }
  0xc7   : > { %568 = vst [vmem:[%s845_s21 + $0x78] sm:$0xff] %v547_v61 }
  0xcb   : > { %v481_v62 = vpop.f32.mrf.mxu0  ;;  %v504_v63 = vpop.f32.mrf.mxu1 }
  0xcc   : > { %581 = vst [vmem:[%s845_s21 + $0xe0] sm:$0x7f] %v481_v62 }
  0xcd   : > { %v527_v0 = vpop.f32.mrf.mxu2  ;;  %v550_v1 = vpop.f32.mrf.mxu3  ;;  %582 = vst [vmem:[%s845_s21 + $0xe8] sm:$0x7f] %v504_v63 }
  0xce   : > { %583 = vst [vmem:[%s845_s21 + $0xf0] sm:$0x7f] %v527_v0 }
  0xcf   : > { %584 = vst [vmem:[%s845_s21 + $0xf8] sm:$0x7f] %v550_v1 }
  0xd0 PF: > { %s12_s9 = sadd.s32 1, %s699_s9  }
  0xd1   : > { %p9_p4 = scmp.ge.s32.totalorder %s12_s9, 4  }
  0xd3   :  { %11 = sbr.rel (!%p9_p4) target bundleno = 1 (0x1), region = 58 }

// kernel: newelppm_forward.16
= control target key start
LH: loop header
LB: loop body
LE: loop exit
PB: predicated region body
PF: predicated region fallthrough
CT: control target
= control target key end

     0   :  { %s378_s12 = smov 0   ;;  %s406_s0 = inlined_call_operand.vmem [shape: f32[2,16], index: 0, kind: input, shape index: {}]   ;;  %s407_s1 = inlined_call_operand.vmem [shape: f32[2,2,16,128], index: 1, kind: input, shape index: {}]   ;;  %s408_s2 = inlined_call_operand.vmem [shape: f32[2,1,16,128], index: 2, kind: input, shape index: {}]   ;;  %s409_s3 = inlined_call_operand.vmem [shape: f32[2,2,2,128], index: 3, kind: output, shape index: {}]  }
   0x1 LB: > { %s321_s13 = sadd.s32 4294967295, %s356_s12   ;;  %p325_p0 = scmp.ge.s32.totalorder %s356_s12, 1  ;;  %s356_s12 = sphi %s378_s12, %s13_s12  }
   0x2   : > { %p147_p1 = scmp.lt.s32.totalorder %s356_s12, 3 }
   0x4   : > { %p148_p2 = pnand %p325_p0, %p147_p1 }
   0x5   : > { %p176_p3 = scmp.lt.s32.totalorder (!%p148_p2), %s321_s13, 1 }
   0x6   : > { %151 = sbr.rel (%p148_p2) target bundleno = 148 (0x94), region = 32 }
   0xb   : > { %s411_s13 = smov (!%p176_p3, %s321_s13), 1  ;;  %v191_v4 = vld [vmem:[%s406_s0] sm:$0x3]  ;;  %vm204_vm0 = vcmask 130048  }
   0xc   : > { %s339_s14 = sshll.u32 %s411_s13, 5  ;;  %s340_s20 = sshll.u32 %s411_s13, 4 }
   0xd   : > { %s180_s17 = scalar_lea.vmem %s407_s1, %s339_s14  ;;  %s185_s23 = scalar_lea.vmem %s408_s2, %s340_s20 }
   0xe   : > { %v203_v0 = vld [vmem:[%s180_s17 + $0x8] sm:$0xff]  ;;  %v334_v1 = vld [vmem:[%s180_s17 + $0x18] sm:$0xff]  ;;  %v202_v2 = vld [vmem:[%s180_s17] sm:$0xff]  ;;  %s341_s24 = sshll.u32 %s411_s13, 2 }
   0xf   : > { %222 = vmatpush.msra.mxu0 %v203_v0  ;;  %246 = vmatpush.msra.mxu1 %v334_v1  ;;  %v333_v3 = vld [vmem:[%s180_s17 + $0x10] sm:$0xff]  ;;  %v192_v5 = vld [vmem:[%s185_s23] sm:$0xff]  ;;  %v193_v6 = vld [vmem:[%s185_s23 + $0x8] sm:$0xff]  ;;  %s190_s27 = scalar_lea.vmem %s409_s3, %s341_s24 }
  0x10   : > { %v194_v7 = vadd.f32 %v193_v6, %v192_v5 }
  0x11   : > { %223 = vmatpush.msra.mxu0 %v202_v2  ;;  %247 = vmatpush.msra.mxu1 %v333_v3 }
  0x12   : > { %332 = vmatmul.msk.f32.vlgmr.msra.gmra.mxu0 %vm204_vm0, %v191_v4  ;;  %335 = vmatmul.msk.f32.vlgmr.msra.gmra.mxu1 %vm204_vm0, %v191_v4  ;;  %v195_v8 = vrot.slane %v194_v7, 4 }
  0x14   : > { %v196_v9 = vadd.f32 %v195_v8, %v194_v7 }
  0x16   : > { %v197_v10 = vrot.slane %v196_v9, 2 }
  0x18   : > { %v198_v11 = vadd.f32 %v197_v10, %v196_v9 }
  0x1a   : > { %v199_v12 = vrot.slane %v198_v11, 1 }
  0x1c   : > { %v200_v13 = vadd.f32 %v199_v12, %v198_v11 }
  0x1e   : > { %v201_v14 = vmul.f32 0.0625, %v200_v13 }
  0x8f   : > { %v225_v15 = vpop.f32.mrf.mxu0  ;;  %v249_v16 = vpop.f32.mrf.mxu1 }
  0x90   : > { %v226_v17 = vadd.f32 %v225_v15, %v201_v14  ;;  %v250_v18 = vadd.f32 %v249_v16, %v201_v14 }
  0x92   : > { %228 = vst [vmem:[%s190_s27] sm:$0x3] %v226_v17 }
  0x93   : > { %336 = vst [vmem:[%s190_s27 + $0x2] sm:$0x3] %v250_v18 }
  0x94 PF: > { %s13_s12 = sadd.s32 1, %s356_s12  }
  0x95   : > { %p10_p4 = scmp.ge.s32.totalorder %s13_s12, 4  }
  0x97   :  { %12 = sbr.rel (!%p10_p4) target bundleno = 1 (0x1), region = 67 }

// kernel: newelppm_forward.19
= control target key start
LH: loop header
LB: loop body
LE: loop exit
PB: predicated region body
PF: predicated region fallthrough
CT: control target
= control target key end

     0   :  { %s374_s12 = smov 0   ;;  %s404_s0 = inlined_call_operand.vmem [shape: f32[2,4,4,128], index: 0, kind: input, shape index: {}]   ;;  %s405_s1 = inlined_call_operand.vmem [shape: f32[9,128], index: 1, kind: input, shape index: {}]   ;;  %s406_s2 = inlined_call_operand.vmem [shape: f32[1,128], index: 2, kind: input, shape index: {}]   ;;  %s407_s3 = inlined_call_operand.vmem [shape: f32[2,2,2,128], index: 3, kind: output, shape index: {}]  }
   0x1 LB: > { %s323_s13 = sadd.s32 4294967295, %s352_s12   ;;  %p327_p0 = scmp.ge.s32.totalorder %s352_s12, 1  ;;  %s352_s12 = sphi %s374_s12, %s13_s12  }
   0x2   : > { %p137_p1 = scmp.lt.s32.totalorder %s352_s12, 3 }
   0x4   : > { %p138_p2 = pnand %p327_p0, %p137_p1 }
   0x5   : > { %p161_p3 = scmp.lt.s32.totalorder (!%p138_p2), %s323_s13, 1 }
   0x6   : > { %141 = sbr.rel (%p138_p2) target bundleno = 41 (0x29), region = 32 }
   0xb   : > { %v175_v0 = vld [vmem:[%s405_s1] sm:$0xff]  ;;  %s409_s13 = smov (!%p161_p3, %s323_s13), 1  ;;  %v344_v27 = vld [vmem:[%s405_s1 + $0x8] ss:$0 sm:$0xff] }
   0xc   : > { %v177_v1 = vperm.slane %v175_v0, 0  ;;  %v182_v2 = vperm.slane %v175_v0, 1  ;;  %s334_s16 = sshll.u32 %s409_s13, 4  ;;  %v193_v3 = vperm.slane %v175_v0, 2  ;;  %v209_v4 = vperm.slane %v175_v0, 4  ;;  %s335_s24 = sshll.u32 %s409_s13, 2 }
   0xd   : > { %s165_s19 = scalar_lea.vmem %s404_s0, %s334_s16  ;;  %v204_v7 = vperm.slane %v175_v0, 3  ;;  %v220_v8 = vperm.slane %v175_v0, 5  ;;  %v236_v22 = vperm.slane %v175_v0, 7  ;;  %v231_v26 = vperm.slane %v175_v0, 6  ;;  %v345_v57 = vld [vmem:[%s406_s2] ss:$0 sm:$0xff]  ;;  %s170_s27 = scalar_lea.vmem %s407_s3, %s335_s24 }
   0xe   : > { %v171_v5 = vld [vmem:[%s165_s19] sm:$0xf]  ;;  %v172_v6 = vld [vmem:[%s165_s19 + $0x4] sm:$0xf]  ;;  %v173_v15 = vld [vmem:[%s165_s19 + $0x8] sm:$0xf] }
   0xf   : > { %v178_v9 = vmul.f32 %v177_v1, %v171_v5  ;;  %v179_v10 = vmul.f32 %v177_v1, %v172_v6  ;;  %v183_v11 = vmul.f32 %v182_v2, %v171_v5  ;;  %v184_v12 = vmul.f32 %v182_v2, %v172_v6  ;;  %v174_v28 = vld [vmem:[%s165_s19 + $0xc] sm:$0xf] }
  0x10   : > { %v194_v13 = vmul.f32 %v193_v3, %v171_v5  ;;  %v195_v14 = vmul.f32 %v193_v3, %v172_v6  ;;  %v210_v18 = vmul.f32 %v209_v4, %v172_v6  ;;  %v221_v21 = vmul.f32 %v220_v8, %v172_v6 }
  0x11   : > { %v187_v16 = vrot.slane %v183_v11, 1  ;;  %v188_v17 = vrot.slane %v184_v12, 1  ;;  %v205_v25 = vmul.f32 %v204_v7, %v172_v6  ;;  %v206_v29 = vmul.f32 %v204_v7, %v173_v15 }
  0x12   : > { %v198_v19 = vrot.slane %v194_v13, 2  ;;  %v199_v20 = vrot.slane %v195_v14, 2  ;;  %v211_v30 = vmul.f32 %v209_v4, %v173_v15  ;;  %v222_v31 = vmul.f32 %v220_v8, %v173_v15 }
  0x13   : > { %v191_v23 = vadd.f32 %v187_v16, %v178_v9  ;;  %v192_v24 = vadd.f32 %v188_v17, %v179_v10  ;;  %v214_v33 = vrot.slane %v210_v18, 1  ;;  %v225_v35 = vrot.slane %v221_v21, 2 }
  0x14   : > { %v237_v36 = vmul.f32 %v236_v22, %v173_v15  ;;  %v215_v37 = vrot.slane %v211_v30, 1  ;;  %v226_v40 = vrot.slane %v222_v31, 2  ;;  %v238_v41 = vmul.f32 %v236_v22, %v174_v28 }
  0x15   : > { %v202_v32 = vadd.f32 %v198_v19, %v191_v23  ;;  %v203_v34 = vadd.f32 %v199_v20, %v192_v24  ;;  %v232_v42 = vmul.f32 %v231_v26, %v173_v15  ;;  %v248_v43 = vmul.f32 %v344_v27, %v173_v15 }
  0x16   : > { %v233_v46 = vmul.f32 %v231_v26, %v174_v28  ;;  %v249_v47 = vmul.f32 %v344_v27, %v174_v28  ;;  %v241_v49 = vrot.slane %v237_v36, 1  ;;  %v242_v51 = vrot.slane %v238_v41, 1 }
  0x17   : > { %v207_v38 = vadd.f32 %v205_v25, %v202_v32  ;;  %v208_v39 = vadd.f32 %v206_v29, %v203_v34  ;;  %v252_v53 = vrot.slane %v248_v43, 2 }
  0x18   : > { %v253_v55 = vrot.slane %v249_v47, 2 }
  0x19   : > { %v218_v44 = vadd.f32 %v214_v33, %v207_v38  ;;  %v219_v45 = vadd.f32 %v215_v37, %v208_v39 }
  0x1b   : > { %v229_v48 = vadd.f32 %v225_v35, %v218_v44  ;;  %v230_v50 = vadd.f32 %v226_v40, %v219_v45 }
  0x1d   : > { %v234_v52 = vadd.f32 %v232_v42, %v229_v48  ;;  %v235_v54 = vadd.f32 %v233_v46, %v230_v50 }
  0x1f   : > { %v245_v56 = vadd.f32 %v241_v49, %v234_v52  ;;  %v246_v58 = vadd.f32 %v242_v51, %v235_v54 }
  0x21   : > { %v256_v59 = vadd.f32 %v252_v53, %v245_v56  ;;  %v257_v60 = vadd.f32 %v253_v55, %v246_v58 }
  0x23   : > { %v262_v61 = vadd.f32 %v345_v57, %v256_v59  ;;  %v263_v62 = vadd.f32 %v345_v57, %v257_v60 }
  0x25   : > { %v264_v63 = vmax.f32 %v262_v61, 0.0  ;;  %v265_v0 = vmax.f32 %v263_v62, 0.0 }
  0x27   : > { %266 = vst [vmem:[%s170_s27] sm:$0x3] %v264_v63 }
  0x28   : > { %267 = vst [vmem:[%s170_s27 + $0x2] sm:$0x3] %v265_v0 }
  0x29 PF: > { %s13_s12 = sadd.s32 1, %s352_s12  }
  0x2a   : > { %p10_p4 = scmp.ge.s32.totalorder %s13_s12, 4  }
  0x2c   :  { %12 = sbr.rel (!%p10_p4) target bundleno = 1 (0x1), region = 62 }

// kernel: newelppm_forward.20
= control target key start
LH: loop header
LB: loop body
LE: loop exit
PB: predicated region body
PF: predicated region fallthrough
CT: control target
= control target key end

     0   :  { %s309_s9 = smov 0   ;;  %s329_s0 = inlined_call_operand.vmem [shape: f32[4,2], index: 0, kind: input, shape index: {}]   ;;  %s330_s1 = inlined_call_operand.vmem [shape: f32[2,2,256], index: 1, kind: input, shape index: {}]   ;;  %s331_s2 = inlined_call_operand.vmem [shape: f32[2,4,256], index: 2, kind: output, shape index: {}]  }
   0x1 LB: > { %s261_s10 = sadd.s32 4294967295, %s292_s9   ;;  %p265_p0 = scmp.ge.s32.totalorder %s292_s9, 1  ;;  %s292_s9 = sphi %s309_s9, %s12_s9  }
   0x2   : > { %p112_p1 = scmp.lt.s32.totalorder %s292_s9, 3 }
   0x4   : > { %p113_p2 = pnand %p265_p0, %p112_p1 }
   0x5   : > { %p134_p3 = scmp.lt.s32.totalorder (!%p113_p2), %s261_s10, 1 }
   0x6   : > { %116 = sbr.rel (%p113_p2) target bundleno = 154 (0x9a), region = 28 }
   0xb   : > { %s333_s10 = smov (!%p134_p3, %s261_s10), 1  ;;  %vm154_vm0 = vcmask 1041408   ;;  %v144_v1 = vld [vmem:[%s329_s0] sm:$0xf]  ;;  %vm150_vm1 = vcmask 15360   ;;  %vm202_vm2 = vcmask 1043456  }
   0xc   : > { %s276_s11 = sshll.u32 %s333_s10, 2  ;;  %s277_s17 = sshll.u32 %s333_s10, 3 }
   0xd   : > { %s138_s14 = scalar_lea.vmem %s330_s1, %s276_s11  ;;  %s143_s20 = scalar_lea.vmem %s331_s2, %s277_s17 }
   0xe   : > { %v145_v0 = vld [vmem:[%s138_s14] sm:$0xf] }
   0xf   : > { %147 = vst [vmem:[#allocation1] ss:$4 sm:$0xff] %v145_v0 }
  0x16   : > { %v149_v2 = vld.sshfl [vmem:[#allocation1 + $0x8] sm:$0xff pattern:$0x73625140]  ;;  %v148_v3 = vld.sshfl [vmem:[#allocation1] sm:$0xff pattern:$0x73625140] }
  0x17   : > { %272 = vmatpush.msk.msra.mxu1 %vm154_vm0, %v149_v2  ;;  %270 = vmatpush.msk.msra.mxu0 %vm154_vm0, %v148_v3 }
  0x18   : > { %273 = vmatmul.msk.f32.vlgmr.msra.gmra.mxu1 %vm150_vm1, %v144_v1  ;;  %271 = vmatmul.msk.f32.vlgmr.msra.gmra.mxu0 %vm150_vm1, %v144_v1 }
  0x95   : > { %v196_v4 = vpop.f32.mrf.mxu1  ;;  %v176_v5 = vpop.f32.mrf.mxu0 }
  0x96   : > { %v201_v6 = vrot.slane %v196_v4, 4 }
  0x98   : > { %v203_v7 = vsel %vm202_vm2, %v176_v5, %v201_v6 }
  0x99   : > { %205 = vst [vmem:[%s143_s20] sm:$0xff] %v203_v7 }
  0x9a PF: > { %s12_s9 = sadd.s32 1, %s292_s9  }
  0x9b   : > { %p9_p4 = scmp.ge.s32.totalorder %s12_s9, 4  }
  0x9d   :  { %11 = sbr.rel (!%p9_p4) target bundleno = 1 (0x1), region = 58 }

// kernel: newelppm_forward.17
= control target key start
LH: loop header
LB: loop body
LE: loop exit
PB: predicated region body
PF: predicated region fallthrough
CT: control target
= control target key end

     0   :  { %s359_s9 = smov 0   ;;  %s379_s0 = inlined_call_operand.vmem [shape: f32[4,16], index: 0, kind: input, shape index: {}]   ;;  %s380_s1 = inlined_call_operand.vmem [shape: f32[2,4,16,128], index: 1, kind: input, shape index: {}]   ;;  %s381_s2 = inlined_call_operand.vmem [shape: f32[2,4,4,128], index: 2, kind: output, shape index: {}]  }
   0x1 LB: > { %s302_s10 = sadd.s32 4294967295, %s342_s9   ;;  %p306_p0 = scmp.ge.s32.totalorder %s342_s9, 1  ;;  %s342_s9 = sphi %s359_s9, %s12_s9  }
   0x2   : > { %p112_p1 = scmp.lt.s32.totalorder %s342_s9, 3 }
   0x4   : > { %p113_p2 = pnand %p306_p0, %p112_p1 }
   0x5   : > { %p134_p3 = scmp.lt.s32.totalorder (!%p113_p2), %s302_s10, 1 }
   0x6   : > { %116 = sbr.rel (%p113_p2) target bundleno = 152 (0x98), region = 28 }
   0xb   : > { %s383_s10 = smov (!%p134_p3, %s302_s10), 1  ;;  %v144_v0 = vld [vmem:[%s379_s0] sm:$0xf]  ;;  %vm147_vm0 = vcmask 130048  }
   0xc   : > { %s326_s11 = sshll.u32 %s383_s10, 6  ;;  %s327_s17 = sshll.u32 %s383_s10, 4 }
   0xd   : > { %s138_s14 = scalar_lea.vmem %s380_s1, %s326_s11  ;;  %s143_s20 = scalar_lea.vmem %s381_s2, %s327_s17 }
   0xe   : > { %v317_v1 = vld [vmem:[%s138_s14 + $0x28] sm:$0xff]  ;;  %v321_v2 = vld [vmem:[%s138_s14 + $0x38] sm:$0xff]  ;;  %v316_v3 = vld [vmem:[%s138_s14 + $0x20] sm:$0xff] }
   0xf   : > { %214 = vmatpush.msra.mxu2 %v317_v1  ;;  %239 = vmatpush.msra.mxu3 %v321_v2  ;;  %v320_v4 = vld [vmem:[%s138_s14 + $0x30] sm:$0xff]  ;;  %v146_v5 = vld [vmem:[%s138_s14 + $0x8] sm:$0xff]  ;;  %v313_v6 = vld [vmem:[%s138_s14 + $0x18] sm:$0xff] }
  0x10   : > { %165 = vmatpush.msra.mxu0 %v146_v5  ;;  %189 = vmatpush.msra.mxu1 %v313_v6  ;;  %v145_v7 = vld [vmem:[%s138_s14] sm:$0xff]  ;;  %v312_v8 = vld [vmem:[%s138_s14 + $0x10] sm:$0xff] }
  0x11   : > { %215 = vmatpush.msra.mxu2 %v316_v3  ;;  %240 = vmatpush.msra.mxu3 %v320_v4 }
  0x12   : > { %318 = vmatmul.msk.f32.vlgmr.msra.gmra.mxu2 %vm147_vm0, %v144_v0  ;;  %322 = vmatmul.msk.f32.vlgmr.msra.gmra.mxu3 %vm147_vm0, %v144_v0 }
  0x13   : > { %166 = vmatpush.msra.mxu0 %v145_v7  ;;  %190 = vmatpush.msra.mxu1 %v312_v8 }
  0x14   : > { %311 = vmatmul.msk.f32.vlgmr.msra.gmra.mxu0 %vm147_vm0, %v144_v0  ;;  %314 = vmatmul.msk.f32.vlgmr.msra.gmra.mxu1 %vm147_vm0, %v144_v0 }
  0x91   : > { %v168_v9 = vpop.f32.mrf.mxu0  ;;  %v192_v10 = vpop.f32.mrf.mxu1 }
  0x92   : > { %171 = vst [vmem:[%s143_s20] sm:$0xf] %v168_v9 }
  0x93   : > { %315 = vst [vmem:[%s143_s20 + $0x4] sm:$0xf] %v192_v10 }
  0x95   : > { %v217_v11 = vpop.f32.mrf.mxu2  ;;  %v242_v12 = vpop.f32.mrf.mxu3 }
  0x96   : > { %319 = vst [vmem:[%s143_s20 + $0x8] sm:$0xf] %v217_v11 }
  0x97   : > { %323 = vst [vmem:[%s143_s20 + $0xc] sm:$0xf] %v242_v12 }
  0x98 PF: > { %s12_s9 = sadd.s32 1, %s342_s9  }
  0x99   : > { %p9_p4 = scmp.ge.s32.totalorder %s12_s9, 4  }
  0x9b   :  { %11 = sbr.rel (!%p9_p4) target bundleno = 1 (0x1), region = 64 }

// kernel: newelppm_forward.21
= control target key start
LH: loop header
LB: loop body
LE: loop exit
PB: predicated region body
PF: predicated region fallthrough
CT: control target
= control target key end

     0   :  { %s446_s12 = smov 0   ;;  %s469_s0 = inlined_call_operand.vmem [shape: f32[4,2], index: 0, kind: input, shape index: {}]   ;;  %s470_s1 = inlined_call_operand.vmem [shape: f32[2,4,2,128], index: 1, kind: input, shape index: {}]   ;;  %s471_s2 = inlined_call_operand.vmem [shape: f32[2,4,4,128], index: 2, kind: input, shape index: {}]   ;;  %s472_s3 = inlined_call_operand.vmem [shape: f32[2,4,4,128], index: 3, kind: output, shape index: {}]  }
   0x1 LB: > { %s377_s13 = sadd.s32 4294967295, %s424_s12   ;;  %p381_p0 = scmp.ge.s32.totalorder %s424_s12, 1  ;;  %s424_s12 = sphi %s446_s12, %s13_s12  }
   0x2   : > { %p147_p1 = scmp.lt.s32.totalorder %s424_s12, 3 }
   0x4   : > { %p148_p2 = pnand %p381_p0, %p147_p1 }
   0x5   : > { %p176_p3 = scmp.lt.s32.totalorder (!%p148_p2), %s377_s13, 1 }
   0x6   : > { %151 = sbr.rel (%p148_p2) target bundleno = 152 (0x98), region = 32 }
   0xb   : > { %s474_s13 = smov (!%p176_p3, %s377_s13), 1  ;;  %vm198_vm0 = vcmask 1041408   ;;  %v191_v0 = vld [vmem:[%s469_s0] sm:$0xf]  ;;  %vm194_vm1 = vcmask 15360  }
   0xc   : > { %s407_s14 = sshll.u32 %s474_s13, 3  ;;  %s408_s20 = sshll.u32 %s474_s13, 4 }
   0xd   : > { %s180_s17 = scalar_lea.vmem %s470_s1, %s407_s14  ;;  %s185_s23 = scalar_lea.vmem %s471_s2, %s408_s20 }
   0xe   : > { %v395_v1 = vld [vmem:[%s180_s17 + $0x4] sm:$0x3]  ;;  %v400_v2 = vld [vmem:[%s180_s17 + $0x6] sm:$0x3]  ;;  %v192_v3 = vld [vmem:[%s180_s17] sm:$0x3]  ;;  %s190_s26 = scalar_lea.vmem %s472_s3, %s408_s20 }
   0xf   : > { %397 = vmatpush.msk.msra.mxu2 %vm198_vm0, %v395_v1  ;;  %402 = vmatpush.msk.msra.mxu3 %vm198_vm0, %v400_v2  ;;  %v390_v4 = vld [vmem:[%s180_s17 + $0x2] sm:$0x3]  ;;  %v391_v6 = vld [vmem:[%s185_s23 + $0x4] sm:$0xf]  ;;  %v396_v11 = vld [vmem:[%s185_s23 + $0x8] sm:$0xf] }
  0x10   : > { %398 = vmatmul.msk.f32.vlgmr.msra.gmra.mxu2 %vm194_vm1, %v191_v0  ;;  %403 = vmatmul.msk.f32.vlgmr.msra.gmra.mxu3 %vm194_vm1, %v191_v0  ;;  %v193_v5 = vld [vmem:[%s185_s23] sm:$0xf]  ;;  %v401_v12 = vld [vmem:[%s185_s23 + $0xc] sm:$0xf] }
  0x11   : > { %388 = vmatpush.msk.msra.mxu0 %vm198_vm0, %v192_v3  ;;  %392 = vmatpush.msk.msra.mxu1 %vm198_vm0, %v390_v4 }
  0x12   : > { %389 = vmatmul.msk.f32.vlgmr.msra.gmra.mxu0 %vm194_vm1, %v191_v0  ;;  %393 = vmatmul.msk.f32.vlgmr.msra.gmra.mxu1 %vm194_vm1, %v191_v0 }
  0x8f   : > { %v219_v7 = vpop.f32.mrf.mxu0  ;;  %v247_v8 = vpop.f32.mrf.mxu1 }
  0x90   : > { %v220_v9 = vadd.f32 %v219_v7, %v193_v5  ;;  %v248_v10 = vadd.f32 %v391_v6, %v247_v8 }
  0x92   : > { %222 = vst [vmem:[%s190_s26] sm:$0xf] %v220_v9 }
  0x93   : > { %394 = vst [vmem:[%s190_s26 + $0x4] sm:$0xf] %v248_v10  ;;  %v276_v13 = vpop.f32.mrf.mxu2  ;;  %v305_v14 = vpop.f32.mrf.mxu3 }
  0x94   : > { %v277_v15 = vadd.f32 %v396_v11, %v276_v13  ;;  %v306_v16 = vadd.f32 %v401_v12, %v305_v14 }
  0x96   : > { %399 = vst [vmem:[%s190_s26 + $0x8] sm:$0xf] %v277_v15 }
  0x97   : > { %404 = vst [vmem:[%s190_s26 + $0xc] sm:$0xf] %v306_v16 }
  0x98 PF: > { %s13_s12 = sadd.s32 1, %s424_s12  }
  0x99   : > { %p10_p4 = scmp.ge.s32.totalorder %s13_s12, 4  }
  0x9b   :  { %12 = sbr.rel (!%p10_p4) target bundleno = 1 (0x1), region = 74 }

// kernel: newelppm_forward.18
= control target key start
LH: loop header
LB: loop body
LE: loop exit
PB: predicated region body
PF: predicated region fallthrough
CT: control target
= control target key end

     0   :  { %s475_s9 = smov 0   ;;  %s525_s0 = inlined_call_operand.vmem [shape: f32[8,16], index: 0, kind: input, shape index: {}]   ;;  %s526_s1 = inlined_call_operand.vmem [shape: f32[2,8,16,128], index: 1, kind: input, shape index: {}]   ;;  %s527_s2 = inlined_call_operand.vmem [shape: f32[2,8,8,128], index: 2, kind: output, shape index: {}]  }
   0x1 LB: > { %s402_s10 = sadd.s32 4294967295, %s458_s9   ;;  %p406_p0 = scmp.ge.s32.totalorder %s458_s9, 1  ;;  %s458_s9 = sphi %s475_s9, %s12_s9  }
   0x2   : > { %p112_p1 = scmp.lt.s32.totalorder %s458_s9, 3 }
   0x4   : > { %p113_p2 = pnand %p406_p0, %p112_p1 }
   0x5   : > { %p134_p3 = scmp.lt.s32.totalorder (!%p113_p2), %s402_s10, 1 }
   0x6   : > { %116 = sbr.rel (%p113_p2) target bundleno = 161 (0xa1), region = 28 }
   0xb   : > { %s529_s10 = smov (!%p134_p3, %s402_s10), 1  ;;  %v144_v4 = vld [vmem:[%s525_s0] sm:$0xff]  ;;  %vm147_vm0 = vcmask 130048  }
   0xc   : > { %s442_s11 = sshll.u32 %s529_s10, 7  ;;  %s443_s17 = sshll.u32 %s529_s10, 6 }
   0xd   : > { %s489_s14 = scalar_lea.vmem %s526_s1, %s442_s11  ;;  %s143_s20 = scalar_lea.vmem %s527_s2, %s443_s17 }
   0xe   : > { %v417_v0 = vld [vmem:[%s489_s14 + $0x28] sm:$0xff]  ;;  %v421_v1 = vld [vmem:[%s489_s14 + $0x38] sm:$0xff]  ;;  %v416_v2 = vld [vmem:[%s489_s14 + $0x20] sm:$0xff] }
   0xf   : > { %214 = vmatpush.msra.mxu2 %v417_v0  ;;  %239 = vmatpush.msra.mxu3 %v421_v1  ;;  %v420_v3 = vld [vmem:[%s489_s14 + $0x30] sm:$0xff]  ;;  %v433_v5 = vld [vmem:[%s489_s14 + $0x68] sm:$0xff]  ;;  %v437_v6 = vld [vmem:[%s489_s14 + $0x78] sm:$0xff] }
  0x10   : > { %v146_v7 = vld [vmem:[%s489_s14 + $0x8] sm:$0xff]  ;;  %v413_v8 = vld [vmem:[%s489_s14 + $0x18] sm:$0xff]  ;;  %v432_v9 = vld [vmem:[%s489_s14 + $0x60] sm:$0xff] }
  0x11   : > { %215 = vmatpush.msra.mxu2 %v416_v2  ;;  %240 = vmatpush.msra.mxu3 %v420_v3  ;;  %v436_v10 = vld [vmem:[%s489_s14 + $0x70] sm:$0xff]  ;;  %v145_v11 = vld [vmem:[%s489_s14] sm:$0xff]  ;;  %v425_v13 = vld [vmem:[%s489_s14 + $0x48] sm:$0xff] }
  0x12   : > { %418 = vmatmul.msk.f32.vlgmr.msra.gmra.mxu2 %vm147_vm0, %v144_v4  ;;  %422 = vmatmul.msk.f32.vlgmr.msra.gmra.mxu3 %vm147_vm0, %v144_v4  ;;  %v412_v12 = vld [vmem:[%s489_s14 + $0x10] sm:$0xff]  ;;  %v429_v14 = vld [vmem:[%s489_s14 + $0x58] sm:$0xff]  ;;  %v424_v15 = vld [vmem:[%s489_s14 + $0x40] sm:$0xff] }
  0x13   : > { %314 = vmatpush.msrb.mxu2 %v433_v5  ;;  %339 = vmatpush.msrb.mxu3 %v437_v6  ;;  %v428_v16 = vld [vmem:[%s489_s14 + $0x50] sm:$0xff] }
  0x14   : > { %165 = vmatpush.msra.mxu0 %v146_v7  ;;  %189 = vmatpush.msra.mxu1 %v413_v8 }
  0x15   : > { %315 = vmatpush.msrb.mxu2 %v432_v9  ;;  %340 = vmatpush.msrb.mxu3 %v436_v10 }
  0x16   : > { %166 = vmatpush.msra.mxu0 %v145_v11  ;;  %190 = vmatpush.msra.mxu1 %v412_v12 }
  0x17   : > { %411 = vmatmul.msk.f32.vlgmr.msra.gmra.mxu0 %vm147_vm0, %v144_v4  ;;  %414 = vmatmul.msk.f32.vlgmr.msra.gmra.mxu1 %vm147_vm0, %v144_v4 }
  0x18   : > { %264 = vmatpush.msrb.mxu0 %v425_v13  ;;  %289 = vmatpush.msrb.mxu1 %v429_v14 }
  0x1a   : > { %434 = vmatmul.msk.f32.vlgmr.msrb.gmra.mxu2 %vm147_vm0, %v144_v4  ;;  %438 = vmatmul.msk.f32.vlgmr.msrb.gmra.mxu3 %vm147_vm0, %v144_v4 }
  0x1b   : > { %265 = vmatpush.msrb.mxu0 %v424_v15  ;;  %290 = vmatpush.msrb.mxu1 %v428_v16 }
  0x1f   : > { %426 = vmatmul.msk.f32.vlgmr.msrb.gmra.mxu0 %vm147_vm0, %v144_v4  ;;  %430 = vmatmul.msk.f32.vlgmr.msrb.gmra.mxu1 %vm147_vm0, %v144_v4 }
  0x94   : > { %v168_v17 = vpop.f32.mrf.mxu0  ;;  %v192_v18 = vpop.f32.mrf.mxu1 }
  0x95   : > { %171 = vst [vmem:[%s143_s20] sm:$0xff] %v168_v17  ;;  %v217_v19 = vpop.f32.mrf.mxu2  ;;  %v242_v20 = vpop.f32.mrf.mxu3 }
  0x96   : > { %415 = vst [vmem:[%s143_s20 + $0x8] sm:$0xff] %v192_v18 }
  0x97   : > { %419 = vst [vmem:[%s143_s20 + $0x10] sm:$0xff] %v217_v19 }
  0x98   : > { %423 = vst [vmem:[%s143_s20 + $0x18] sm:$0xff] %v242_v20 }
  0x9c   : > { %v267_v21 = vpop.f32.mrf.mxu0  ;;  %v292_v22 = vpop.f32.mrf.mxu1 }
  0x9d   : > { %427 = vst [vmem:[%s143_s20 + $0x20] sm:$0xff] %v267_v21  ;;  %v317_v23 = vpop.f32.mrf.mxu2  ;;  %v342_v24 = vpop.f32.mrf.mxu3 }
  0x9e   : > { %431 = vst [vmem:[%s143_s20 + $0x28] sm:$0xff] %v292_v22 }
  0x9f   : > { %435 = vst [vmem:[%s143_s20 + $0x30] sm:$0xff] %v317_v23 }
  0xa0   : > { %439 = vst [vmem:[%s143_s20 + $0x38] sm:$0xff] %v342_v24 }
  0xa1 PF: > { %s12_s9 = sadd.s32 1, %s458_s9  }
  0xa2   : > { %p9_p4 = scmp.ge.s32.totalorder %s12_s9, 4  }
  0xa4   :  { %11 = sbr.rel (!%p9_p4) target bundleno = 1 (0x1), region = 72 }

// kernel: newelppm_forward.22
= control target key start
LH: loop header
LB: loop body
LE: loop exit
PB: predicated region body
PF: predicated region fallthrough
CT: control target
= control target key end

     0   :  { %s453_s12 = smov 0   ;;  %s545_s0 = inlined_call_operand.vmem [shape: f32[2,6,6,128], index: 0, kind: input, shape index: {}]   ;;  %s546_s1 = inlined_call_operand.vmem [shape: f32[9,128], index: 1, kind: input, shape index: {}]   ;;  %s547_s2 = inlined_call_operand.vmem [shape: f32[1,128], index: 2, kind: input, shape index: {}]   ;;  %s548_s3 = inlined_call_operand.vmem [shape: f32[2,4,4,128], index: 3, kind: output, shape index: {}]  }
   0x1 LB: > { %s403_s13 = sadd.s32 4294967295, %s431_s12   ;;  %p407_p0 = scmp.ge.s32.totalorder %s431_s12, 1  ;;  %s431_s12 = sphi %s453_s12, %s13_s12  }
   0x2   : > { %p137_p1 = scmp.lt.s32.totalorder %s431_s12, 3 }
   0x4   : > { %p138_p2 = pnand %p407_p0, %p137_p1 }
   0x5   : > { %p161_p3 = scmp.lt.s32.totalorder (!%p138_p2), %s403_s13, 1 }
   0x6   : > { %141 = sbr.rel (%p138_p2) target bundleno = 53 (0x35), region = 32 }
   0xb   : > { %v177_v0 = vld [vmem:[%s546_s1] sm:$0xff]  ;;  %s550_s13 = smov (!%p161_p3, %s403_s13), 1  ;;  %v494_v13 = vld [vmem:[%s546_s1 + $0x8] ss:$0 sm:$0xff] }
   0xc   : > { %s414_s16 = smul.u32 48, %s550_s13  ;;  %v467_v1 = vperm.slane %v177_v0, 0  ;;  %v469_v2 = vperm.slane %v177_v0, 1  ;;  %v471_v3 = vperm.slane %v177_v0, 2  ;;  %v473_v4 = vperm.slane %v177_v0, 4  ;;  %s413_s24 = sshll.u32 %s550_s13, 4 }
   0xd   : > { %v480_v5 = vperm.slane %v177_v0, 5  ;;  %v482_v6 = vperm.slane %v177_v0, 7  ;;  %v489_v12 = vperm.slane %v177_v0, 3  ;;  %v498_v16 = vperm.slane %v177_v0, 6  ;;  %s170_s27 = scalar_lea.vmem %s548_s3, %s413_s24 }
   0xe   : > { %s478_s19 = scalar_lea.vmem %s545_s0, %s414_s16 }
   0xf   : > { %v171_v7 = vld [vmem:[%s478_s19] sm:$0x3f]  ;;  %v172_v8 = vld [vmem:[%s478_s19 + $0x8] sm:$0x3f]  ;;  %v173_v14 = vld [vmem:[%s478_s19 + $0x10] sm:$0x3f] }
  0x10   : > { %v180_v9 = vmul.f32 %v467_v1, %v171_v7  ;;  %v189_v10 = vmul.f32 %v469_v2, %v171_v7  ;;  %v210_v11 = vmul.f32 %v471_v3, %v171_v7  ;;  %v240_v15 = vmul.f32 %v473_v4, %v172_v8  ;;  %v174_v31 = vld [vmem:[%s478_s19 + $0x18] sm:$0x3f]  ;;  %v175_v57 = vld [vmem:[%s478_s19 + $0x20] sm:$0x3f] }
  0x11   : > { %v261_v19 = vmul.f32 %v480_v5, %v172_v8  ;;  %v291_v20 = vmul.f32 %v482_v6, %v173_v14  ;;  %v181_v21 = vmul.f32 %v467_v1, %v172_v8  ;;  %v190_v22 = vmul.f32 %v469_v2, %v172_v8 }
  0x12   : > { %v197_v17 = vrot.slane %v189_v10, 1  ;;  %v218_v18 = vrot.slane %v210_v11, 2  ;;  %v231_v24 = vmul.f32 %v489_v12, %v172_v8  ;;  %v312_v25 = vmul.f32 %v494_v13, %v173_v14 }
  0x13   : > { %v211_v26 = vmul.f32 %v471_v3, %v172_v8  ;;  %v248_v27 = vrot.slane %v240_v15, 1  ;;  %v282_v28 = vmul.f32 %v498_v16, %v173_v14  ;;  %v198_v29 = vrot.slane %v190_v22, 1 }
  0x14   : > { %v205_v23 = vadd.f32 %v197_v17, %v180_v9  ;;  %v241_v30 = vmul.f32 %v473_v4, %v173_v14  ;;  %v269_v33 = vrot.slane %v261_v19, 2  ;;  %v299_v34 = vrot.slane %v291_v20, 1 }
  0x15   : > { %v219_v35 = vrot.slane %v211_v26, 2  ;;  %v206_v36 = vadd.f32 %v198_v29, %v181_v21  ;;  %v232_v37 = vmul.f32 %v489_v12, %v173_v14  ;;  %v262_v38 = vmul.f32 %v480_v5, %v173_v14 }
  0x16   : > { %v226_v32 = vadd.f32 %v218_v18, %v205_v23  ;;  %v292_v39 = vmul.f32 %v482_v6, %v174_v31  ;;  %v320_v41 = vrot.slane %v312_v25, 2  ;;  %v182_v42 = vmul.f32 %v467_v1, %v173_v14 }
  0x17   : > { %v191_v43 = vmul.f32 %v469_v2, %v173_v14  ;;  %v227_v44 = vadd.f32 %v219_v35, %v206_v36  ;;  %v249_v45 = vrot.slane %v241_v30, 1  ;;  %v313_v46 = vmul.f32 %v494_v13, %v174_v31 }
  0x18   : > { %v235_v40 = vadd.f32 %v231_v24, %v226_v32  ;;  %v212_v47 = vmul.f32 %v471_v3, %v173_v14  ;;  %v283_v49 = vmul.f32 %v498_v16, %v174_v31  ;;  %v242_v51 = vmul.f32 %v473_v4, %v174_v31 }
  0x19   : > { %v199_v50 = vrot.slane %v191_v43, 1  ;;  %v236_v52 = vadd.f32 %v232_v37, %v227_v44  ;;  %v270_v53 = vrot.slane %v262_v38, 2  ;;  %v300_v54 = vrot.slane %v292_v39, 1 }
  0x1a   : > { %v256_v48 = vadd.f32 %v248_v27, %v235_v40  ;;  %v220_v55 = vrot.slane %v212_v47, 2  ;;  %v233_v59 = vmul.f32 %v489_v12, %v174_v31  ;;  %v263_v60 = vmul.f32 %v480_v5, %v174_v31  ;;  %v176_v27 = vld [vmem:[%s478_s19 + $0x28] sm:$0x3f] }
  0x1b   : > { %v207_v58 = vadd.f32 %v199_v50, %v182_v42  ;;  %v257_v61 = vadd.f32 %v249_v45, %v236_v52  ;;  %v321_v62 = vrot.slane %v313_v46, 2  ;;  %v183_v63 = vmul.f32 %v467_v1, %v174_v31  ;;  %v424_v1 = vld [vmem:[%s547_s2] ss:$0 sm:$0xff] }
  0x1c   : > { %v277_v56 = vadd.f32 %v269_v33, %v256_v48  ;;  %v192_v0 = vmul.f32 %v469_v2, %v174_v31  ;;  %v250_v9 = vrot.slane %v242_v51, 1  ;;  %v213_v10 = vmul.f32 %v471_v3, %v174_v31 }
  0x1d   : > { %v228_v8 = vadd.f32 %v220_v55, %v207_v58  ;;  %v278_v11 = vadd.f32 %v270_v53, %v257_v61  ;;  %v293_v14 = vmul.f32 %v482_v6, %v175_v57  ;;  %v243_v17 = vmul.f32 %v473_v4, %v175_v57 }
  0x1e   : > { %v286_v7 = vadd.f32 %v282_v28, %v277_v56  ;;  %v200_v15 = vrot.slane %v192_v0, 1  ;;  %v271_v2 = vrot.slane %v263_v60, 2  ;;  %v221_v20 = vrot.slane %v213_v10, 2 }
  0x1f   : > { %v237_v19 = vadd.f32 %v233_v59, %v228_v8  ;;  %v287_v21 = vadd.f32 %v283_v49, %v278_v11  ;;  %v234_v23 = vmul.f32 %v489_v12, %v175_v57  ;;  %v264_v3 = vmul.f32 %v480_v5, %v175_v57 }
  0x20   : > { %v307_v18 = vadd.f32 %v299_v34, %v286_v7  ;;  %v208_v22 = vadd.f32 %v200_v15, %v183_v63  ;;  %v284_v26 = vmul.f32 %v498_v16, %v175_v57  ;;  %v314_v4 = vmul.f32 %v494_v13, %v175_v57 }
  0x21   : > { %v258_v25 = vadd.f32 %v250_v9, %v237_v19  ;;  %v308_v28 = vadd.f32 %v300_v54, %v287_v21  ;;  %v251_v30 = vrot.slane %v243_v17, 1  ;;  %v301_v33 = vrot.slane %v293_v14, 1 }
  0x22   : > { %v328_v24 = vadd.f32 %v320_v41, %v307_v18  ;;  %v229_v29 = vadd.f32 %v221_v20, %v208_v22  ;;  %v272_v34 = vrot.slane %v264_v3, 2  ;;  %v294_v35 = vmul.f32 %v482_v6, %v176_v27 }
  0x23   : > { %v279_v32 = vadd.f32 %v271_v2, %v258_v25  ;;  %v329_v12 = vadd.f32 %v321_v62, %v308_v28  ;;  %v322_v38 = vrot.slane %v314_v4, 2  ;;  %v285_v41 = vmul.f32 %v498_v16, %v176_v27 }
  0x24   : > { %v336_v31 = vadd.f32 %v424_v1, %v328_v24  ;;  %v238_v5 = vadd.f32 %v234_v23, %v229_v29  ;;  %v315_v42 = vmul.f32 %v494_v13, %v176_v27  ;;  %v302_v46 = vrot.slane %v294_v35, 1 }
  0x25   : > { %v288_v37 = vadd.f32 %v284_v26, %v279_v32  ;;  %v337_v39 = vadd.f32 %v424_v1, %v329_v12 }
  0x26   : > { %v340_v36 = vmax.f32 %v336_v31, 0.0  ;;  %v259_v40 = vadd.f32 %v251_v30, %v238_v5  ;;  %v323_v49 = vrot.slane %v315_v42, 2 }
  0x27   : > { %v309_v43 = vadd.f32 %v301_v33, %v288_v37  ;;  %v341_v44 = vmax.f32 %v337_v39, 0.0 }
  0x28   : > { %344 = vst [vmem:[%s170_s27] sm:$0xf] %v340_v36  ;;  %v280_v45 = vadd.f32 %v272_v34, %v259_v40 }
  0x29   : > { %v330_v47 = vadd.f32 %v322_v38, %v309_v43  ;;  %345 = vst [vmem:[%s170_s27 + $0x4] sm:$0xf] %v341_v44 }
  0x2a   : > { %v289_v48 = vadd.f32 %v285_v41, %v280_v45 }
  0x2b   : > { %v338_v50 = vadd.f32 %v424_v1, %v330_v47 }
  0x2c   : > { %v310_v6 = vadd.f32 %v302_v46, %v289_v48 }
  0x2d   : > { %v342_v51 = vmax.f32 %v338_v50, 0.0 }
  0x2e   : > { %v331_v52 = vadd.f32 %v323_v49, %v310_v6 }
  0x2f   : > { %346 = vst [vmem:[%s170_s27 + $0x8] sm:$0xf] %v342_v51 }
  0x30   : > { %v339_v53 = vadd.f32 %v424_v1, %v331_v52 }
  0x32   : > { %v343_v54 = vmax.f32 %v339_v53, 0.0 }
  0x34   : > { %347 = vst [vmem:[%s170_s27 + $0xc] sm:$0xf] %v343_v54 }
  0x35 PF: > { %s13_s12 = sadd.s32 1, %s431_s12  }
  0x36   : > { %p10_p4 = scmp.ge.s32.totalorder %s13_s12, 4  }
  0x38   :  { %12 = sbr.rel (!%p10_p4) target bundleno = 1 (0x1), region = 62 }

// kernel: newelppm_forward.23
= control target key start
LH: loop header
LB: loop body
LE: loop exit
PB: predicated region body
PF: predicated region fallthrough
CT: control target
= control target key end

     0   :  { %s360_s9 = smov 0   ;;  %s380_s0 = inlined_call_operand.vmem [shape: f32[8,4], index: 0, kind: input, shape index: {}]   ;;  %s381_s1 = inlined_call_operand.vmem [shape: f32[2,4,512], index: 1, kind: input, shape index: {}]   ;;  %s382_s2 = inlined_call_operand.vmem [shape: f32[2,8,512], index: 2, kind: output, shape index: {}]  }
   0x1 LB: > { %s308_s10 = sadd.s32 4294967295, %s343_s9   ;;  %p312_p0 = scmp.ge.s32.totalorder %s343_s9, 1  ;;  %s343_s9 = sphi %s360_s9, %s12_s9  }
   0x2   : > { %p112_p1 = scmp.lt.s32.totalorder %s343_s9, 3 }
   0x4   : > { %p113_p2 = pnand %p312_p0, %p112_p1 }
   0x5   : > { %p134_p3 = scmp.lt.s32.totalorder (!%p113_p2), %s308_s10, 1 }
   0x6   : > { %116 = sbr.rel (%p113_p2) target bundleno = 158 (0x9e), region = 28 }
   0xb   : > { %s384_s10 = smov (!%p134_p3, %s308_s10), 1  ;;  %vm160_vm0 = vcmask 1043456   ;;  %v144_v2 = vld [vmem:[%s380_s0] sm:$0xff]  ;;  %vm156_vm1 = vcmask 31744  }
   0xc   : > { %s327_s11 = sshll.u32 %s384_s10, 4  ;;  %s328_s17 = sshll.u32 %s384_s10, 5 }
   0xd   : > { %s138_s14 = scalar_lea.vmem %s381_s1, %s327_s11  ;;  %s143_s20 = scalar_lea.vmem %s382_s2, %s328_s17 }
   0xe   : > { %v146_v0 = vld [vmem:[%s138_s14 + $0x8] sm:$0xff]  ;;  %v145_v1 = vld [vmem:[%s138_s14] sm:$0xff] }
   0xf   : > { %151 = vst [vmem:[#allocation1 + $0x10] ss:$2 sm:$0xff] %v146_v0 }
  0x10   : > { %149 = vst [vmem:[#allocation1] ss:$2 sm:$0xff] %v145_v1 }
  0x16   : > { %v154_v3 = vld.sshfl [vmem:[#allocation1 + $0x10] sm:$0xff pattern:$0x75316420]  ;;  %v155_v4 = vld.sshfl [vmem:[#allocation1 + $0x18] sm:$0xff pattern:$0x75316420] }
  0x17   : > { %321 = vmatpush.msk.msra.mxu2 %vm160_vm0, %v154_v3  ;;  %323 = vmatpush.msk.msra.mxu3 %vm160_vm0, %v155_v4  ;;  %v152_v5 = vld.sshfl [vmem:[#allocation1] sm:$0xff pattern:$0x75316420]  ;;  %v153_v6 = vld.sshfl [vmem:[#allocation1 + $0x8] sm:$0xff pattern:$0x75316420] }
  0x18   : > { %322 = vmatmul.msk.f32.vlgmr.msra.gmra.mxu2 %vm156_vm1, %v144_v2  ;;  %324 = vmatmul.msk.f32.vlgmr.msra.gmra.mxu3 %vm156_vm1, %v144_v2 }
  0x19   : > { %317 = vmatpush.msk.msra.mxu0 %vm160_vm0, %v152_v5  ;;  %319 = vmatpush.msk.msra.mxu1 %vm160_vm0, %v153_v6 }
  0x1a   : > { %318 = vmatmul.msk.f32.vlgmr.msra.gmra.mxu0 %vm156_vm1, %v144_v2  ;;  %320 = vmatmul.msk.f32.vlgmr.msra.gmra.mxu1 %vm156_vm1, %v144_v2 }
  0x97   : > { %v186_v7 = vpop.f32.mrf.mxu0  ;;  %v206_v8 = vpop.f32.mrf.mxu1 }
  0x98   : > { %249 = vst [vmem:[%s143_s20] sm:$0xff] %v186_v7 }
  0x99   : > { %250 = vst [vmem:[%s143_s20 + $0x8] sm:$0xff] %v206_v8 }
  0x9b   : > { %v226_v9 = vpop.f32.mrf.mxu2  ;;  %v246_v10 = vpop.f32.mrf.mxu3 }
  0x9c   : > { %251 = vst [vmem:[%s143_s20 + $0x10] sm:$0xff] %v226_v9 }
  0x9d   : > { %252 = vst [vmem:[%s143_s20 + $0x18] sm:$0xff] %v246_v10 }
  0x9e PF: > { %s12_s9 = sadd.s32 1, %s343_s9  }
  0x9f   : > { %p9_p4 = scmp.ge.s32.totalorder %s12_s9, 4  }
  0xa1   :  { %11 = sbr.rel (!%p9_p4) target bundleno = 1 (0x1), region = 59 }

// kernel: newelppm_forward.24
= control target key start
LH: loop header
LB: loop body
LE: loop exit
PB: predicated region body
PF: predicated region fallthrough
CT: control target
= control target key end

     0   :  { %s582_s12 = smov 0   ;;  %s625_s0 = inlined_call_operand.vmem [shape: f32[8,4], index: 0, kind: input, shape index: {}]   ;;  %s626_s1 = inlined_call_operand.vmem [shape: f32[2,8,4,128], index: 1, kind: input, shape index: {}]   ;;  %s627_s2 = inlined_call_operand.vmem [shape: f32[2,8,8,128], index: 2, kind: input, shape index: {}]   ;;  %s628_s3 = inlined_call_operand.vmem [shape: f32[2,8,8,128], index: 3, kind: output, shape index: {}]  }
   0x1 LB: > { %s493_s13 = sadd.s32 4294967295, %s560_s12   ;;  %p497_p0 = scmp.ge.s32.totalorder %s560_s12, 1  ;;  %s560_s12 = sphi %s582_s12, %s13_s12  }
   0x2   : > { %p147_p1 = scmp.lt.s32.totalorder %s560_s12, 3 }
   0x4   : > { %p148_p2 = pnand %p497_p0, %p147_p1 }
   0x5   : > { %p176_p3 = scmp.lt.s32.totalorder (!%p148_p2), %s493_s13, 1 }
   0x6   : > { %151 = sbr.rel (%p148_p2) target bundleno = 160 (0xa0), region = 32 }
   0xb   : > { %s630_s13 = smov (!%p176_p3, %s493_s13), 1  ;;  %vm198_vm0 = vcmask 1043456   ;;  %v191_v0 = vld [vmem:[%s625_s0] sm:$0xff]  ;;  %vm194_vm1 = vcmask 31744  }
   0xc   : > { %s543_s14 = sshll.u32 %s630_s13, 5  ;;  %s544_s20 = sshll.u32 %s630_s13, 6 }
   0xd   : > { %s180_s17 = scalar_lea.vmem %s626_s1, %s543_s14  ;;  %s185_s23 = scalar_lea.vmem %s627_s2, %s544_s20 }
   0xe   : > { %v511_v1 = vld [vmem:[%s180_s17 + $0x8] sm:$0xf]  ;;  %v516_v2 = vld [vmem:[%s180_s17 + $0xc] sm:$0xf]  ;;  %v531_v3 = vld [vmem:[%s180_s17 + $0x18] sm:$0xf]  ;;  %s190_s26 = scalar_lea.vmem %s628_s3, %s544_s20 }
   0xf   : > { %513 = vmatpush.msk.msra.mxu2 %vm198_vm0, %v511_v1  ;;  %518 = vmatpush.msk.msra.mxu3 %vm198_vm0, %v516_v2  ;;  %v536_v4 = vld [vmem:[%s180_s17 + $0x1c] sm:$0xf]  ;;  %v192_v5 = vld [vmem:[%s180_s17] sm:$0xf]  ;;  %v506_v6 = vld [vmem:[%s180_s17 + $0x4] sm:$0xf] }
  0x10   : > { %514 = vmatmul.msk.f32.vlgmr.msra.gmra.mxu2 %vm194_vm1, %v191_v0  ;;  %519 = vmatmul.msk.f32.vlgmr.msra.gmra.mxu3 %vm194_vm1, %v191_v0  ;;  %v521_v7 = vld [vmem:[%s180_s17 + $0x10] sm:$0xf]  ;;  %v526_v8 = vld [vmem:[%s180_s17 + $0x14] sm:$0xf]  ;;  %v193_v9 = vld [vmem:[%s185_s23] sm:$0xff] }
  0x11   : > { %533 = vmatpush.msk.msrb.mxu2 %vm198_vm0, %v531_v3  ;;  %538 = vmatpush.msk.msrb.mxu3 %vm198_vm0, %v536_v4  ;;  %v507_v10 = vld [vmem:[%s185_s23 + $0x8] sm:$0xff]  ;;  %v512_v15 = vld [vmem:[%s185_s23 + $0x10] sm:$0xff]  ;;  %v517_v16 = vld [vmem:[%s185_s23 + $0x18] sm:$0xff] }
  0x12   : > { %504 = vmatpush.msk.msra.mxu0 %vm198_vm0, %v192_v5  ;;  %508 = vmatpush.msk.msra.mxu1 %vm198_vm0, %v506_v6  ;;  %v522_v21 = vld [vmem:[%s185_s23 + $0x20] sm:$0xff]  ;;  %v527_v22 = vld [vmem:[%s185_s23 + $0x28] sm:$0xff]  ;;  %v532_v27 = vld [vmem:[%s185_s23 + $0x30] sm:$0xff] }
  0x13   : > { %505 = vmatmul.msk.f32.vlgmr.msra.gmra.mxu0 %vm194_vm1, %v191_v0  ;;  %509 = vmatmul.msk.f32.vlgmr.msra.gmra.mxu1 %vm194_vm1, %v191_v0  ;;  %v537_v28 = vld [vmem:[%s185_s23 + $0x38] sm:$0xff] }
  0x14   : > { %523 = vmatpush.msk.msrb.mxu0 %vm198_vm0, %v521_v7  ;;  %528 = vmatpush.msk.msrb.mxu1 %vm198_vm0, %v526_v8 }
  0x18   : > { %534 = vmatmul.msk.f32.vlgmr.msrb.gmra.mxu2 %vm194_vm1, %v191_v0  ;;  %539 = vmatmul.msk.f32.vlgmr.msrb.gmra.mxu3 %vm194_vm1, %v191_v0 }
  0x1b   : > { %524 = vmatmul.msk.f32.vlgmr.msrb.gmra.mxu0 %vm194_vm1, %v191_v0  ;;  %529 = vmatmul.msk.f32.vlgmr.msrb.gmra.mxu1 %vm194_vm1, %v191_v0 }
  0x90   : > { %v219_v11 = vpop.f32.mrf.mxu0  ;;  %v247_v12 = vpop.f32.mrf.mxu1 }
  0x91   : > { %v220_v13 = vadd.f32 %v219_v11, %v193_v9  ;;  %v248_v14 = vadd.f32 %v507_v10, %v247_v12 }
  0x93   : > { %222 = vst [vmem:[%s190_s26] sm:$0xff] %v220_v13  ;;  %v276_v17 = vpop.f32.mrf.mxu2  ;;  %v305_v18 = vpop.f32.mrf.mxu3 }
  0x94   : > { %510 = vst [vmem:[%s190_s26 + $0x8] sm:$0xff] %v248_v14  ;;  %v277_v19 = vadd.f32 %v512_v15, %v276_v17  ;;  %v306_v20 = vadd.f32 %v517_v16, %v305_v18 }
  0x96   : > { %515 = vst [vmem:[%s190_s26 + $0x10] sm:$0xff] %v277_v19 }
  0x97   : > { %520 = vst [vmem:[%s190_s26 + $0x18] sm:$0xff] %v306_v20 }
  0x98   : > { %v334_v23 = vpop.f32.mrf.mxu0  ;;  %v363_v24 = vpop.f32.mrf.mxu1 }
  0x99   : > { %v335_v25 = vadd.f32 %v522_v21, %v334_v23  ;;  %v364_v26 = vadd.f32 %v527_v22, %v363_v24 }
  0x9b   : > { %525 = vst [vmem:[%s190_s26 + $0x20] sm:$0xff] %v335_v25  ;;  %v392_v29 = vpop.f32.mrf.mxu2  ;;  %v421_v30 = vpop.f32.mrf.mxu3 }
  0x9c   : > { %530 = vst [vmem:[%s190_s26 + $0x28] sm:$0xff] %v364_v26  ;;  %v393_v31 = vadd.f32 %v532_v27, %v392_v29  ;;  %v422_v32 = vadd.f32 %v537_v28, %v421_v30 }
  0x9e   : > { %535 = vst [vmem:[%s190_s26 + $0x30] sm:$0xff] %v393_v31 }
  0x9f   : > { %540 = vst [vmem:[%s190_s26 + $0x38] sm:$0xff] %v422_v32 }
  0xa0 PF: > { %s13_s12 = sadd.s32 1, %s560_s12  }
  0xa1   : > { %p10_p4 = scmp.ge.s32.totalorder %s13_s12, 4  }
  0xa3   :  { %12 = sbr.rel (!%p10_p4) target bundleno = 1 (0x1), region = 86 }

// kernel: newelppm_forward.26
= control target key start
LH: loop header
LB: loop body
LE: loop exit
PB: predicated region body
PF: predicated region fallthrough
CT: control target
= control target key end

     0   :  { %s476_s9 = smov 0   ;;  %s537_s0 = inlined_call_operand.vmem [shape: f32[16,8], index: 0, kind: input, shape index: {}]   ;;  %s538_s1 = inlined_call_operand.vmem [shape: f32[2,8,1024], index: 1, kind: input, shape index: {}]   ;;  %s539_s2 = inlined_call_operand.vmem [shape: f32[2,16,1024], index: 2, kind: output, shape index: {}]  }
   0x1 LB: > { %s416_s10 = sadd.s32 4294967295, %s459_s9   ;;  %p420_p0 = scmp.ge.s32.totalorder %s459_s9, 1  ;;  %s459_s9 = sphi %s476_s9, %s12_s9  }
   0x2   : > { %p112_p1 = scmp.lt.s32.totalorder %s459_s9, 3 }
   0x4   : > { %p113_p2 = pnand %p420_p0, %p112_p1 }
   0x5   : > { %p134_p3 = scmp.lt.s32.totalorder (!%p113_p2), %s416_s10, 1 }
   0x6   : > { %116 = sbr.rel (%p113_p2) target bundleno = 174 (0xae), region = 28 }
   0xb   : > { %s541_s10 = smov (!%p134_p3, %s416_s10), 1  ;;  %v144_v0 = vld [vmem:[%s537_s0] sm:$0xff]  ;;  %vm154_vm0 = vcmask 64512   ;;  %v145_v9 = vld [vmem:[%s537_s0 + $0x8] sm:$0xff] }
   0xc   : > { %s443_s11 = sshll.u32 %s541_s10, 6  ;;  %s444_s19 = sshll.u32 %s541_s10, 7 }
   0xd   : > { %s138_s14 = scalar_lea.vmem %s538_s1, %s443_s11  ;;  %s516_s22 = scalar_lea.vmem %s539_s2, %s444_s19 }
   0xe   : > { %v148_v1 = vld [vmem:[%s138_s14 + $0x10] sm:$0xff]  ;;  %v149_v2 = vld [vmem:[%s138_s14 + $0x18] sm:$0xff]  ;;  %v146_v5 = vld [vmem:[%s138_s14] sm:$0xff] }
   0xf   : > { %v152_v3 = vld [vmem:[%s138_s14 + $0x30] sm:$0xff]  ;;  %222 = vmatpush.msra.mxu2 %v148_v1  ;;  %245 = vmatpush.msra.mxu3 %v149_v2  ;;  %v153_v4 = vld [vmem:[%s138_s14 + $0x38] sm:$0xff]  ;;  %v147_v6 = vld [vmem:[%s138_s14 + $0x8] sm:$0xff] }
  0x10   : > { %429 = vmatmul.msk.f32.vlgmr.msra.gmra.mxu2 %vm154_vm0, %v144_v0  ;;  %431 = vmatmul.msk.f32.vlgmr.msra.gmra.mxu3 %vm154_vm0, %v144_v0  ;;  %v150_v7 = vld [vmem:[%s138_s14 + $0x20] sm:$0xff]  ;;  %v151_v8 = vld [vmem:[%s138_s14 + $0x28] sm:$0xff] }
  0x11   : > { %314 = vmatpush.msrb.mxu2 %v152_v3  ;;  %337 = vmatpush.msrb.mxu3 %v153_v4 }
  0x12   : > { %176 = vmatpush.msra.mxu0 %v146_v5  ;;  %199 = vmatpush.msra.mxu1 %v147_v6 }
  0x13   : > { %425 = vmatmul.msk.f32.vlgmr.msra.gmra.mxu0 %vm154_vm0, %v144_v0  ;;  %427 = vmatmul.msk.f32.vlgmr.msra.gmra.mxu1 %vm154_vm0, %v144_v0 }
  0x14   : > { %268 = vmatpush.msrb.mxu0 %v150_v7  ;;  %291 = vmatpush.msrb.mxu1 %v151_v8 }
  0x18   : > { %430 = vmatmul.msk.f32.gmra.mxu2 %vm154_vm0, %v145_v9  ;;  %432 = vmatmul.msk.f32.gmra.mxu3 %vm154_vm0, %v145_v9 }
  0x1b   : > { %426 = vmatmul.msk.f32.gmra.mxu0 %vm154_vm0, %v145_v9  ;;  %428 = vmatmul.msk.f32.gmra.mxu1 %vm154_vm0, %v145_v9 }
  0x20   : > { %437 = vmatmul.msk.f32.vlgmr.msrb.gmra.mxu2 %vm154_vm0, %v144_v0  ;;  %439 = vmatmul.msk.f32.vlgmr.msrb.gmra.mxu3 %vm154_vm0, %v144_v0 }
  0x23   : > { %433 = vmatmul.msk.f32.vlgmr.msrb.gmra.mxu0 %vm154_vm0, %v144_v0  ;;  %435 = vmatmul.msk.f32.vlgmr.msrb.gmra.mxu1 %vm154_vm0, %v144_v0 }
  0x28   : > { %438 = vmatmul.msk.f32.gmra.mxu2 %vm154_vm0, %v145_v9  ;;  %440 = vmatmul.msk.f32.gmra.mxu3 %vm154_vm0, %v145_v9 }
  0x2b   : > { %434 = vmatmul.msk.f32.gmra.mxu0 %vm154_vm0, %v145_v9  ;;  %436 = vmatmul.msk.f32.gmra.mxu1 %vm154_vm0, %v145_v9 }
  0x90   : > { %v178_v10 = vpop.f32.mrf.mxu0  ;;  %v201_v11 = vpop.f32.mrf.mxu1 }
  0x91   : > { %345 = vst [vmem:[%s516_s22] sm:$0xff] %v178_v10 }
  0x92   : > { %346 = vst [vmem:[%s516_s22 + $0x8] sm:$0xff] %v201_v11 }
  0x93   : > { %v224_v12 = vpop.f32.mrf.mxu2  ;;  %v247_v13 = vpop.f32.mrf.mxu3 }
  0x94   : > { %347 = vst [vmem:[%s516_s22 + $0x10] sm:$0xff] %v224_v12 }
  0x95   : > { %348 = vst [vmem:[%s516_s22 + $0x18] sm:$0xff] %v247_v13 }
  0x98   : > { %v181_v14 = vpop.f32.mrf.mxu0  ;;  %v204_v15 = vpop.f32.mrf.mxu1 }
  0x99   : > { %353 = vst [vmem:[%s516_s22 + $0x40] sm:$0xff] %v181_v14 }
  0x9a   : > { %354 = vst [vmem:[%s516_s22 + $0x48] sm:$0xff] %v204_v15 }
  0x9b   : > { %v227_v16 = vpop.f32.mrf.mxu2  ;;  %v250_v17 = vpop.f32.mrf.mxu3 }
  0x9c   : > { %355 = vst [vmem:[%s516_s22 + $0x50] sm:$0xff] %v227_v16 }
  0x9d   : > { %356 = vst [vmem:[%s516_s22 + $0x58] sm:$0xff] %v250_v17 }
  0xa0   : > { %v270_v18 = vpop.f32.mrf.mxu0  ;;  %v293_v19 = vpop.f32.mrf.mxu1 }
  0xa1   : > { %349 = vst [vmem:[%s516_s22 + $0x20] sm:$0xff] %v270_v18 }
  0xa2   : > { %350 = vst [vmem:[%s516_s22 + $0x28] sm:$0xff] %v293_v19 }
  0xa3   : > { %v316_v20 = vpop.f32.mrf.mxu2  ;;  %v339_v21 = vpop.f32.mrf.mxu3 }
  0xa4   : > { %351 = vst [vmem:[%s516_s22 + $0x30] sm:$0xff] %v316_v20 }
  0xa5   : > { %352 = vst [vmem:[%s516_s22 + $0x38] sm:$0xff] %v339_v21 }
  0xa8   : > { %v273_v22 = vpop.f32.mrf.mxu0  ;;  %v296_v23 = vpop.f32.mrf.mxu1 }
  0xa9   : > { %357 = vst [vmem:[%s516_s22 + $0x60] sm:$0xff] %v273_v22 }
  0xaa   : > { %358 = vst [vmem:[%s516_s22 + $0x68] sm:$0xff] %v296_v23 }
  0xab   : > { %v319_v24 = vpop.f32.mrf.mxu2  ;;  %v342_v25 = vpop.f32.mrf.mxu3 }
  0xac   : > { %359 = vst [vmem:[%s516_s22 + $0x70] sm:$0xff] %v319_v24 }
  0xad   : > { %360 = vst [vmem:[%s516_s22 + $0x78] sm:$0xff] %v342_v25 }
  0xae PF: > { %s12_s9 = sadd.s32 1, %s459_s9  }
  0xaf   : > { %p9_p4 = scmp.ge.s32.totalorder %s12_s9, 4  }
  0xb1   :  { %11 = sbr.rel (!%p9_p4) target bundleno = 1 (0x1), region = 58 }

// kernel: newelppm_forward.25
= control target key start
LH: loop header
LB: loop body
LE: loop exit
PB: predicated region body
PF: predicated region fallthrough
CT: control target
= control target key end

     0   :  { %s1076_s18 = smov 0   ;;  %s1668_s0 = inlined_call_operand.vmem [shape: f32[2,10,10,128], index: 0, kind: input, shape index: {}]   ;;  %s1669_s1 = inlined_call_operand.vmem [shape: f32[9,128], index: 1, kind: input, shape index: {}]   ;;  %s1670_s2 = inlined_call_operand.vmem [shape: f32[1,128], index: 2, kind: input, shape index: {}]   ;;  %s1671_s3 = inlined_call_operand.vmem [shape: f32[128,128], index: 3, kind: input, shape index: {}]   ;;  %s1672_s4 = inlined_call_operand.vmem [shape: f32[1,128], index: 4, kind: input, shape index: {}]   ;;  %s1673_s5 = inlined_call_operand.vmem [shape: f32[2,8,8,128], index: 5, kind: output, shape index: {}]  }
   0x1 LB: > { %s1008_s19 = sadd.s32 4294967295, %s1044_s18   ;;  %p1012_p0 = scmp.ge.s32.totalorder %s1044_s18, 1  ;;  %s1044_s18 = sphi %s1076_s18, %s15_s18  }
   0x2   : > { %p187_p1 = scmp.lt.s32.totalorder %s1044_s18, 3 }
   0x4   : > { %p188_p2 = pnand %p1012_p0, %p187_p1 }
   0x5   : > { %p215_p3 = scmp.lt.s32.totalorder (!%p188_p2), %s1008_s19, 1 }
   0x6   : > { %191 = sbr.rel (%p188_p2) target bundleno = 244 (0xf4), region = 40 }
   0xb   : > { %v1087_v0 = vld [vmem:[%s1671_s3 + $0x78] sm:$0xff]  ;;  %v1092_v1 = vld [vmem:[%s1671_s3 + $0x70] sm:$0xff]  ;;  %v1099_v2 = vld [vmem:[%s1671_s3 + $0x68] sm:$0xff]  ;;  %s1675_s19 = smov (!%p215_p3, %s1008_s19), 1  ;;  %vm297_vm0 = vcmask 1046528   ;;  %vm371_vm1 = vcmask 1045504  }
   0xc   : > { %815 = vmatpush.msra.mxu2 %v1087_v0  ;;  %838 = vmatpush.msra.mxu3 %v1087_v0  ;;  %v1110_v3 = vld [vmem:[%s1671_s3 + $0x60] sm:$0xff]  ;;  %s1026_s28 = smul.u32 160, %s1675_s19  ;;  %v1120_v4 = vld [vmem:[%s1671_s3 + $0x58] sm:$0xff]  ;;  %v1163_v14 = vld [vmem:[%s1671_s3 + $0x50] sm:$0xff]  ;;  %s1025_s16 = sshll.u32 %s1675_s19, 6 }
   0xd   : > { %770 = vmatpush.msra.mxu0 %v1087_v0  ;;  %792 = vmatpush.msra.mxu1 %v1087_v0  ;;  %v1125_v5 = vld [vmem:[%s1669_s1] sm:$0xff]  ;;  %v1190_v23 = vld [vmem:[%s1671_s3 + $0x48] sm:$0xff]  ;;  %v1229_v43 = vld [vmem:[%s1671_s3 + $0x38] sm:$0xff]  ;;  %s224_s21 = scalar_lea.vmem %s1673_s5, %s1025_s16 }
   0xe   : > { %816 = vmatpush.msra.mxu2 %v1092_v1  ;;  %839 = vmatpush.msra.mxu3 %v1092_v1  ;;  %s1132_s10 = scalar_lea.vmem %s1668_s0, %s1026_s28  ;;  %v1135_v6 = vperm.slane %v1125_v5, 0  ;;  %v1138_v7 = vperm.slane %v1125_v5, 1  ;;  %v1141_v8 = vperm.slane %v1125_v5, 2  ;;  %v1144_v9 = vperm.slane %v1125_v5, 3  ;;  %v1207_v32 = vld [vmem:[%s1671_s3 + $0x40] sm:$0xff]  ;;  %v1252_v52 = vld [vmem:[%s1671_s3 + $0x30] sm:$0xff] }
   0xf   : > { %771 = vmatpush.msra.mxu0 %v1092_v1  ;;  %793 = vmatpush.msra.mxu1 %v1092_v1  ;;  %v1149_v10 = vld [vmem:[%s1132_s10 + $0x20] sm:$0xff]  ;;  %v1152_v11 = vld [vmem:[%s1132_s10 + $0x28] sm:$0x3]  ;;  %v1155_v12 = vperm.slane %v1125_v5, 4  ;;  %v1158_v13 = vperm.slane %v1125_v5, 5  ;;  %v1168_v15 = vld [vmem:[%s1132_s10 + $0x30] sm:$0xff] }
  0x10   : > { %817 = vmatpush.msra.mxu2 %v1099_v2  ;;  %840 = vmatpush.msra.mxu3 %v1099_v2  ;;  %v250_v16 = vmul.f32 %v1135_v6, %v1149_v10  ;;  %v269_v17 = vmul.f32 %v1138_v7, %v1149_v10  ;;  %v270_v18 = vmul.f32 %v1138_v7, %v1152_v11  ;;  %v1179_v19 = vld [vmem:[%s1132_s10 + $0x38] sm:$0x3]  ;;  %v1213_v36 = vperm.slane %v1125_v5, 6  ;;  %v1218_v37 = vld [vmem:[%s1669_s1 + $0x8] ss:$0 sm:$0xff]  ;;  %v1223_v38 = vld [vmem:[%s1132_s10 + $0x40] sm:$0xff] }
  0x11   : > { %772 = vmatpush.msra.mxu0 %v1099_v2  ;;  %794 = vmatpush.msra.mxu1 %v1099_v2  ;;  %v343_v20 = vmul.f32 %v1141_v8, %v1149_v10  ;;  %v344_v21 = vmul.f32 %v1141_v8, %v1152_v11  ;;  %v415_v22 = vmul.f32 %v1144_v9, %v1168_v15  ;;  %v1234_v44 = vld [vmem:[%s1132_s10 + $0x48] sm:$0x3]  ;;  %v1240_v47 = vperm.slane %v1125_v5, 7 }
  0x12   : > { %818 = vmatpush.msra.mxu2 %v1110_v3  ;;  %841 = vmatpush.msra.mxu3 %v1110_v3  ;;  %v304_v24 = vrot.slane %v269_v17, 1  ;;  %v305_v25 = vrot.slane %v270_v18, 1  ;;  %v434_v26 = vmul.f32 %v1155_v12, %v1168_v15  ;;  %v435_v27 = vmul.f32 %v1155_v12, %v1179_v19  ;;  %v1271_v61 = vld [vmem:[%s1671_s3 + $0x28] sm:$0xff] }
  0x13   : > { %773 = vmatpush.msra.mxu0 %v1110_v3  ;;  %795 = vmatpush.msra.mxu1 %v1110_v3  ;;  %v378_v28 = vrot.slane %v343_v20, 2  ;;  %v379_v29 = vrot.slane %v344_v21, 2  ;;  %v507_v30 = vmul.f32 %v1158_v13, %v1168_v15  ;;  %v508_v31 = vmul.f32 %v1158_v13, %v1179_v19 }
  0x14   : > { %819 = vmatpush.msra.mxu2 %v1120_v4  ;;  %842 = vmatpush.msra.mxu3 %v1120_v4  ;;  %v306_v33 = vsel %vm297_vm0, %v304_v24, %v305_v25  ;;  %v468_v34 = vrot.slane %v434_v26, 1  ;;  %v469_v35 = vrot.slane %v435_v27, 1  ;;  %v578_v46 = vmul.f32 %v1213_v36, %v1223_v38 }
  0x15   : > { %774 = vmatpush.msra.mxu0 %v1120_v4  ;;  %796 = vmatpush.msra.mxu1 %v1120_v4  ;;  %v332_v39 = vadd.f32 %v306_v33, %v250_v16  ;;  %v380_v40 = vsel %vm371_vm1, %v378_v28, %v379_v29  ;;  %v541_v41 = vrot.slane %v507_v30, 2  ;;  %v542_v42 = vrot.slane %v508_v31, 2  ;;  %v1295_v29 = vld [vmem:[%s1132_s10 + $0x50] sm:$0xff]  ;;  %v1303_v33 = vld [vmem:[%s1671_s3 + $0x18] sm:$0xff] }
  0x16   : > { %820 = vmatpush.msra.mxu2 %v1163_v14  ;;  %843 = vmatpush.msra.mxu3 %v1163_v14  ;;  %v470_v45 = vsel %vm297_vm0, %v468_v34, %v469_v35  ;;  %v670_v48 = vmul.f32 %v1218_v37, %v1223_v38  ;;  %v671_v51 = vmul.f32 %v1218_v37, %v1234_v44  ;;  %v1308_v34 = vld [vmem:[%s1132_s10 + $0x58] sm:$0x3] }
  0x17   : > { %775 = vmatpush.msra.mxu0 %v1163_v14  ;;  %797 = vmatpush.msra.mxu1 %v1163_v14  ;;  %v406_v49 = vadd.f32 %v380_v40, %v332_v39  ;;  %v543_v50 = vsel %vm371_vm1, %v541_v41, %v542_v42  ;;  %v597_v53 = vmul.f32 %v1240_v47, %v1223_v38 }
  0x18   : > { %821 = vmatpush.msra.mxu2 %v1190_v23  ;;  %844 = vmatpush.msra.mxu3 %v1190_v23  ;;  %v598_v54 = vmul.f32 %v1240_v47, %v1234_v44  ;;  %v704_v55 = vrot.slane %v670_v48, 2  ;;  %v251_v56 = vmul.f32 %v1135_v6, %v1168_v15  ;;  %v705_v58 = vrot.slane %v671_v51, 2 }
  0x19   : > { %776 = vmatpush.msra.mxu0 %v1190_v23  ;;  %798 = vmatpush.msra.mxu1 %v1190_v23  ;;  %v423_v57 = vadd.f32 %v415_v22, %v406_v49  ;;  %v271_v59 = vmul.f32 %v1138_v7, %v1168_v15  ;;  %v272_v60 = vmul.f32 %v1138_v7, %v1179_v19  ;;  %v631_v62 = vrot.slane %v597_v53, 1  ;;  %v1285_v22 = vld [vmem:[%s1671_s3 + $0x20] sm:$0xff]  ;;  %v1322_v49 = vld [vmem:[%s1671_s3 + $0x10] sm:$0xff] }
  0x1a   : > { %822 = vmatpush.msra.mxu2 %v1207_v32  ;;  %845 = vmatpush.msra.mxu3 %v1207_v32  ;;  %v632_v63 = vrot.slane %v598_v54, 1  ;;  %v345_v5 = vmul.f32 %v1141_v8, %v1168_v15  ;;  %v346_v16 = vmul.f32 %v1141_v8, %v1179_v19  ;;  %v706_v18 = vsel %vm371_vm1, %v704_v55, %v705_v58  ;;  %v1335_v55 = vld [vmem:[%s1670_s2] ss:$0 sm:$0xff] }
  0x1b   : > { %777 = vmatpush.msra.mxu0 %v1207_v32  ;;  %799 = vmatpush.msra.mxu1 %v1207_v32  ;;  %v496_v17 = vadd.f32 %v470_v45, %v423_v57  ;;  %v307_v20 = vrot.slane %v271_v59, 1  ;;  %v308_v21 = vrot.slane %v272_v60, 1  ;;  %v416_v27 = vmul.f32 %v1144_v9, %v1223_v38  ;;  %v225_v59 = vld [vmem:[%s1132_s10] sm:$0xff]  ;;  %v1343_v60 = vld [vmem:[%s1671_s3 + $0x8] sm:$0xff] }
  0x1c   : > { %823 = vmatpush.msra.mxu2 %v1229_v43  ;;  %846 = vmatpush.msra.mxu3 %v1229_v43  ;;  %v633_v24 = vsel %vm297_vm0, %v631_v62, %v632_v63  ;;  %v381_v25 = vrot.slane %v345_v5, 2  ;;  %v382_v26 = vrot.slane %v346_v16, 2  ;;  %v436_v31 = vmul.f32 %v1155_v12, %v1223_v38 }
  0x1d   : > { %778 = vmatpush.msra.mxu0 %v1229_v43  ;;  %800 = vmatpush.msra.mxu1 %v1229_v43  ;;  %v569_v28 = vadd.f32 %v543_v50, %v496_v17  ;;  %v309_v30 = vsel %vm297_vm0, %v307_v20, %v308_v21  ;;  %v437_v40 = vmul.f32 %v1155_v12, %v1234_v44  ;;  %v226_v17 = vld [vmem:[%s1132_s10 + $0x8] sm:$0x3] }
  0x1e   : > { %824 = vmatpush.msra.mxu2 %v1252_v52  ;;  %847 = vmatpush.msra.mxu3 %v1252_v52  ;;  %v333_v35 = vadd.f32 %v309_v30, %v251_v56  ;;  %v383_v39 = vsel %vm371_vm1, %v381_v25, %v382_v26  ;;  %v471_v42 = vrot.slane %v436_v31, 1  ;;  %v509_v45 = vmul.f32 %v1158_v13, %v1223_v38  ;;  %v1359_v26 = vld [vmem:[%s1671_s3] sm:$0xff] }
  0x1f   : > { %779 = vmatpush.msra.mxu0 %v1252_v52  ;;  %801 = vmatpush.msra.mxu1 %v1252_v52  ;;  %v586_v41 = vadd.f32 %v578_v46, %v569_v28  ;;  %v510_v48 = vmul.f32 %v1158_v13, %v1234_v44  ;;  %v472_v51 = vrot.slane %v437_v40, 1  ;;  %v579_v46 = vmul.f32 %v1213_v36, %v1295_v29 }
  0x20   : > { %825 = vmatpush.msra.mxu2 %v1271_v61  ;;  %848 = vmatpush.msra.mxu3 %v1271_v61  ;;  %v407_v50 = vadd.f32 %v383_v39, %v333_v35  ;;  %v599_v53 = vmul.f32 %v1240_v47, %v1295_v29  ;;  %v544_v56 = vrot.slane %v509_v45, 2  ;;  %v600_v58 = vmul.f32 %v1240_v47, %v1308_v34 }
  0x21   : > { %780 = vmatpush.msra.mxu0 %v1271_v61  ;;  %802 = vmatpush.msra.mxu1 %v1271_v61  ;;  %v659_v54 = vadd.f32 %v633_v24, %v586_v41  ;;  %v545_v57 = vrot.slane %v510_v48, 2  ;;  %v473_v63 = vsel %vm297_vm0, %v471_v42, %v472_v51  ;;  %v672_v16 = vmul.f32 %v1218_v37, %v1295_v29  ;;  %v227_v42 = vld [vmem:[%s1132_s10 + $0x10] sm:$0xff] }
  0x22   : > { %826 = vmatpush.msra.mxu2 %v1285_v22  ;;  %849 = vmatpush.msra.mxu3 %v1285_v22  ;;  %v424_v62 = vadd.f32 %v416_v27, %v407_v50  ;;  %v634_v5 = vrot.slane %v599_v53, 1  ;;  %v635_v24 = vrot.slane %v600_v58, 1  ;;  %v673_v25 = vmul.f32 %v1218_v37, %v1308_v34  ;;  %v228_v53 = vld [vmem:[%s1132_s10 + $0x18] sm:$0x3] }
  0x23   : > { %781 = vmatpush.msra.mxu0 %v1285_v22  ;;  %803 = vmatpush.msra.mxu1 %v1285_v22  ;;  %v732_v20 = vadd.f32 %v706_v18, %v659_v54  ;;  %v546_v21 = vsel %vm371_vm1, %v544_v56, %v545_v57  ;;  %v707_v28 = vrot.slane %v672_v16, 2  ;;  %v248_v18 = vmul.f32 %v1135_v6, %v225_v59 }
  0x24   : > { %827 = vmatpush.msra.mxu2 %v1303_v33  ;;  %850 = vmatpush.msra.mxu3 %v1303_v33  ;;  %v497_v27 = vadd.f32 %v473_v63, %v424_v62  ;;  %v265_v30 = vmul.f32 %v1138_v7, %v225_v59  ;;  %v636_v35 = vsel %vm297_vm0, %v634_v5, %v635_v24  ;;  %v708_v39 = vrot.slane %v673_v25, 2 }
  0x25   : > { %782 = vmatpush.msra.mxu0 %v1303_v33  ;;  %804 = vmatpush.msra.mxu1 %v1303_v33  ;;  %v1368_v31 = vadd.f32 %v1335_v55, %v732_v20  ;;  %v266_v40 = vmul.f32 %v1138_v7, %v226_v17  ;;  %v339_v48 = vmul.f32 %v1141_v8, %v225_v59 }
  0x26   : > { %828 = vmatpush.msra.mxu2 %v1322_v49  ;;  %851 = vmatpush.msra.mxu3 %v1322_v49  ;;  %v570_v41 = vadd.f32 %v546_v21, %v497_v27  ;;  %v298_v45 = vrot.slane %v265_v30, 1  ;;  %v340_v50 = vmul.f32 %v1141_v8, %v226_v17  ;;  %v709_v51 = vsel %vm371_vm1, %v707_v28, %v708_v39 }
  0x27   : > { %783 = vmatpush.msra.mxu0 %v1322_v49  ;;  %805 = vmatpush.msra.mxu1 %v1322_v49  ;;  %v299_v54 = vrot.slane %v266_v40, 1  ;;  %v413_v56 = vmul.f32 %v1144_v9, %v227_v42  ;;  %v430_v57 = vmul.f32 %v1155_v12, %v227_v42  ;;  %v372_v59 = vrot.slane %v339_v48, 2 }
  0x28   : > { %829 = vmatpush.msra.mxu2 %v1343_v60  ;;  %852 = vmatpush.msra.mxu3 %v1343_v60  ;;  %v587_v58 = vadd.f32 %v579_v46, %v570_v41  ;;  %v373_v62 = vrot.slane %v340_v50, 2  ;;  %v431_v63 = vmul.f32 %v1155_v12, %v228_v53  ;;  %v503_v17 = vmul.f32 %v1158_v13, %v227_v42 }
  0x29   : > { %784 = vmatpush.msra.mxu0 %v1343_v60  ;;  %806 = vmatpush.msra.mxu1 %v1343_v60  ;;  %v300_v5 = vsel %vm297_vm0, %v298_v45, %v299_v54  ;;  %v462_v16 = vrot.slane %v430_v57, 1  ;;  %v504_v20 = vmul.f32 %v1158_v13, %v228_v53  ;;  %v576_v30 = vmul.f32 %v1213_v36, %v1149_v10 }
  0x2a   : > { %830 = vmatpush.msra.mxu2 %v1359_v26  ;;  %853 = vmatpush.msra.mxu3 %v1359_v26  ;;  %v660_v46 = vadd.f32 %v636_v35, %v587_v58  ;;  %v330_v21 = vadd.f32 %v300_v5, %v248_v18  ;;  %v374_v24 = vsel %vm371_vm1, %v372_v59, %v373_v62  ;;  %v463_v25 = vrot.slane %v431_v63, 1 }
  0x2b   : > { %785 = vmatpush.msra.mxu0 %v1359_v26  ;;  %807 = vmatpush.msra.mxu1 %v1359_v26  ;;  %v535_v27 = vrot.slane %v503_v17, 2  ;;  %v536_v28 = vrot.slane %v504_v20, 2  ;;  %v593_v39 = vmul.f32 %v1240_v47, %v1149_v10  ;;  %v594_v41 = vmul.f32 %v1240_v47, %v1152_v11 }
  0x2c   : > { %907 = vmatpush.msrb.mxu2 %v1087_v0  ;;  %930 = vmatpush.msrb.mxu3 %v1087_v0  ;;  %v733_v18 = vadd.f32 %v709_v51, %v660_v46  ;;  %v404_v35 = vadd.f32 %v374_v24, %v330_v21  ;;  %v464_v40 = vsel %vm297_vm0, %v462_v16, %v463_v25 }
  0x2d   : > { %861 = vmatpush.msrb.mxu0 %v1087_v0  ;;  %884 = vmatpush.msrb.mxu1 %v1087_v0  ;;  %v537_v0 = vsel %vm371_vm1, %v535_v27, %v536_v28  ;;  %v625_v45 = vrot.slane %v593_v39, 1  ;;  %v666_v48 = vmul.f32 %v1218_v37, %v1149_v10  ;;  %v626_v54 = vrot.slane %v594_v41, 1 }
  0x2e   : > { %908 = vmatpush.msrb.mxu2 %v1092_v1  ;;  %931 = vmatpush.msrb.mxu3 %v1092_v1  ;;  %v1413_v50 = vadd.f32 %v1335_v55, %v733_v18  ;;  %v421_v51 = vadd.f32 %v413_v56, %v404_v35  ;;  %v249_v58 = vmul.f32 %v1135_v6, %v227_v42 }
  0x2f   : > { %862 = vmatpush.msrb.mxu0 %v1092_v1  ;;  %885 = vmatpush.msrb.mxu1 %v1092_v1  ;;  %v667_v1 = vmul.f32 %v1218_v37, %v1152_v11  ;;  %v698_v57 = vrot.slane %v666_v48, 2  ;;  %v267_v59 = vmul.f32 %v1138_v7, %v227_v42  ;;  %v268_v56 = vmul.f32 %v1138_v7, %v228_v53 }
  0x30   : > { %909 = vmatpush.msrb.mxu2 %v1099_v2  ;;  %932 = vmatpush.msrb.mxu3 %v1099_v2  ;;  %v494_v62 = vadd.f32 %v464_v40, %v421_v51  ;;  %v341_v5 = vmul.f32 %v1141_v8, %v227_v42  ;;  %v342_v17 = vmul.f32 %v1141_v8, %v228_v53  ;;  %v1460_v51 = vld [vmem:[%s1132_s10 + $0x60] sm:$0xff] }
  0x31   : > { %863 = vmatpush.msrb.mxu0 %v1099_v2  ;;  %886 = vmatpush.msrb.mxu1 %v1099_v2  ;;  %v699_v63 = vrot.slane %v667_v1, 2  ;;  %v627_v2 = vsel %vm297_vm0, %v625_v45, %v626_v54  ;;  %v301_v16 = vrot.slane %v267_v59, 1  ;;  %v414_v20 = vmul.f32 %v1144_v9, %v1149_v10 }
  0x32   : > { %910 = vmatpush.msrb.mxu2 %v1110_v3  ;;  %933 = vmatpush.msrb.mxu3 %v1110_v3  ;;  %v567_v46 = vadd.f32 %v537_v0, %v494_v62  ;;  %v302_v42 = vrot.slane %v268_v56, 1  ;;  %v375_v24 = vrot.slane %v341_v5, 2  ;;  %v432_v53 = vmul.f32 %v1155_v12, %v1149_v10 }
  0x33   : > { %864 = vmatpush.msrb.mxu0 %v1110_v3  ;;  %887 = vmatpush.msrb.mxu1 %v1110_v3  ;;  %v700_v21 = vsel %vm371_vm1, %v698_v57, %v699_v63  ;;  %v376_v3 = vrot.slane %v342_v17, 2  ;;  %v433_v25 = vmul.f32 %v1155_v12, %v1152_v11  ;;  %v505_v27 = vmul.f32 %v1158_v13, %v1149_v10 }
  0x34   : > { %911 = vmatpush.msrb.mxu2 %v1120_v4  ;;  %934 = vmatpush.msrb.mxu3 %v1120_v4  ;;  %v584_v28 = vadd.f32 %v576_v30, %v567_v46  ;;  %v303_v39 = vsel %vm297_vm0, %v301_v16, %v302_v42  ;;  %v465_v40 = vrot.slane %v432_v53, 1  ;;  %v595_v48 = vmul.f32 %v1240_v47, %v1168_v15  ;;  %v1493_v46 = vld [vmem:[%s1132_s10 + $0x70] sm:$0xff]  ;;  %v1503_v53 = vld [vmem:[%s1132_s10 + $0x78] sm:$0x3] }
  0x35   : > { %865 = vmatpush.msrb.mxu0 %v1120_v4  ;;  %888 = vmatpush.msrb.mxu1 %v1120_v4  ;;  %v506_v4 = vmul.f32 %v1158_v13, %v1152_v11  ;;  %v331_v18 = vadd.f32 %v303_v39, %v249_v58  ;;  %v377_v35 = vsel %vm371_vm1, %v375_v24, %v376_v3  ;;  %v466_v10 = vrot.slane %v433_v25, 1  ;;  %v1468_v58 = vld [vmem:[%s1132_s10 + $0x68] sm:$0x3] }
  0x36   : > { %912 = vmatpush.msrb.mxu2 %v1163_v14  ;;  %935 = vmatpush.msrb.mxu3 %v1163_v14  ;;  %v657_v30 = vadd.f32 %v627_v2, %v584_v28  ;;  %v538_v0 = vrot.slane %v505_v27, 2  ;;  %v577_v11 = vmul.f32 %v1213_v36, %v1168_v15  ;;  %v596_v57 = vmul.f32 %v1240_v47, %v1179_v19 }
  0x37   : > { %866 = vmatpush.msrb.mxu0 %v1163_v14  ;;  %889 = vmatpush.msrb.mxu1 %v1163_v14  ;;  %v539_v41 = vrot.slane %v506_v4, 2  ;;  %v405_v14 = vadd.f32 %v377_v35, %v331_v18  ;;  %v467_v45 = vsel %vm297_vm0, %v465_v40, %v466_v10  ;;  %v628_v59 = vrot.slane %v595_v48, 1  ;;  %v241_v40 = vld [vmem:[%s1132_s10 + $0x80] sm:$0xff]  ;;  %v242_v48 = vld [vmem:[%s1132_s10 + $0x88] sm:$0x3] }
  0x38   : > { %913 = vmatpush.msrb.mxu2 %v1190_v23  ;;  %936 = vmatpush.msrb.mxu3 %v1190_v23  ;;  %v730_v1 = vadd.f32 %v700_v21, %v657_v30  ;;  %v668_v62 = vmul.f32 %v1218_v37, %v1168_v15  ;;  %v669_v63 = vmul.f32 %v1218_v37, %v1179_v19  ;;  %v629_v5 = vrot.slane %v596_v57, 1 }
  0x39   : > { %867 = vmatpush.msrb.mxu0 %v1190_v23  ;;  %890 = vmatpush.msrb.mxu1 %v1190_v23  ;;  %v540_v54 = vsel %vm371_vm1, %v538_v0, %v539_v41  ;;  %v422_v23 = vadd.f32 %v414_v20, %v405_v14  ;;  %v277_v2 = vmul.f32 %v1138_v7, %v1460_v51 }
  0x3a   : > { %914 = vmatpush.msrb.mxu2 %v1207_v32  ;;  %937 = vmatpush.msrb.mxu3 %v1207_v32  ;;  %v1479_v56 = vadd.f32 %v1335_v55, %v730_v1  ;;  %v701_v19 = vrot.slane %v668_v62, 2  ;;  %v702_v16 = vrot.slane %v669_v63, 2  ;;  %v278_v17 = vmul.f32 %v1138_v7, %v1468_v58 }
  0x3b   : > { %868 = vmatpush.msrb.mxu0 %v1207_v32  ;;  %891 = vmatpush.msrb.mxu1 %v1207_v32  ;;  %v254_v32 = vmul.f32 %v1135_v6, %v1460_v51  ;;  %v495_v15 = vadd.f32 %v467_v45, %v422_v23  ;;  %v630_v20 = vsel %vm297_vm0, %v628_v59, %v629_v5  ;;  %v316_v21 = vrot.slane %v277_v2, 1 }
  0x3c   : > { %915 = vmatpush.msrb.mxu2 %v1229_v43  ;;  %938 = vmatpush.msrb.mxu3 %v1229_v43  ;;  %v351_v42 = vmul.f32 %v1141_v8, %v1460_v51  ;;  %v703_v3 = vsel %vm371_vm1, %v701_v19, %v702_v16  ;;  %v317_v25 = vrot.slane %v278_v17, 1  ;;  %v419_v27 = vmul.f32 %v1144_v9, %v1493_v46 }
  0x3d   : > { %869 = vmatpush.msrb.mxu0 %v1229_v43  ;;  %892 = vmatpush.msrb.mxu1 %v1229_v43  ;;  %v352_v43 = vmul.f32 %v1141_v8, %v1468_v58  ;;  %v568_v24 = vadd.f32 %v540_v54, %v495_v15  ;;  %v515_v35 = vmul.f32 %v1158_v13, %v1493_v46 }
  0x3e   : > { %916 = vmatpush.msrb.mxu2 %v1252_v52  ;;  %939 = vmatpush.msrb.mxu3 %v1252_v52  ;;  %v390_v28 = vrot.slane %v351_v42, 2  ;;  %v318_v18 = vsel %vm297_vm0, %v316_v21, %v317_v25  ;;  %v582_v45 = vmul.f32 %v1213_v36, %v241_v40  ;;  %v605_v57 = vmul.f32 %v1240_v47, %v241_v40 }
  0x3f   : > { %831 = vmatmul.f32.vlgmr.msra.gmra.mxu2 %v1368_v31  ;;  %854 = vmatmul.f32.vlgmr.msra.gmra.mxu3 %v1413_v50  ;;  %v391_v39 = vrot.slane %v352_v43, 2  ;;  %v442_v31 = vmul.f32 %v1155_v12, %v1493_v46  ;;  %v443_v50 = vmul.f32 %v1155_v12, %v1503_v53  ;;  %v585_v4 = vadd.f32 %v577_v11, %v568_v24 }
  0x40   : > { %917 = vmatpush.msrb.mxu2 %v1271_v61  ;;  %940 = vmatpush.msrb.mxu3 %v1271_v61  ;;  %v336_v10 = vadd.f32 %v318_v18, %v254_v32  ;;  %v516_v11 = vmul.f32 %v1158_v13, %v1503_v53  ;;  %v553_v14 = vrot.slane %v515_v35, 2  ;;  %v606_v59 = vmul.f32 %v1240_v47, %v242_v48  ;;  %v244_v35 = vld [vmem:[%s1132_s10 + $0x98] sm:$0x3] }
  0x41   : > { %870 = vmatpush.msrb.mxu0 %v1252_v52  ;;  %893 = vmatpush.msrb.mxu1 %v1252_v52  ;;  %v392_v30 = vsel %vm371_vm1, %v390_v28, %v391_v39  ;;  %v480_v0 = vrot.slane %v442_v31, 1  ;;  %v481_v41 = vrot.slane %v443_v50, 1  ;;  %v658_v52 = vadd.f32 %v630_v20, %v585_v4  ;;  %v243_v28 = vld [vmem:[%s1132_s10 + $0x90] sm:$0xff] }
  0x42   : > { %918 = vmatpush.msrb.mxu2 %v1285_v22  ;;  %941 = vmatpush.msrb.mxu3 %v1285_v22  ;;  %v410_v1 = vadd.f32 %v392_v30, %v336_v10  ;;  %v554_v23 = vrot.slane %v516_v11, 2  ;;  %v678_v62 = vmul.f32 %v1218_v37, %v241_v40  ;;  %v643_v5 = vrot.slane %v605_v57, 1 }
  0x43   : > { %871 = vmatpush.msrb.mxu0 %v1271_v61  ;;  %894 = vmatpush.msrb.mxu1 %v1271_v61  ;;  %v482_v54 = vsel %vm297_vm0, %v480_v0, %v481_v41  ;;  %v731_v61 = vadd.f32 %v703_v3, %v658_v52  ;;  %v679_v32 = vmul.f32 %v1218_v37, %v242_v48  ;;  %v644_v19 = vrot.slane %v606_v59, 1 }
  0x44   : > { %919 = vmatpush.msrb.mxu2 %v1303_v33  ;;  %942 = vmatpush.msrb.mxu3 %v1303_v33  ;;  %v427_v63 = vadd.f32 %v419_v27, %v410_v1  ;;  %v255_v2 = vmul.f32 %v1135_v6, %v1493_v46  ;;  %v555_v15 = vsel %vm371_vm1, %v553_v14, %v554_v23  ;;  %v716_v16 = vrot.slane %v678_v62, 2 }
  0x45   : > { %872 = vmatpush.msrb.mxu0 %v1285_v22  ;;  %895 = vmatpush.msrb.mxu1 %v1285_v22  ;;  %v743_v22 = vadd.f32 %v1335_v55, %v731_v61  ;;  %v717_v20 = vrot.slane %v679_v32, 2  ;;  %v279_v21 = vmul.f32 %v1138_v7, %v1493_v46  ;;  %v645_v42 = vsel %vm297_vm0, %v643_v5, %v644_v19 }
  0x46   : > { %920 = vmatpush.msrb.mxu2 %v1322_v49  ;;  %943 = vmatpush.msrb.mxu3 %v1322_v49  ;;  %v500_v17 = vadd.f32 %v482_v54, %v427_v63  ;;  %v354_v43 = vmul.f32 %v1141_v8, %v1503_v53  ;;  %v420_v50 = vmul.f32 %v1144_v9, %v241_v40 }
  0x47   : > { %786 = vmatmul.f32.vlgmr.msra.gmra.mxu0 %v1479_v56  ;;  %896 = vmatpush.msrb.mxu1 %v1303_v33  ;;  %v280_v56 = vmul.f32 %v1138_v7, %v1503_v53  ;;  %v718_v3 = vsel %vm371_vm1, %v716_v16, %v717_v20  ;;  %v319_v25 = vrot.slane %v279_v21, 1  ;;  %v444_v4 = vmul.f32 %v1155_v12, %v241_v40 }
  0x48   : > { %921 = vmatpush.msrb.mxu2 %v1343_v60  ;;  %944 = vmatpush.msrb.mxu3 %v1343_v60  ;;  %v573_v24 = vadd.f32 %v555_v15, %v500_v17  ;;  %v394_v31 = vrot.slane %v354_v43, 2  ;;  %v445_v30 = vmul.f32 %v1155_v12, %v242_v48  ;;  %v517_v0 = vmul.f32 %v1158_v13, %v241_v40 }
  0x49   : > { %873 = vmatpush.msrb.mxu0 %v1303_v33  ;;  %808 = vmatmul.f32.vlgmr.msra.gmra.mxu1 %v743_v22  ;;  %v353_v33 = vmul.f32 %v1141_v8, %v1493_v46  ;;  %v320_v27 = vrot.slane %v280_v56, 1  ;;  %v483_v52 = vrot.slane %v444_v4, 1  ;;  %v518_v11 = vmul.f32 %v1158_v13, %v242_v48 }
  0x4a   : > { %922 = vmatpush.msrb.mxu2 %v1359_v26  ;;  %945 = vmatpush.msrb.mxu3 %v1359_v26  ;;  %v590_v18 = vadd.f32 %v582_v45, %v573_v24  ;;  %v484_v1 = vrot.slane %v445_v30, 1  ;;  %v556_v45 = vrot.slane %v517_v0, 2  ;;  %v583_v54 = vmul.f32 %v1213_v36, %v243_v28 }
  0x4b   : > { %874 = vmatpush.msrb.mxu0 %v1322_v49  ;;  %897 = vmatpush.msrb.mxu1 %v1322_v49  ;;  %v393_v39 = vrot.slane %v353_v33, 2  ;;  %v321_v10 = vsel %vm297_vm0, %v319_v25, %v320_v27  ;;  %v557_v61 = vrot.slane %v518_v11, 2  ;;  %v607_v40 = vmul.f32 %v1240_v47, %v243_v28 }
  0x4c   : > { %v337_v41 = vadd.f32 %v321_v10, %v255_v2  ;;  %v663_v14 = vadd.f32 %v645_v42, %v590_v18  ;;  %v608_v23 = vmul.f32 %v1240_v47, %v244_v35  ;;  %v485_v48 = vsel %vm297_vm0, %v483_v52, %v484_v1 }
  0x4d   : > { %875 = vmatpush.msrb.mxu0 %v1343_v60  ;;  %v395_v49 = vsel %vm371_vm1, %v393_v39, %v394_v31  ;;  %898 = vmatpush.msrb.mxu1 %v1343_v60  ;;  %v680_v60 = vmul.f32 %v1218_v37, %v243_v28  ;;  %v681_v62 = vmul.f32 %v1218_v37, %v244_v35  ;;  %v646_v32 = vrot.slane %v607_v40, 1 }
  0x4e   : > { %v411_v57 = vadd.f32 %v395_v49, %v337_v41  ;;  %v736_v59 = vadd.f32 %v718_v3, %v663_v14  ;;  %v558_v5 = vsel %vm371_vm1, %v556_v45, %v557_v61  ;;  %v647_v2 = vrot.slane %v608_v23, 1 }
  0x4f   : > { %876 = vmatpush.msrb.mxu0 %v1359_v26  ;;  %899 = vmatpush.msrb.mxu1 %v1359_v26  ;;  %v719_v15 = vrot.slane %v680_v60, 2  ;;  %v720_v19 = vrot.slane %v681_v62, 2  ;;  %v252_v16 = vmul.f32 %v1135_v6, %v1223_v38  ;;  %v273_v20 = vmul.f32 %v1138_v7, %v1223_v38 }
  0x50   : > { %v428_v63 = vadd.f32 %v420_v50, %v411_v57  ;;  %v748_v22 = vadd.f32 %v1335_v55, %v736_v59  ;;  %v648_v17 = vsel %vm297_vm0, %v646_v32, %v647_v2  ;;  %v274_v21 = vmul.f32 %v1138_v7, %v1234_v44 }
  0x51   : > { %v721_v56 = vsel %vm371_vm1, %v719_v15, %v720_v19  ;;  %v347_v42 = vmul.f32 %v1141_v8, %v1223_v38  ;;  %v348_v33 = vmul.f32 %v1141_v8, %v1234_v44  ;;  %v417_v43 = vmul.f32 %v1144_v9, %v1295_v29 }
  0x52   : > { %v501_v26 = vadd.f32 %v485_v48, %v428_v63  ;;  %923 = vmatmul.f32.vlgmr.msrb.gmra.mxu2 %v748_v22  ;;  %v310_v3 = vrot.slane %v273_v20, 1  ;;  %v311_v25 = vrot.slane %v274_v21, 1  ;;  %v438_v27 = vmul.f32 %v1155_v12, %v1295_v29 }
  0x53   : > { %v384_v28 = vrot.slane %v347_v42, 2  ;;  %v385_v39 = vrot.slane %v348_v33, 2  ;;  %v439_v31 = vmul.f32 %v1155_v12, %v1308_v34  ;;  %v511_v38 = vmul.f32 %v1158_v13, %v1295_v29 }
  0x54   : > { %v574_v24 = vadd.f32 %v558_v5, %v501_v26  ;;  %v312_v44 = vsel %vm297_vm0, %v310_v3, %v311_v25  ;;  %v474_v4 = vrot.slane %v438_v27, 1  ;;  %v512_v18 = vmul.f32 %v1158_v13, %v1308_v34 }
  0x55   : > { %v334_v35 = vadd.f32 %v312_v44, %v252_v16  ;;  %v386_v10 = vsel %vm371_vm1, %v384_v28, %v385_v39  ;;  %v475_v30 = vrot.slane %v439_v31, 1  ;;  %v547_v0 = vrot.slane %v511_v38, 2 }
  0x56   : > { %v591_v50 = vadd.f32 %v583_v54, %v574_v24  ;;  %v548_v49 = vrot.slane %v512_v18, 2  ;;  %v601_v52 = vmul.f32 %v1240_v47, %v1460_v51  ;;  %v580_v14 = vmul.f32 %v1213_v36, %v1460_v51 }
  0x57   : > { %v408_v11 = vadd.f32 %v386_v10, %v334_v35  ;;  %v602_v1 = vmul.f32 %v1240_v47, %v1468_v58  ;;  %v674_v45 = vmul.f32 %v1218_v37, %v1460_v51  ;;  %v476_v57 = vsel %vm297_vm0, %v474_v4, %v475_v30 }
  0x58   : > { %v664_v41 = vadd.f32 %v648_v17, %v591_v50  ;;  %v637_v61 = vrot.slane %v601_v52, 1  ;;  %v675_v40 = vmul.f32 %v1218_v37, %v1468_v58  ;;  %v549_v59 = vsel %vm371_vm1, %v547_v0, %v548_v49 }
  0x59   : > { %v425_v23 = vadd.f32 %v417_v43, %v408_v11  ;;  %v638_v48 = vrot.slane %v602_v1, 1  ;;  %v710_v60 = vrot.slane %v674_v45, 2  ;;  %v253_v63 = vmul.f32 %v1135_v6, %v1295_v29  ;;  %v1037_v45 = vld [vmem:[%s1672_s4] ss:$0 sm:$0xff] }
  0x5a   : > { %v737_v54 = vadd.f32 %v721_v56, %v664_v41  ;;  %v275_v5 = vmul.f32 %v1138_v7, %v1295_v29  ;;  %v276_v32 = vmul.f32 %v1138_v7, %v1308_v34  ;;  %v711_v22 = vrot.slane %v675_v40, 2 }
  0x5b   : > { %v498_v2 = vadd.f32 %v476_v57, %v425_v23  ;;  %v349_v15 = vmul.f32 %v1141_v8, %v1295_v29  ;;  %v350_v19 = vmul.f32 %v1141_v8, %v1308_v34  ;;  %v639_v16 = vsel %vm297_vm0, %v637_v61, %v638_v48 }
  0x5c   : > { %v749_v62 = vadd.f32 %v1335_v55, %v737_v54  ;;  %v313_v26 = vrot.slane %v275_v5, 1  ;;  %v314_v17 = vrot.slane %v276_v32, 1  ;;  %v418_v6 = vmul.f32 %v1144_v9, %v1460_v51 }
  0x5d   : > { %v571_v20 = vadd.f32 %v549_v59, %v498_v2  ;;  %v387_v21 = vrot.slane %v349_v15, 2  ;;  %v388_v56 = vrot.slane %v350_v19, 2  ;;  %v440_v7 = vmul.f32 %v1155_v12, %v1460_v51 }
  0x5e   : > { %946 = vmatmul.f32.vlgmr.msrb.gmra.mxu3 %v749_v62  ;;  %v315_v42 = vsel %vm297_vm0, %v313_v26, %v314_v17  ;;  %v441_v29 = vmul.f32 %v1155_v12, %v1468_v58  ;;  %v513_v8 = vmul.f32 %v1158_v13, %v1460_v51  ;;  %v514_v34 = vmul.f32 %v1158_v13, %v1468_v58 }
  0x5f   : > { %v588_v33 = vadd.f32 %v580_v14, %v571_v20  ;;  %v335_v43 = vadd.f32 %v315_v42, %v253_v63  ;;  %v389_v9 = vsel %vm371_vm1, %v387_v21, %v388_v56  ;;  %v477_v24 = vrot.slane %v440_v7, 1 }
  0x60   : > { %v712_v3 = vsel %vm371_vm1, %v710_v60, %v711_v22  ;;  %v478_v25 = vrot.slane %v441_v29, 1  ;;  %v550_v27 = vrot.slane %v513_v8, 2  ;;  %v551_v28 = vrot.slane %v514_v34, 2 }
  0x61   : > { %v661_v39 = vadd.f32 %v639_v16, %v588_v33  ;;  %v409_v31 = vadd.f32 %v389_v9, %v335_v43  ;;  %v603_v12 = vmul.f32 %v1240_v47, %v1493_v46  ;;  %v604_v51 = vmul.f32 %v1240_v47, %v1503_v53 }
  0x62   : > { %v479_v13 = vsel %vm297_vm0, %v477_v24, %v478_v25  ;;  %v676_v58 = vmul.f32 %v1218_v37, %v1493_v46  ;;  %v677_v38 = vmul.f32 %v1218_v37, %v1503_v53  ;;  %v552_v4 = vsel %vm371_vm1, %v550_v27, %v551_v28 }
  0x63   : > { %v734_v50 = vadd.f32 %v712_v3, %v661_v39  ;;  %v426_v44 = vadd.f32 %v418_v6, %v409_v31  ;;  %v640_v18 = vrot.slane %v603_v12, 1  ;;  %v641_v35 = vrot.slane %v604_v51, 1 }
  0x64   : > { %v581_v47 = vmul.f32 %v1213_v36, %v1493_v46  ;;  %v713_v0 = vrot.slane %v676_v58, 2  ;;  %v714_v41 = vrot.slane %v677_v38, 2 }
  0x65   : > { %v746_v10 = vadd.f32 %v1335_v55, %v734_v50  ;;  %v499_v30 = vadd.f32 %v479_v13, %v426_v44  ;;  %v642_v52 = vsel %vm297_vm0, %v640_v18, %v641_v35 }
  0x66   : > { %v715_v53 = vsel %vm371_vm1, %v713_v0, %v714_v41 }
  0x67   : > { %877 = vmatmul.f32.vlgmr.msrb.gmra.mxu0 %v746_v10  ;;  %v572_v49 = vadd.f32 %v552_v4, %v499_v30 }
  0x69   : > { %v589_v37 = vadd.f32 %v581_v47, %v572_v49 }
  0x6b   : > { %v662_v11 = vadd.f32 %v642_v52, %v589_v37 }
  0x6d   : > { %v735_v14 = vadd.f32 %v715_v53, %v662_v11 }
  0x6f   : > { %v747_v1 = vadd.f32 %v1335_v55, %v735_v14 }
  0x71   : > { %900 = vmatmul.f32.vlgmr.msrb.gmra.mxu1 %v747_v1 }
  0xc2   : > { %v832_v36 = vpop.f32.mrf.mxu2  ;;  %v855_v46 = vpop.f32.mrf.mxu3 }
  0xc3   : > { %v833_v54 = vadd.f32 %v1037_v45, %v832_v36  ;;  %v856_v57 = vadd.f32 %v1037_v45, %v855_v46 }
  0xc4   : > { %v787_v61 = vpop.f32.mrf.mxu0 }
  0xc5   : > { %v788_v40 = vadd.f32 %v1037_v45, %v787_v61  ;;  %v835_v23 = vmax.f32 %v833_v54, 0.0  ;;  %v858_v59 = vmax.f32 %v856_v57, 0.0 }
  0xc6   : > { %v809_v48 = vpop.f32.mrf.mxu1 }
  0xc7   : > { %v790_v55 = vmax.f32 %v788_v40, 0.0  ;;  %v810_v60 = vadd.f32 %v1037_v45, %v809_v48  ;;  %1017 = vst [vmem:[%s224_s21 + $0x10] sm:$0xff] %v835_v23 }
  0xc8   : > { %1018 = vst [vmem:[%s224_s21 + $0x18] sm:$0xff] %v858_v59 }
  0xc9   : > { %791 = vst [vmem:[%s224_s21] sm:$0xff] %v790_v55  ;;  %v812_v62 = vmax.f32 %v810_v60, 0.0 }
  0xcb   : > { %1016 = vst [vmem:[%s224_s21 + $0x8] sm:$0xff] %v812_v62 }
  0xd5   : > { %v924_v63 = vpop.f32.mrf.mxu2 }
  0xd6   : > { %v925_v5 = vadd.f32 %v1037_v45, %v924_v63 }
  0xd8   : > { %v927_v32 = vmax.f32 %v925_v5, 0.0 }
  0xda   : > { %1021 = vst [vmem:[%s224_s21 + $0x30] sm:$0xff] %v927_v32 }
  0xe1   : > { %v947_v2 = vpop.f32.mrf.mxu3 }
  0xe2   : > { %v948_v22 = vadd.f32 %v1037_v45, %v947_v2 }
  0xe4   : > { %v950_v15 = vmax.f32 %v948_v22, 0.0  ;;  %v878_v19 = vpop.f32.mrf.mxu0 }
  0xe5   : > { %v879_v16 = vadd.f32 %v1037_v45, %v878_v19 }
  0xe6   : > { %1022 = vst [vmem:[%s224_s21 + $0x38] sm:$0xff] %v950_v15 }
  0xe7   : > { %v881_v26 = vmax.f32 %v879_v16, 0.0 }
  0xe9   : > { %1019 = vst [vmem:[%s224_s21 + $0x20] sm:$0xff] %v881_v26 }
  0xee   : > { %v901_v17 = vpop.f32.mrf.mxu1 }
  0xef   : > { %v902_v6 = vadd.f32 %v1037_v45, %v901_v17 }
  0xf1   : > { %v904_v20 = vmax.f32 %v902_v6, 0.0 }
  0xf3   : > { %1020 = vst [vmem:[%s224_s21 + $0x28] sm:$0xff] %v904_v20 }
  0xf4 PF: > { %s15_s18 = sadd.s32 1, %s1044_s18  }
  0xf5   : > { %p12_p4 = scmp.ge.s32.totalorder %s15_s18, 4  }
  0xf7   :  { %14 = sbr.rel (!%p12_p4) target bundleno = 1 (0x1), region = 77 }

// kernel: newelppm_forward.27
= control target key start
LH: loop header
LB: loop body
LE: loop exit
PB: predicated region body
PF: predicated region fallthrough
CT: control target
= control target key end

     0   :  { %s919_s12 = smov 0   ;;  %s1067_s0 = inlined_call_operand.vmem [shape: f32[16,8], index: 0, kind: input, shape index: {}]   ;;  %s1068_s1 = inlined_call_operand.vmem [shape: f32[2,16,8,128], index: 1, kind: input, shape index: {}]   ;;  %s1069_s2 = inlined_call_operand.vmem [shape: f32[2,16,16,128], index: 2, kind: input, shape index: {}]   ;;  %s1070_s3 = inlined_call_operand.vmem [shape: f32[2,16,16,128], index: 3, kind: output, shape index: {}]  }
   0x1 LB: > { %s760_s13 = sadd.s32 4294967295, %s897_s12   ;;  %p764_p0 = scmp.ge.s32.totalorder %s897_s12, 1  ;;  %s897_s12 = sphi %s919_s12, %s13_s12  }
   0x2   : > { %p147_p1 = scmp.lt.s32.totalorder %s897_s12, 3 }
   0x4   : > { %p148_p2 = pnand %p764_p0, %p147_p1 }
   0x5   : > { %p176_p3 = scmp.lt.s32.totalorder (!%p148_p2), %s760_s13, 1 }
   0x6   : > { %151 = sbr.rel (%p148_p2) target bundleno = 208 (0xd0), region = 32 }
   0xb   : > { %s1072_s13 = smov (!%p176_p3, %s760_s13), 1  ;;  %v191_v0 = vld [vmem:[%s1067_s0] sm:$0xff]  ;;  %vm196_vm0 = vcmask 64512   ;;  %v192_v13 = vld [vmem:[%s1067_s0 + $0x8] sm:$0xff] }
   0xc   : > { %s880_s14 = sshll.u32 %s1072_s13, 7  ;;  %s881_s22 = sshll.u32 %s1072_s13, 8 }
   0xd   : > { %s933_s17 = scalar_lea.vmem %s1068_s1, %s880_s14  ;;  %s993_s25 = scalar_lea.vmem %s1069_s2, %s881_s22 }
   0xe   : > { %v780_v1 = vld [vmem:[%s933_s17 + $0x10] sm:$0xff]  ;;  %v787_v2 = vld [vmem:[%s933_s17 + $0x18] sm:$0xff]  ;;  %v193_v5 = vld [vmem:[%s933_s17] sm:$0xff]  ;;  %s1000_s28 = scalar_lea.vmem %s1070_s3, %s881_s22 }
   0xf   : > { %v808_v3 = vld [vmem:[%s933_s17 + $0x30] sm:$0xff]  ;;  %279 = vmatpush.msra.mxu2 %v780_v1  ;;  %310 = vmatpush.msra.mxu3 %v787_v2  ;;  %v815_v4 = vld [vmem:[%s933_s17 + $0x38] sm:$0xff]  ;;  %v773_v6 = vld [vmem:[%s933_s17 + $0x8] sm:$0xff] }
  0x10   : > { %783 = vmatmul.msk.f32.vlgmr.msra.gmra.mxu2 %vm196_vm0, %v191_v0  ;;  %790 = vmatmul.msk.f32.vlgmr.msra.gmra.mxu3 %vm196_vm0, %v191_v0  ;;  %v794_v7 = vld [vmem:[%s933_s17 + $0x20] sm:$0xff]  ;;  %v801_v8 = vld [vmem:[%s933_s17 + $0x28] sm:$0xff]  ;;  %v836_v9 = vld [vmem:[%s933_s17 + $0x50] sm:$0xff] }
  0x11   : > { %403 = vmatpush.msrb.mxu2 %v808_v3  ;;  %434 = vmatpush.msrb.mxu3 %v815_v4  ;;  %v843_v10 = vld [vmem:[%s933_s17 + $0x58] sm:$0xff]  ;;  %v822_v11 = vld [vmem:[%s933_s17 + $0x40] sm:$0xff]  ;;  %v829_v12 = vld [vmem:[%s933_s17 + $0x48] sm:$0xff] }
  0x12   : > { %218 = vmatpush.msra.mxu0 %v193_v5  ;;  %248 = vmatpush.msra.mxu1 %v773_v6  ;;  %v864_v14 = vld [vmem:[%s933_s17 + $0x70] sm:$0xff]  ;;  %v871_v15 = vld [vmem:[%s933_s17 + $0x78] sm:$0xff]  ;;  %v850_v16 = vld [vmem:[%s933_s17 + $0x60] sm:$0xff] }
  0x13   : > { %771 = vmatmul.msk.f32.vlgmr.msra.gmra.mxu0 %vm196_vm0, %v191_v0  ;;  %776 = vmatmul.msk.f32.vlgmr.msra.gmra.mxu1 %vm196_vm0, %v191_v0  ;;  %v857_v17 = vld [vmem:[%s933_s17 + $0x68] sm:$0xff]  ;;  %v194_v18 = vld [vmem:[%s993_s25] sm:$0xff]  ;;  %v774_v19 = vld [vmem:[%s993_s25 + $0x10] sm:$0xff] }
  0x14   : > { %341 = vmatpush.msrb.mxu0 %v794_v7  ;;  %372 = vmatpush.msrb.mxu1 %v801_v8  ;;  %v781_v24 = vld [vmem:[%s993_s25 + $0x20] sm:$0xff]  ;;  %v788_v25 = vld [vmem:[%s993_s25 + $0x30] sm:$0xff]  ;;  %v195_v30 = vld [vmem:[%s993_s25 + $0x8] sm:$0xff] }
  0x15   : > { %527 = vmatpush.msra.mxu2 %v836_v9  ;;  %558 = vmatpush.msra.mxu3 %v843_v10  ;;  %v775_v31 = vld [vmem:[%s993_s25 + $0x18] sm:$0xff]  ;;  %v782_v36 = vld [vmem:[%s993_s25 + $0x28] sm:$0xff]  ;;  %v795_v42 = vld [vmem:[%s993_s25 + $0x40] sm:$0xff] }
  0x16   : > { %465 = vmatpush.msra.mxu0 %v822_v11  ;;  %496 = vmatpush.msra.mxu1 %v829_v12  ;;  %v789_v37 = vld [vmem:[%s993_s25 + $0x38] sm:$0xff]  ;;  %v802_v43 = vld [vmem:[%s993_s25 + $0x50] sm:$0xff]  ;;  %v809_v48 = vld [vmem:[%s993_s25 + $0x60] sm:$0xff] }
  0x17   : > { %v816_v49 = vld [vmem:[%s993_s25 + $0x70] sm:$0xff]  ;;  %v796_v54 = vld [vmem:[%s993_s25 + $0x48] sm:$0xff]  ;;  %v803_v55 = vld [vmem:[%s993_s25 + $0x58] sm:$0xff] }
  0x18   : > { %784 = vmatmul.msk.f32.gmra.mxu2 %vm196_vm0, %v192_v13  ;;  %791 = vmatmul.msk.f32.gmra.mxu3 %vm196_vm0, %v192_v13  ;;  %v810_v60 = vld [vmem:[%s993_s25 + $0x68] sm:$0xff]  ;;  %v817_v61 = vld [vmem:[%s993_s25 + $0x78] sm:$0xff]  ;;  %v823_v2 = vld [vmem:[%s993_s25 + $0x80] sm:$0xff] }
  0x19   : > { %v830_v3 = vld [vmem:[%s993_s25 + $0x90] sm:$0xff]  ;;  %v837_v8 = vld [vmem:[%s993_s25 + $0xa0] sm:$0xff] }
  0x1a   : > { %v844_v9 = vld [vmem:[%s993_s25 + $0xb0] sm:$0xff] }
  0x1b   : > { %772 = vmatmul.msk.f32.gmra.mxu0 %vm196_vm0, %v192_v13  ;;  %777 = vmatmul.msk.f32.gmra.mxu1 %vm196_vm0, %v192_v13 }
  0x20   : > { %811 = vmatmul.msk.f32.vlgmr.msrb.gmra.mxu2 %vm196_vm0, %v191_v0  ;;  %818 = vmatmul.msk.f32.vlgmr.msrb.gmra.mxu3 %vm196_vm0, %v191_v0 }
  0x21   : > { %651 = vmatpush.msrb.mxu2 %v864_v14  ;;  %682 = vmatpush.msrb.mxu3 %v871_v15  ;;  %v824_v14 = vld [vmem:[%s993_s25 + $0x88] sm:$0xff]  ;;  %v831_v15 = vld [vmem:[%s993_s25 + $0x98] sm:$0xff] }
  0x23   : > { %797 = vmatmul.msk.f32.vlgmr.msrb.gmra.mxu0 %vm196_vm0, %v191_v0  ;;  %804 = vmatmul.msk.f32.vlgmr.msrb.gmra.mxu1 %vm196_vm0, %v191_v0 }
  0x24   : > { %589 = vmatpush.msrb.mxu0 %v850_v16  ;;  %620 = vmatpush.msrb.mxu1 %v857_v17 }
  0x28   : > { %812 = vmatmul.msk.f32.gmra.mxu2 %vm196_vm0, %v192_v13  ;;  %819 = vmatmul.msk.f32.gmra.mxu3 %vm196_vm0, %v192_v13 }
  0x2b   : > { %798 = vmatmul.msk.f32.gmra.mxu0 %vm196_vm0, %v192_v13  ;;  %805 = vmatmul.msk.f32.gmra.mxu1 %vm196_vm0, %v192_v13 }
  0x30   : > { %839 = vmatmul.msk.f32.vlgmr.msra.gmra.mxu2 %vm196_vm0, %v191_v0  ;;  %846 = vmatmul.msk.f32.vlgmr.msra.gmra.mxu3 %vm196_vm0, %v191_v0 }
  0x33   : > { %825 = vmatmul.msk.f32.vlgmr.msra.gmra.mxu0 %vm196_vm0, %v191_v0  ;;  %832 = vmatmul.msk.f32.vlgmr.msra.gmra.mxu1 %vm196_vm0, %v191_v0 }
  0x38   : > { %840 = vmatmul.msk.f32.gmra.mxu2 %vm196_vm0, %v192_v13  ;;  %847 = vmatmul.msk.f32.gmra.mxu3 %vm196_vm0, %v192_v13 }
  0x3b   : > { %826 = vmatmul.msk.f32.gmra.mxu0 %vm196_vm0, %v192_v13  ;;  %833 = vmatmul.msk.f32.gmra.mxu1 %vm196_vm0, %v192_v13 }
  0x40   : > { %867 = vmatmul.msk.f32.vlgmr.msrb.gmra.mxu2 %vm196_vm0, %v191_v0  ;;  %874 = vmatmul.msk.f32.vlgmr.msrb.gmra.mxu3 %vm196_vm0, %v191_v0 }
  0x43   : > { %853 = vmatmul.msk.f32.vlgmr.msrb.gmra.mxu0 %vm196_vm0, %v191_v0  ;;  %860 = vmatmul.msk.f32.vlgmr.msrb.gmra.mxu1 %vm196_vm0, %v191_v0 }
  0x48   : > { %868 = vmatmul.msk.f32.gmra.mxu2 %vm196_vm0, %v192_v13  ;;  %875 = vmatmul.msk.f32.gmra.mxu3 %vm196_vm0, %v192_v13 }
  0x4b   : > { %854 = vmatmul.msk.f32.gmra.mxu0 %vm196_vm0, %v192_v13  ;;  %861 = vmatmul.msk.f32.gmra.mxu1 %vm196_vm0, %v192_v13 }
  0x90   : > { %v220_v20 = vpop.f32.mrf.mxu0  ;;  %v250_v21 = vpop.f32.mrf.mxu1 }
  0x91   : > { %v221_v22 = vadd.f32 %v220_v20, %v194_v18  ;;  %v251_v23 = vadd.f32 %v774_v19, %v250_v21  ;;  %v838_v20 = vld [vmem:[%s993_s25 + $0xa8] sm:$0xff]  ;;  %v845_v21 = vld [vmem:[%s993_s25 + $0xb8] sm:$0xff] }
  0x93   : > { %226 = vst [vmem:[%s1000_s28] sm:$0xff] %v221_v22  ;;  %v281_v26 = vpop.f32.mrf.mxu2  ;;  %v312_v27 = vpop.f32.mrf.mxu3 }
  0x94   : > { %778 = vst [vmem:[%s1000_s28 + $0x10] sm:$0xff] %v251_v23  ;;  %v282_v28 = vadd.f32 %v781_v24, %v281_v26  ;;  %v313_v29 = vadd.f32 %v788_v25, %v312_v27  ;;  %v851_v26 = vld [vmem:[%s993_s25 + $0xc0] sm:$0xff]  ;;  %v858_v27 = vld [vmem:[%s993_s25 + $0xd0] sm:$0xff] }
  0x96   : > { %785 = vst [vmem:[%s1000_s28 + $0x20] sm:$0xff] %v282_v28 }
  0x97   : > { %792 = vst [vmem:[%s1000_s28 + $0x30] sm:$0xff] %v313_v29 }
  0x98   : > { %v223_v32 = vpop.f32.mrf.mxu0  ;;  %v253_v33 = vpop.f32.mrf.mxu1 }
  0x99   : > { %v224_v34 = vadd.f32 %v223_v32, %v195_v30  ;;  %v254_v35 = vadd.f32 %v775_v31, %v253_v33  ;;  %v865_v32 = vld [vmem:[%s993_s25 + $0xe0] sm:$0xff]  ;;  %v872_v33 = vld [vmem:[%s993_s25 + $0xf0] sm:$0xff] }
  0x9b   : > { %227 = vst [vmem:[%s1000_s28 + $0x8] sm:$0xff] %v224_v34  ;;  %v284_v38 = vpop.f32.mrf.mxu2  ;;  %v315_v39 = vpop.f32.mrf.mxu3 }
  0x9c   : > { %779 = vst [vmem:[%s1000_s28 + $0x18] sm:$0xff] %v254_v35  ;;  %v285_v40 = vadd.f32 %v782_v36, %v284_v38  ;;  %v316_v41 = vadd.f32 %v789_v37, %v315_v39  ;;  %v852_v38 = vld [vmem:[%s993_s25 + $0xc8] sm:$0xff]  ;;  %v859_v39 = vld [vmem:[%s993_s25 + $0xd8] sm:$0xff] }
  0x9e   : > { %786 = vst [vmem:[%s1000_s28 + $0x28] sm:$0xff] %v285_v40 }
  0x9f   : > { %793 = vst [vmem:[%s1000_s28 + $0x38] sm:$0xff] %v316_v41 }
  0xa0   : > { %v343_v44 = vpop.f32.mrf.mxu0  ;;  %v374_v45 = vpop.f32.mrf.mxu1 }
  0xa1   : > { %v344_v46 = vadd.f32 %v795_v42, %v343_v44  ;;  %v375_v47 = vadd.f32 %v802_v43, %v374_v45  ;;  %v866_v44 = vld [vmem:[%s993_s25 + $0xe8] sm:$0xff]  ;;  %v873_v45 = vld [vmem:[%s993_s25 + $0xf8] sm:$0xff] }
  0xa3   : > { %799 = vst [vmem:[%s1000_s28 + $0x40] sm:$0xff] %v344_v46  ;;  %v405_v50 = vpop.f32.mrf.mxu2  ;;  %v436_v51 = vpop.f32.mrf.mxu3 }
  0xa4   : > { %806 = vst [vmem:[%s1000_s28 + $0x50] sm:$0xff] %v375_v47  ;;  %v406_v52 = vadd.f32 %v809_v48, %v405_v50  ;;  %v437_v53 = vadd.f32 %v816_v49, %v436_v51 }
  0xa6   : > { %813 = vst [vmem:[%s1000_s28 + $0x60] sm:$0xff] %v406_v52 }
  0xa7   : > { %820 = vst [vmem:[%s1000_s28 + $0x70] sm:$0xff] %v437_v53 }
  0xa8   : > { %v346_v56 = vpop.f32.mrf.mxu0  ;;  %v377_v57 = vpop.f32.mrf.mxu1 }
  0xa9   : > { %v347_v58 = vadd.f32 %v796_v54, %v346_v56  ;;  %v378_v59 = vadd.f32 %v803_v55, %v377_v57 }
  0xab   : > { %800 = vst [vmem:[%s1000_s28 + $0x48] sm:$0xff] %v347_v58  ;;  %v408_v62 = vpop.f32.mrf.mxu2  ;;  %v439_v63 = vpop.f32.mrf.mxu3 }
  0xac   : > { %807 = vst [vmem:[%s1000_s28 + $0x58] sm:$0xff] %v378_v59  ;;  %v409_v0 = vadd.f32 %v810_v60, %v408_v62  ;;  %v440_v1 = vadd.f32 %v817_v61, %v439_v63 }
  0xae   : > { %814 = vst [vmem:[%s1000_s28 + $0x68] sm:$0xff] %v409_v0 }
  0xaf   : > { %821 = vst [vmem:[%s1000_s28 + $0x78] sm:$0xff] %v440_v1 }
  0xb0   : > { %v467_v4 = vpop.f32.mrf.mxu0  ;;  %v498_v5 = vpop.f32.mrf.mxu1 }
  0xb1   : > { %v468_v6 = vadd.f32 %v823_v2, %v467_v4  ;;  %v499_v7 = vadd.f32 %v830_v3, %v498_v5 }
  0xb3   : > { %827 = vst [vmem:[%s1000_s28 + $0x80] sm:$0xff] %v468_v6  ;;  %v529_v10 = vpop.f32.mrf.mxu2  ;;  %v560_v11 = vpop.f32.mrf.mxu3 }
  0xb4   : > { %834 = vst [vmem:[%s1000_s28 + $0x90] sm:$0xff] %v499_v7  ;;  %v530_v12 = vadd.f32 %v837_v8, %v529_v10  ;;  %v561_v13 = vadd.f32 %v844_v9, %v560_v11 }
  0xb6   : > { %841 = vst [vmem:[%s1000_s28 + $0xa0] sm:$0xff] %v530_v12 }
  0xb7   : > { %848 = vst [vmem:[%s1000_s28 + $0xb0] sm:$0xff] %v561_v13 }
  0xb8   : > { %v470_v16 = vpop.f32.mrf.mxu0  ;;  %v501_v17 = vpop.f32.mrf.mxu1 }
  0xb9   : > { %v471_v18 = vadd.f32 %v824_v14, %v470_v16  ;;  %v502_v19 = vadd.f32 %v831_v15, %v501_v17 }
  0xbb   : > { %828 = vst [vmem:[%s1000_s28 + $0x88] sm:$0xff] %v471_v18  ;;  %v532_v22 = vpop.f32.mrf.mxu2  ;;  %v563_v23 = vpop.f32.mrf.mxu3 }
  0xbc   : > { %835 = vst [vmem:[%s1000_s28 + $0x98] sm:$0xff] %v502_v19  ;;  %v533_v24 = vadd.f32 %v838_v20, %v532_v22  ;;  %v564_v25 = vadd.f32 %v845_v21, %v563_v23 }
  0xbe   : > { %842 = vst [vmem:[%s1000_s28 + $0xa8] sm:$0xff] %v533_v24 }
  0xbf   : > { %849 = vst [vmem:[%s1000_s28 + $0xb8] sm:$0xff] %v564_v25 }
  0xc0   : > { %v591_v28 = vpop.f32.mrf.mxu0  ;;  %v622_v29 = vpop.f32.mrf.mxu1 }
  0xc1   : > { %v592_v30 = vadd.f32 %v851_v26, %v591_v28  ;;  %v623_v31 = vadd.f32 %v858_v27, %v622_v29 }
  0xc3   : > { %855 = vst [vmem:[%s1000_s28 + $0xc0] sm:$0xff] %v592_v30  ;;  %v653_v34 = vpop.f32.mrf.mxu2  ;;  %v684_v35 = vpop.f32.mrf.mxu3 }
  0xc4   : > { %862 = vst [vmem:[%s1000_s28 + $0xd0] sm:$0xff] %v623_v31  ;;  %v654_v36 = vadd.f32 %v865_v32, %v653_v34  ;;  %v685_v37 = vadd.f32 %v872_v33, %v684_v35 }
  0xc6   : > { %869 = vst [vmem:[%s1000_s28 + $0xe0] sm:$0xff] %v654_v36 }
  0xc7   : > { %876 = vst [vmem:[%s1000_s28 + $0xf0] sm:$0xff] %v685_v37 }
  0xc8   : > { %v594_v40 = vpop.f32.mrf.mxu0  ;;  %v625_v41 = vpop.f32.mrf.mxu1 }
  0xc9   : > { %v595_v42 = vadd.f32 %v852_v38, %v594_v40  ;;  %v626_v43 = vadd.f32 %v859_v39, %v625_v41 }
  0xcb   : > { %856 = vst [vmem:[%s1000_s28 + $0xc8] sm:$0xff] %v595_v42  ;;  %v656_v46 = vpop.f32.mrf.mxu2  ;;  %v687_v47 = vpop.f32.mrf.mxu3 }
  0xcc   : > { %863 = vst [vmem:[%s1000_s28 + $0xd8] sm:$0xff] %v626_v43  ;;  %v657_v48 = vadd.f32 %v866_v44, %v656_v46  ;;  %v688_v49 = vadd.f32 %v873_v45, %v687_v47 }
  0xce   : > { %870 = vst [vmem:[%s1000_s28 + $0xe8] sm:$0xff] %v657_v48 }
  0xcf   : > { %877 = vst [vmem:[%s1000_s28 + $0xf8] sm:$0xff] %v688_v49 }
  0xd0 PF: > { %s13_s12 = sadd.s32 1, %s897_s12  }
  0xd1   : > { %p10_p4 = scmp.ge.s32.totalorder %s13_s12, 4  }
  0xd3   :  { %12 = sbr.rel (!%p10_p4) target bundleno = 1 (0x1), region = 110 }

</bundles_post_ra>
